<compile_context>
chip_gen: v7x
topology: tpu7x:2x2x1
jax: 0.10.0
libtpu: 0.0.40
codegen_flags: <defaults>
</compile_context>

<pallas_src>
import math

import jax
import jax.numpy as jnp
from jax.experimental import pallas as pl
from jax.experimental.pallas import tpu as pltpu

# ---------------- model hyper-params (small, consistent with the module) ----
B = 2            # batch
S_TGT = 8        # decoder (target) sequence length
S_SRC = 16       # encoder (source) sequence length
D_MODEL = 32
NUM_HEADS = 4
D_K = D_MODEL // NUM_HEADS
D_FF = 64
LN_EPS = 1e-5
NEG_INF = -1e9                    # torch uses masked_fill(mask==0, -1e9)
SCALE = 1.0 / math.sqrt(D_K)


# ---------------------------- fused Pallas kernel ----------------------------
def _decoder_layer_kernel(
    x_ref, enc_ref, tgt_add_ref, src_add_ref,
    sa_wqkv_ref, sa_bqkv_ref, sa_wo_ref, sa_bo_ref,
    ca_wq_ref, ca_bq_ref, ca_wkv_ref, ca_bkv_ref, ca_wo_ref, ca_bo_ref,
    ff_w1_ref, ff_b1_ref, ff_w2_ref, ff_b2_ref,
    ln1_g_ref, ln1_b_ref, ln2_g_ref, ln2_b_ref, ln3_g_ref, ln3_b_ref,
    o_ref, attn_scr,
):
    x = x_ref[...]                 # (B*S_TGT, D)
    enc = enc_ref[...]             # (B*S_SRC, D)

    def add_ln(a, r, g, beta):
        # LayerNorm(a + r) over last dim (biased variance, torch semantics)
        z = a + r
        mu = jnp.mean(z, axis=-1, keepdims=True)
        var = jnp.mean((z - mu) * (z - mu), axis=-1, keepdims=True)
        return (z - mu) * jax.lax.rsqrt(var + LN_EPS) * g + beta

    def attention(q_mat, q_off, kv_mat, k_off, v_off, sq, sk,
                  mask_ref, wo_ref):
        # q_mat: (B*sq, *) with q at columns [q_off, q_off+D)   (scale folded)
        # kv_mat: (B*sk, *) with k at [k_off, ...), v at [v_off, ...)
        # mask_ref: (B*sq, sk) additive mask (0 / -1e9), already broadcast.
        # Per-head W_o fold: acc += (softmax(qk) @ v_h) @ W_o[h*D_K:(h+1)*D_K].
        # Per-batch results go into the VMEM scratch via aligned row stores.
        for b in range(B):
            mb = mask_ref[b * sq:(b + 1) * sq, :]            # (sq, sk)
            acc = jnp.zeros((sq, D_MODEL), jnp.float32)
            for hh in range(NUM_HEADS):
                qlo = q_off + hh * D_K
                klo = k_off + hh * D_K
                vlo = v_off + hh * D_K
                qh = q_mat[b * sq:(b + 1) * sq, qlo:qlo + D_K]
                kh = kv_mat[b * sk:(b + 1) * sk, klo:klo + D_K]
                vh = kv_mat[b * sk:(b + 1) * sk, vlo:vlo + D_K]
                s = jax.lax.dot_general(                     # q @ k^T -> (sq, sk)
                    qh, kh, (((1,), (1,)), ((), ())),
                    preferred_element_type=jnp.float32)
                s = s + mb                                   # additive mask
                s = s - jnp.max(s, axis=-1, keepdims=True)
                p = jnp.exp(s)
                l = jnp.sum(p, axis=-1, keepdims=True)       # (sq, 1)
                r = pl.reciprocal(l, approx=True)            # EUP vrcp
                r = r * (2.0 - l * r)                        # one Newton step
                o_h = jnp.dot(p, vh,                         # (sq, D_K)
                              preferred_element_type=jnp.float32) * r
                acc = acc + jnp.dot(                         # fold W_o rows
                    o_h, wo_ref[hh * D_K:(hh + 1) * D_K, :],
                    preferred_element_type=jnp.float32)
            attn_scr[b * sq:(b + 1) * sq, :] = acc           # aligned row store

    # ---- masked self-attention + add & norm ----
    qkv = jnp.dot(x, sa_wqkv_ref[...],
                  preferred_element_type=jnp.float32) + sa_bqkv_ref[...]
    attention(qkv, 0, qkv, D_MODEL, 2 * D_MODEL,
              S_TGT, S_TGT, tgt_add_ref, sa_wo_ref)
    x = add_ln(x, attn_scr[...] + sa_bo_ref[...], ln1_g_ref[...], ln1_b_ref[...])

    # ---- cross-attention (K/V from encoder output) + add & norm ----
    q = jnp.dot(x, ca_wq_ref[...],
                preferred_element_type=jnp.float32) + ca_bq_ref[...]
    kv = jnp.dot(enc, ca_wkv_ref[...],
                 preferred_element_type=jnp.float32) + ca_bkv_ref[...]
    attention(q, 0, kv, 0, D_MODEL,
              S_TGT, S_SRC, src_add_ref, ca_wo_ref)
    x = add_ln(x, attn_scr[...] + ca_bo_ref[...], ln2_g_ref[...], ln2_b_ref[...])

    # ---- position-wise feed-forward + add & norm ----
    h = jnp.dot(x, ff_w1_ref[...],
                preferred_element_type=jnp.float32) + ff_b1_ref[...]
    h = jnp.maximum(h, 0.0)
    ff = jnp.dot(h, ff_w2_ref[...],
                 preferred_element_type=jnp.float32) + ff_b2_ref[...]
    x = add_ln(x, ff, ln3_g_ref[...], ln3_b_ref[...])

    o_ref[...] = x


def _spec(shape):
    n = len(shape)
    return pl.BlockSpec(shape, lambda i, n=n: (0,) * n)


def decoder_layer(packed, x, enc_output, src_mask, tgt_mask):
    """x:(B,S_tgt,D); enc_output:(B,S_src,D); masks: bool (B,1,S|1,S)."""
    b, s, d = x.shape
    sk = enc_output.shape[1]

    # Additive masks built once outside the kernel, pre-broadcast to full
    # (rows, keys) 2-D slabs so the in-kernel head loop does zero broadcasts.
    tgt_add = jnp.broadcast_to(
        jnp.where(tgt_mask[:, 0], 0.0, NEG_INF), (b, s, s)
    ).astype(jnp.float32).reshape(b * s, s)
    src_add = jnp.broadcast_to(
        jnp.where(src_mask[:, 0], 0.0, NEG_INF), (b, s, sk)
    ).astype(jnp.float32).reshape(b * s, sk)

    inputs = [
        x.reshape(b * s, d), enc_output.reshape(b * sk, d), tgt_add, src_add,
        packed["sa_wqkv"], packed["sa_bqkv"], packed["sa_wo"], packed["sa_bo"],
        packed["ca_wq"], packed["ca_bq"], packed["ca_wkv"], packed["ca_bkv"],
        packed["ca_wo"], packed["ca_bo"],
        packed["ff_w1"], packed["ff_b1"], packed["ff_w2"], packed["ff_b2"],
        packed["ln1_g"], packed["ln1_b"], packed["ln2_g"], packed["ln2_b"],
        packed["ln3_g"], packed["ln3_b"],
    ]

    out2d = pl.pallas_call(
        _decoder_layer_kernel,
        out_shape=jax.ShapeDtypeStruct((b * s, d), jnp.float32),
        grid=(1,),
        in_specs=[_spec(a.shape) for a in inputs],
        out_specs=_spec((b * s, d)),
        scratch_shapes=[pltpu.VMEM((b * s, d), jnp.float32)],
        compiler_params=pltpu.CompilerParams(
            dimension_semantics=("arbitrary",)),
        cost_estimate=pl.CostEstimate(
            flops=520_000, transcendentals=1_700, bytes_accessed=62_000),
    )(*inputs)
    return out2d.reshape(b, s, d)


# --------------------- param packing (done once at init) --------------------
def pack_params(p):
    d = D_MODEL
    sa, ca, ff = p["self_attn"], p["cross_attn"], p["ffn"]
    # 1/sqrt(d_k) folded into the Q projection (weights + bias) at pack time.
    return {
        "sa_wqkv": jnp.concatenate(
            [sa["wq_t"] * SCALE, sa["wk_t"], sa["wv_t"]], axis=1),
        "sa_bqkv": jnp.concatenate(
            [sa["bq"] * SCALE, sa["bk"], sa["bv"]]).reshape(1, 3 * d),
        "sa_wo": sa["wo_t"], "sa_bo": sa["bo"].reshape(1, d),
        "ca_wq": ca["wq_t"] * SCALE, "ca_bq": (ca["bq"] * SCALE).reshape(1, d),
        "ca_wkv": jnp.concatenate([ca["wk_t"], ca["wv_t"]], axis=1),
        "ca_bkv": jnp.concatenate([ca["bk"], ca["bv"]]).reshape(1, 2 * d),
        "ca_wo": ca["wo_t"], "ca_bo": ca["bo"].reshape(1, d),
        "ff_w1": ff["w1_t"], "ff_b1": ff["b1"].reshape(1, D_FF),
        "ff_w2": ff["w2_t"], "ff_b2": ff["b2"].reshape(1, d),
        "ln1_g": p["ln1_g"].reshape(1, d), "ln1_b": p["ln1_b"].reshape(1, d),
        "ln2_g": p["ln2_g"].reshape(1, d), "ln2_b": p["ln2_b"].reshape(1, d),
        "ln3_g": p["ln3_g"].reshape(1, d), "ln3_b": p["ln3_b"].reshape(1, d),
    }


# ---------------------------- pure-JAX reference -----------------------------
def _ref_mha(p, Q, K, V, mask):
    b, sq, d = Q.shape
    sk = K.shape[1]
    q = (Q.reshape(-1, d) @ p["wq_t"] + p["bq"]).reshape(b, sq, NUM_HEADS, D_K).transpose(0, 2, 1, 3)
    k = (K.reshape(-1, d) @ p["wk_t"] + p["bk"]).reshape(b, sk, NUM_HEADS, D_K).transpose(0, 2, 1, 3)
    v = (V.reshape(-1, d) @ p["wv_t"] + p["bv"]).reshape(b, sk, NUM_HEADS, D_K).transpose(0, 2, 1, 3)
    scores = jnp.einsum("bhqd,bhkd->bhqk", q, k) / math.sqrt(D_K)
    scores = jnp.where(mask == 0, NEG_INF, scores)
    probs = jax.nn.softmax(scores, axis=-1)
    out = jnp.einsum("bhqk,bhkd->bhqd", probs, v)
    out = out.transpose(0, 2, 1, 3).reshape(b * sq, d) @ p["wo_t"] + p["bo"]
    return out.reshape(b, sq, d)


def _ref_ln(z, g, b):
    mu = jnp.mean(z, axis=-1, keepdims=True)
    var = jnp.mean((z - mu) ** 2, axis=-1, keepdims=True)
    return (z - mu) / jnp.sqrt(var + LN_EPS) * g + b


def ref_decoder_layer(p, x, enc, src_mask, tgt_mask):
    x = _ref_ln(x + _ref_mha(p["self_attn"], x, x, x, tgt_mask), p["ln1_g"], p["ln1_b"])
    x = _ref_ln(x + _ref_mha(p["cross_attn"], x, enc, enc, src_mask), p["ln2_g"], p["ln2_b"])
    h = jnp.maximum(x @ p["ffn"]["w1_t"] + p["ffn"]["b1"], 0.0)
    ff = h @ p["ffn"]["w2_t"] + p["ffn"]["b2"]
    x = _ref_ln(x + ff, p["ln3_g"], p["ln3_b"])
    return x


# ---------------------------- param init -------------------------------------
def _init_mha(key):
    ks = jax.random.split(key, 8)
    ws = 0.05
    bs = 0.02
    return {
        "wq_t": ws * jax.random.normal(ks[0], (D_MODEL, D_MODEL), jnp.float32),
        "wk_t": ws * jax.random.normal(ks[1], (D_MODEL, D_MODEL), jnp.float32),
        "wv_t": ws * jax.random.normal(ks[2], (D_MODEL, D_MODEL), jnp.float32),
        "wo_t": ws * jax.random.normal(ks[3], (D_MODEL, D_MODEL), jnp.float32),
        "bq": bs * jax.random.normal(ks[4], (D_MODEL,), jnp.float32),
        "bk": bs * jax.random.normal(ks[5], (D_MODEL,), jnp.float32),
        "bv": bs * jax.random.normal(ks[6], (D_MODEL,), jnp.float32),
        "bo": bs * jax.random.normal(ks[7], (D_MODEL,), jnp.float32),
    }


def init_params(key):
    k1, k2, k3, k4, k5, k6, k7 = jax.random.split(key, 7)
    ws = 0.05
    ln_keys = jax.random.split(k7, 6)
    return {
        "self_attn": _init_mha(k1),
        "cross_attn": _init_mha(k2),
        "ffn": {
            "w1_t": ws * jax.random.normal(k3, (D_MODEL, D_FF), jnp.float32),
            "b1": 0.02 * jax.random.normal(k5, (D_FF,), jnp.float32),
            "w2_t": ws * jax.random.normal(k4, (D_FF, D_MODEL), jnp.float32),
            "b2": 0.02 * jax.random.normal(k6, (D_MODEL,), jnp.float32),
        },
        "ln1_g": 1.0 + 0.1 * jax.random.normal(ln_keys[0], (D_MODEL,), jnp.float32),
        "ln1_b": 0.1 * jax.random.normal(ln_keys[1], (D_MODEL,), jnp.float32),
        "ln2_g": 1.0 + 0.1 * jax.random.normal(ln_keys[2], (D_MODEL,), jnp.float32),
        "ln2_b": 0.1 * jax.random.normal(ln_keys[3], (D_MODEL,), jnp.float32),
        "ln3_g": 1.0 + 0.1 * jax.random.normal(ln_keys[4], (D_MODEL,), jnp.float32),
        "ln3_b": 0.1 * jax.random.normal(ln_keys[5], (D_MODEL,), jnp.float32),
    }


# ---------------------------------- main --------------------------------------
if __name__ == "__main__":
    key = jax.random.PRNGKey(0)
    kp, kx, ke = jax.random.split(key, 3)

    params = init_params(kp)
    packed = pack_params(params)          # QKV / KV fusion + scale fold at init
    x = jax.random.normal(kx, (B, S_TGT, D_MODEL), jnp.float32)
    enc_output = jax.random.normal(ke, (B, S_SRC, D_MODEL), jnp.float32)

    # tgt_mask: (B, 1, S_tgt, S_tgt) causal (no padding in target here)
    causal = jnp.tril(jnp.ones((S_TGT, S_TGT), jnp.bool_))
    tgt_mask = jnp.broadcast_to(causal[None, None], (B, 1, S_TGT, S_TGT))
    # src_mask: (B, 1, 1, S_src); batch 1 has its last 3 source tokens padded
    src_valid = jnp.ones((B, S_SRC), jnp.bool_)
    src_valid = src_valid.at[1, -3:].set(False)
    src_mask = src_valid[:, None, None, :]

    fwd = jax.jit(decoder_layer)
    out = fwd(packed, x, enc_output, src_mask, tgt_mask)
    out = jax.block_until_ready(out)

    ref = ref_decoder_layer(params, x, enc_output, src_mask, tgt_mask)
    assert out.shape == (B, S_TGT, D_MODEL)
    assert jnp.allclose(out, ref, atol=1e-4, rtol=1e-4), "mismatch vs reference"

    print("KERNEL_OK")
</pallas_src>

<mosaic_0001>
module attributes {stable_mosaic.version = 11 : i64} {
  func.func @_decoder_layer_kernel(%arg0: i32, %arg1: memref<16x32xf32, #tpu.memory_space<vmem>>, %arg2: memref<32x32xf32, #tpu.memory_space<vmem>>, %arg3: memref<16x8xf32, #tpu.memory_space<vmem>>, %arg4: memref<16x16xf32, #tpu.memory_space<vmem>>, %arg5: memref<32x96xf32, #tpu.memory_space<vmem>>, %arg6: memref<1x96xf32, #tpu.memory_space<vmem>>, %arg7: memref<32x32xf32, #tpu.memory_space<vmem>>, %arg8: memref<1x32xf32, #tpu.memory_space<vmem>>, %arg9: memref<32x32xf32, #tpu.memory_space<vmem>>, %arg10: memref<1x32xf32, #tpu.memory_space<vmem>>, %arg11: memref<32x64xf32, #tpu.memory_space<vmem>>, %arg12: memref<1x64xf32, #tpu.memory_space<vmem>>, %arg13: memref<32x32xf32, #tpu.memory_space<vmem>>, %arg14: memref<1x32xf32, #tpu.memory_space<vmem>>, %arg15: memref<32x64xf32, #tpu.memory_space<vmem>>, %arg16: memref<1x64xf32, #tpu.memory_space<vmem>>, %arg17: memref<64x32xf32, #tpu.memory_space<vmem>>, %arg18: memref<1x32xf32, #tpu.memory_space<vmem>>, %arg19: memref<1x32xf32, #tpu.memory_space<vmem>>, %arg20: memref<1x32xf32, #tpu.memory_space<vmem>>, %arg21: memref<1x32xf32, #tpu.memory_space<vmem>>, %arg22: memref<1x32xf32, #tpu.memory_space<vmem>>, %arg23: memref<1x32xf32, #tpu.memory_space<vmem>>, %arg24: memref<1x32xf32, #tpu.memory_space<vmem>>, %arg25: memref<16x32xf32, #tpu.memory_space<vmem>>, %arg26: memref<16x32xf32, #tpu.memory_space<vmem>>) attributes {dimension_semantics = [#tpu.dimension_semantics<arbitrary>], iteration_bounds = array<i64: 1>, scalar_prefetch = 0 : i64, scratch_operands = 1 : i64, tpu.core_type = #tpu.core_type<tc>, window_params = [{pipeline_mode = #tpu.pipeline_mode<synchronous>, transform_indices = @transform_0, window_bounds = array<i64: 16, 32>}, {pipeline_mode = #tpu.pipeline_mode<synchronous>, transform_indices = @transform_1, window_bounds = array<i64: 32, 32>}, {pipeline_mode = #tpu.pipeline_mode<synchronous>, transform_indices = @transform_2, window_bounds = array<i64: 16, 8>}, {pipeline_mode = #tpu.pipeline_mode<synchronous>, transform_indices = @transform_3, window_bounds = array<i64: 16, 16>}, {pipeline_mode = #tpu.pipeline_mode<synchronous>, transform_indices = @transform_4, window_bounds = array<i64: 32, 96>}, {pipeline_mode = #tpu.pipeline_mode<synchronous>, transform_indices = @transform_5, window_bounds = array<i64: 1, 96>}, {pipeline_mode = #tpu.pipeline_mode<synchronous>, transform_indices = @transform_6, window_bounds = array<i64: 32, 32>}, {pipeline_mode = #tpu.pipeline_mode<synchronous>, transform_indices = @transform_7, window_bounds = array<i64: 1, 32>}, {pipeline_mode = #tpu.pipeline_mode<synchronous>, transform_indices = @transform_8, window_bounds = array<i64: 32, 32>}, {pipeline_mode = #tpu.pipeline_mode<synchronous>, transform_indices = @transform_9, window_bounds = array<i64: 1, 32>}, {pipeline_mode = #tpu.pipeline_mode<synchronous>, transform_indices = @transform_10, window_bounds = array<i64: 32, 64>}, {pipeline_mode = #tpu.pipeline_mode<synchronous>, transform_indices = @transform_11, window_bounds = array<i64: 1, 64>}, {pipeline_mode = #tpu.pipeline_mode<synchronous>, transform_indices = @transform_12, window_bounds = array<i64: 32, 32>}, {pipeline_mode = #tpu.pipeline_mode<synchronous>, transform_indices = @transform_13, window_bounds = array<i64: 1, 32>}, {pipeline_mode = #tpu.pipeline_mode<synchronous>, transform_indices = @transform_14, window_bounds = array<i64: 32, 64>}, {pipeline_mode = #tpu.pipeline_mode<synchronous>, transform_indices = @transform_15, window_bounds = array<i64: 1, 64>}, {pipeline_mode = #tpu.pipeline_mode<synchronous>, transform_indices = @transform_16, window_bounds = array<i64: 64, 32>}, {pipeline_mode = #tpu.pipeline_mode<synchronous>, transform_indices = @transform_17, window_bounds = array<i64: 1, 32>}, {pipeline_mode = #tpu.pipeline_mode<synchronous>, transform_indices = @transform_18, window_bounds = array<i64: 1, 32>}, {pipeline_mode = #tpu.pipeline_mode<synchronous>, transform_indices = @transform_19, window_bounds = array<i64: 1, 32>}, {pipeline_mode = #tpu.pipeline_mode<synchronous>, transform_indices = @transform_20, window_bounds = array<i64: 1, 32>}, {pipeline_mode = #tpu.pipeline_mode<synchronous>, transform_indices = @transform_21, window_bounds = array<i64: 1, 32>}, {pipeline_mode = #tpu.pipeline_mode<synchronous>, transform_indices = @transform_22, window_bounds = array<i64: 1, 32>}, {pipeline_mode = #tpu.pipeline_mode<synchronous>, transform_indices = @transform_23, window_bounds = array<i64: 1, 32>}, {pipeline_mode = #tpu.pipeline_mode<synchronous>, transform_indices = @transform_24, window_bounds = array<i64: 16, 32>}]} {
    %c0 = arith.constant 0 : index
    %c0_0 = arith.constant 0 : index
    %0 = vector.load %arg1[%c0, %c0_0] : memref<16x32xf32, #tpu.memory_space<vmem>>, vector<16x32xf32>
    %c0_1 = arith.constant 0 : index
    %c0_2 = arith.constant 0 : index
    %1 = vector.load %arg2[%c0_1, %c0_2] : memref<32x32xf32, #tpu.memory_space<vmem>>, vector<32x32xf32>
    %c0_3 = arith.constant 0 : index
    %c0_4 = arith.constant 0 : index
    %2 = vector.load %arg5[%c0_3, %c0_4] : memref<32x96xf32, #tpu.memory_space<vmem>>, vector<32x96xf32>
    %cst = arith.constant dense<0.000000e+00> : vector<16x96xf32>
    %3 = tpu.matmul %0, %2, %cst {dimension_numbers = #tpu.dot_dimension_numbers<[1], [0], [0], [1], [0, 0, 1, 1], [], []>} : vector<16x32xf32>, vector<32x96xf32>, vector<16x96xf32> -> vector<16x96xf32>
    %c0_5 = arith.constant 0 : index
    %c0_6 = arith.constant 0 : index
    %4 = vector.load %arg6[%c0_5, %c0_6] : memref<1x96xf32, #tpu.memory_space<vmem>>, vector<1x96xf32>
    %5 = vector.broadcast %4 : vector<1x96xf32> to vector<16x96xf32>
    %6 = arith.addf %3, %5 : vector<16x96xf32>
    %c0_7 = arith.constant 0 : index
    %c0_8 = arith.constant 0 : index
    %7 = vector.load %arg3[%c0_7, %c0_8] : memref<16x8xf32, #tpu.memory_space<vmem>>, vector<8x8xf32>
    %cst_9 = arith.constant 0.000000e+00 : f32
    %8 = vector.broadcast %cst_9 : f32 to vector<8x32xf32>
    %9 = vector.extract_strided_slice %6 {offsets = [0, 0], sizes = [8, 8], strides = [1, 1]} : vector<16x96xf32> to vector<8x8xf32>
    %10 = vector.extract_strided_slice %6 {offsets = [0, 32], sizes = [8, 8], strides = [1, 1]} : vector<16x96xf32> to vector<8x8xf32>
    %11 = vector.extract_strided_slice %6 {offsets = [0, 64], sizes = [8, 8], strides = [1, 1]} : vector<16x96xf32> to vector<8x8xf32>
    %cst_10 = arith.constant dense<0.000000e+00> : vector<8x8xf32>
    %12 = tpu.matmul %9, %10, %cst_10 {dimension_numbers = #tpu.dot_dimension_numbers<[1], [1], [0], [0], [0, 0, 1, 0], [], []>} : vector<8x8xf32>, vector<8x8xf32>, vector<8x8xf32> -> vector<8x8xf32>
    %13 = arith.addf %12, %7 : vector<8x8xf32>
    %cst_11 = arith.constant dense<0xFF800000> : vector<8xf32>
    %14 = vector.multi_reduction <maximumf>, %13, %cst_11 [1] : vector<8x8xf32> to vector<8xf32>
    %15 = vector.shape_cast %14 : vector<8xf32> to vector<8x1xf32>
    %16 = vector.broadcast %15 : vector<8x1xf32> to vector<8x8xf32>
    %17 = arith.subf %13, %16 : vector<8x8xf32>
    %18 = math.exp %17 : vector<8x8xf32>
    %cst_12 = arith.constant dense<0.000000e+00> : vector<8xf32>
    %19 = vector.multi_reduction <add>, %18, %cst_12 [1] : vector<8x8xf32> to vector<8xf32>
    %20 = vector.shape_cast %19 : vector<8xf32> to vector<8x1xf32>
    %21 = tpu.reciprocal %20 {approx = true} : vector<8x1xf32> -> vector<8x1xf32>
    %22 = arith.mulf %20, %21 : vector<8x1xf32>
    %cst_13 = arith.constant 2.000000e+00 : f32
    %23 = vector.broadcast %cst_13 : f32 to vector<8x1xf32>
    %24 = arith.subf %23, %22 : vector<8x1xf32>
    %25 = arith.mulf %21, %24 : vector<8x1xf32>
    %cst_14 = arith.constant dense<0.000000e+00> : vector<8x8xf32>
    %26 = tpu.matmul %18, %11, %cst_14 {dimension_numbers = #tpu.dot_dimension_numbers<[1], [0], [0], [1], [0, 0, 1, 1], [], []>} : vector<8x8xf32>, vector<8x8xf32>, vector<8x8xf32> -> vector<8x8xf32>
    %27 = vector.broadcast %25 : vector<8x1xf32> to vector<8x8xf32>
    %28 = arith.mulf %26, %27 : vector<8x8xf32>
    %c0_15 = arith.constant 0 : index
    %c0_16 = arith.constant 0 : index
    %29 = vector.load %arg7[%c0_15, %c0_16] : memref<32x32xf32, #tpu.memory_space<vmem>>, vector<8x32xf32>
    %cst_17 = arith.constant dense<0.000000e+00> : vector<8x32xf32>
    %30 = tpu.matmul %28, %29, %cst_17 {dimension_numbers = #tpu.dot_dimension_numbers<[1], [0], [0], [1], [0, 0, 1, 1], [], []>} : vector<8x8xf32>, vector<8x32xf32>, vector<8x32xf32> -> vector<8x32xf32>
    %31 = arith.addf %8, %30 : vector<8x32xf32>
    %32 = vector.extract_strided_slice %6 {offsets = [0, 8], sizes = [8, 8], strides = [1, 1]} : vector<16x96xf32> to vector<8x8xf32>
    %33 = vector.extract_strided_slice %6 {offsets = [0, 40], sizes = [8, 8], strides = [1, 1]} : vector<16x96xf32> to vector<8x8xf32>
    %34 = vector.extract_strided_slice %6 {offsets = [0, 72], sizes = [8, 8], strides = [1, 1]} : vector<16x96xf32> to vector<8x8xf32>
    %cst_18 = arith.constant dense<0.000000e+00> : vector<8x8xf32>
    %35 = tpu.matmul %32, %33, %cst_18 {dimension_numbers = #tpu.dot_dimension_numbers<[1], [1], [0], [0], [0, 0, 1, 0], [], []>} : vector<8x8xf32>, vector<8x8xf32>, vector<8x8xf32> -> vector<8x8xf32>
    %36 = arith.addf %35, %7 : vector<8x8xf32>
    %cst_19 = arith.constant dense<0xFF800000> : vector<8xf32>
    %37 = vector.multi_reduction <maximumf>, %36, %cst_19 [1] : vector<8x8xf32> to vector<8xf32>
    %38 = vector.shape_cast %37 : vector<8xf32> to vector<8x1xf32>
    %39 = vector.broadcast %38 : vector<8x1xf32> to vector<8x8xf32>
    %40 = arith.subf %36, %39 : vector<8x8xf32>
    %41 = math.exp %40 : vector<8x8xf32>
    %cst_20 = arith.constant dense<0.000000e+00> : vector<8xf32>
    %42 = vector.multi_reduction <add>, %41, %cst_20 [1] : vector<8x8xf32> to vector<8xf32>
    %43 = vector.shape_cast %42 : vector<8xf32> to vector<8x1xf32>
    %44 = tpu.reciprocal %43 {approx = true} : vector<8x1xf32> -> vector<8x1xf32>
    %45 = arith.mulf %43, %44 : vector<8x1xf32>
    %cst_21 = arith.constant 2.000000e+00 : f32
    %46 = vector.broadcast %cst_21 : f32 to vector<8x1xf32>
    %47 = arith.subf %46, %45 : vector<8x1xf32>
    %48 = arith.mulf %44, %47 : vector<8x1xf32>
    %cst_22 = arith.constant dense<0.000000e+00> : vector<8x8xf32>
    %49 = tpu.matmul %41, %34, %cst_22 {dimension_numbers = #tpu.dot_dimension_numbers<[1], [0], [0], [1], [0, 0, 1, 1], [], []>} : vector<8x8xf32>, vector<8x8xf32>, vector<8x8xf32> -> vector<8x8xf32>
    %50 = vector.broadcast %48 : vector<8x1xf32> to vector<8x8xf32>
    %51 = arith.mulf %49, %50 : vector<8x8xf32>
    %c8 = arith.constant 8 : index
    %c0_23 = arith.constant 0 : index
    %52 = vector.load %arg7[%c8, %c0_23] : memref<32x32xf32, #tpu.memory_space<vmem>>, vector<8x32xf32>
    %cst_24 = arith.constant dense<0.000000e+00> : vector<8x32xf32>
    %53 = tpu.matmul %51, %52, %cst_24 {dimension_numbers = #tpu.dot_dimension_numbers<[1], [0], [0], [1], [0, 0, 1, 1], [], []>} : vector<8x8xf32>, vector<8x32xf32>, vector<8x32xf32> -> vector<8x32xf32>
    %54 = arith.addf %31, %53 : vector<8x32xf32>
    %55 = vector.extract_strided_slice %6 {offsets = [0, 16], sizes = [8, 8], strides = [1, 1]} : vector<16x96xf32> to vector<8x8xf32>
    %56 = vector.extract_strided_slice %6 {offsets = [0, 48], sizes = [8, 8], strides = [1, 1]} : vector<16x96xf32> to vector<8x8xf32>
    %57 = vector.extract_strided_slice %6 {offsets = [0, 80], sizes = [8, 8], strides = [1, 1]} : vector<16x96xf32> to vector<8x8xf32>
    %cst_25 = arith.constant dense<0.000000e+00> : vector<8x8xf32>
    %58 = tpu.matmul %55, %56, %cst_25 {dimension_numbers = #tpu.dot_dimension_numbers<[1], [1], [0], [0], [0, 0, 1, 0], [], []>} : vector<8x8xf32>, vector<8x8xf32>, vector<8x8xf32> -> vector<8x8xf32>
    %59 = arith.addf %58, %7 : vector<8x8xf32>
    %cst_26 = arith.constant dense<0xFF800000> : vector<8xf32>
    %60 = vector.multi_reduction <maximumf>, %59, %cst_26 [1] : vector<8x8xf32> to vector<8xf32>
    %61 = vector.shape_cast %60 : vector<8xf32> to vector<8x1xf32>
    %62 = vector.broadcast %61 : vector<8x1xf32> to vector<8x8xf32>
    %63 = arith.subf %59, %62 : vector<8x8xf32>
    %64 = math.exp %63 : vector<8x8xf32>
    %cst_27 = arith.constant dense<0.000000e+00> : vector<8xf32>
    %65 = vector.multi_reduction <add>, %64, %cst_27 [1] : vector<8x8xf32> to vector<8xf32>
    %66 = vector.shape_cast %65 : vector<8xf32> to vector<8x1xf32>
    %67 = tpu.reciprocal %66 {approx = true} : vector<8x1xf32> -> vector<8x1xf32>
    %68 = arith.mulf %66, %67 : vector<8x1xf32>
    %cst_28 = arith.constant 2.000000e+00 : f32
    %69 = vector.broadcast %cst_28 : f32 to vector<8x1xf32>
    %70 = arith.subf %69, %68 : vector<8x1xf32>
    %71 = arith.mulf %67, %70 : vector<8x1xf32>
    %cst_29 = arith.constant dense<0.000000e+00> : vector<8x8xf32>
    %72 = tpu.matmul %64, %57, %cst_29 {dimension_numbers = #tpu.dot_dimension_numbers<[1], [0], [0], [1], [0, 0, 1, 1], [], []>} : vector<8x8xf32>, vector<8x8xf32>, vector<8x8xf32> -> vector<8x8xf32>
    %73 = vector.broadcast %71 : vector<8x1xf32> to vector<8x8xf32>
    %74 = arith.mulf %72, %73 : vector<8x8xf32>
    %c16 = arith.constant 16 : index
    %c0_30 = arith.constant 0 : index
    %75 = vector.load %arg7[%c16, %c0_30] : memref<32x32xf32, #tpu.memory_space<vmem>>, vector<8x32xf32>
    %cst_31 = arith.constant dense<0.000000e+00> : vector<8x32xf32>
    %76 = tpu.matmul %74, %75, %cst_31 {dimension_numbers = #tpu.dot_dimension_numbers<[1], [0], [0], [1], [0, 0, 1, 1], [], []>} : vector<8x8xf32>, vector<8x32xf32>, vector<8x32xf32> -> vector<8x32xf32>
    %77 = arith.addf %54, %76 : vector<8x32xf32>
    %78 = vector.extract_strided_slice %6 {offsets = [0, 24], sizes = [8, 8], strides = [1, 1]} : vector<16x96xf32> to vector<8x8xf32>
    %79 = vector.extract_strided_slice %6 {offsets = [0, 56], sizes = [8, 8], strides = [1, 1]} : vector<16x96xf32> to vector<8x8xf32>
    %80 = vector.extract_strided_slice %6 {offsets = [0, 88], sizes = [8, 8], strides = [1, 1]} : vector<16x96xf32> to vector<8x8xf32>
    %cst_32 = arith.constant dense<0.000000e+00> : vector<8x8xf32>
    %81 = tpu.matmul %78, %79, %cst_32 {dimension_numbers = #tpu.dot_dimension_numbers<[1], [1], [0], [0], [0, 0, 1, 0], [], []>} : vector<8x8xf32>, vector<8x8xf32>, vector<8x8xf32> -> vector<8x8xf32>
    %82 = arith.addf %81, %7 : vector<8x8xf32>
    %cst_33 = arith.constant dense<0xFF800000> : vector<8xf32>
    %83 = vector.multi_reduction <maximumf>, %82, %cst_33 [1] : vector<8x8xf32> to vector<8xf32>
    %84 = vector.shape_cast %83 : vector<8xf32> to vector<8x1xf32>
    %85 = vector.broadcast %84 : vector<8x1xf32> to vector<8x8xf32>
    %86 = arith.subf %82, %85 : vector<8x8xf32>
    %87 = math.exp %86 : vector<8x8xf32>
    %cst_34 = arith.constant dense<0.000000e+00> : vector<8xf32>
    %88 = vector.multi_reduction <add>, %87, %cst_34 [1] : vector<8x8xf32> to vector<8xf32>
    %89 = vector.shape_cast %88 : vector<8xf32> to vector<8x1xf32>
    %90 = tpu.reciprocal %89 {approx = true} : vector<8x1xf32> -> vector<8x1xf32>
    %91 = arith.mulf %89, %90 : vector<8x1xf32>
    %cst_35 = arith.constant 2.000000e+00 : f32
    %92 = vector.broadcast %cst_35 : f32 to vector<8x1xf32>
    %93 = arith.subf %92, %91 : vector<8x1xf32>
    %94 = arith.mulf %90, %93 : vector<8x1xf32>
    %cst_36 = arith.constant dense<0.000000e+00> : vector<8x8xf32>
    %95 = tpu.matmul %87, %80, %cst_36 {dimension_numbers = #tpu.dot_dimension_numbers<[1], [0], [0], [1], [0, 0, 1, 1], [], []>} : vector<8x8xf32>, vector<8x8xf32>, vector<8x8xf32> -> vector<8x8xf32>
    %96 = vector.broadcast %94 : vector<8x1xf32> to vector<8x8xf32>
    %97 = arith.mulf %95, %96 : vector<8x8xf32>
    %c24 = arith.constant 24 : index
    %c0_37 = arith.constant 0 : index
    %98 = vector.load %arg7[%c24, %c0_37] : memref<32x32xf32, #tpu.memory_space<vmem>>, vector<8x32xf32>
    %cst_38 = arith.constant dense<0.000000e+00> : vector<8x32xf32>
    %99 = tpu.matmul %97, %98, %cst_38 {dimension_numbers = #tpu.dot_dimension_numbers<[1], [0], [0], [1], [0, 0, 1, 1], [], []>} : vector<8x8xf32>, vector<8x32xf32>, vector<8x32xf32> -> vector<8x32xf32>
    %100 = arith.addf %77, %99 : vector<8x32xf32>
    %c0_39 = arith.constant 0 : index
    %c0_40 = arith.constant 0 : index
    %101 = vector.load %arg26[%c0_39, %c0_40] : memref<16x32xf32, #tpu.memory_space<vmem>>, vector<8x32xf32>
    tpu.vector_store %arg26[%c0_39, %c0_40], %100 {strides = array<i32>} : memref<16x32xf32, #tpu.memory_space<vmem>>, vector<8x32xf32>,
    %c8_41 = arith.constant 8 : index
    %c0_42 = arith.constant 0 : index
    %102 = vector.load %arg3[%c8_41, %c0_42] : memref<16x8xf32, #tpu.memory_space<vmem>>, vector<8x8xf32>
    %cst_43 = arith.constant 0.000000e+00 : f32
    %103 = vector.broadcast %cst_43 : f32 to vector<8x32xf32>
    %104 = vector.extract_strided_slice %6 {offsets = [8, 0], sizes = [8, 8], strides = [1, 1]} : vector<16x96xf32> to vector<8x8xf32>
    %105 = vector.extract_strided_slice %6 {offsets = [8, 32], sizes = [8, 8], strides = [1, 1]} : vector<16x96xf32> to vector<8x8xf32>
    %106 = vector.extract_strided_slice %6 {offsets = [8, 64], sizes = [8, 8], strides = [1, 1]} : vector<16x96xf32> to vector<8x8xf32>
    %cst_44 = arith.constant dense<0.000000e+00> : vector<8x8xf32>
    %107 = tpu.matmul %104, %105, %cst_44 {dimension_numbers = #tpu.dot_dimension_numbers<[1], [1], [0], [0], [0, 0, 1, 0], [], []>} : vector<8x8xf32>, vector<8x8xf32>, vector<8x8xf32> -> vector<8x8xf32>
    %108 = arith.addf %107, %102 : vector<8x8xf32>
    %cst_45 = arith.constant dense<0xFF800000> : vector<8xf32>
    %109 = vector.multi_reduction <maximumf>, %108, %cst_45 [1] : vector<8x8xf32> to vector<8xf32>
    %110 = vector.shape_cast %109 : vector<8xf32> to vector<8x1xf32>
    %111 = vector.broadcast %110 : vector<8x1xf32> to vector<8x8xf32>
    %112 = arith.subf %108, %111 : vector<8x8xf32>
    %113 = math.exp %112 : vector<8x8xf32>
    %cst_46 = arith.constant dense<0.000000e+00> : vector<8xf32>
    %114 = vector.multi_reduction <add>, %113, %cst_46 [1] : vector<8x8xf32> to vector<8xf32>
    %115 = vector.shape_cast %114 : vector<8xf32> to vector<8x1xf32>
    %116 = tpu.reciprocal %115 {approx = true} : vector<8x1xf32> -> vector<8x1xf32>
    %117 = arith.mulf %115, %116 : vector<8x1xf32>
    %cst_47 = arith.constant 2.000000e+00 : f32
    %118 = vector.broadcast %cst_47 : f32 to vector<8x1xf32>
    %119 = arith.subf %118, %117 : vector<8x1xf32>
    %120 = arith.mulf %116, %119 : vector<8x1xf32>
    %cst_48 = arith.constant dense<0.000000e+00> : vector<8x8xf32>
    %121 = tpu.matmul %113, %106, %cst_48 {dimension_numbers = #tpu.dot_dimension_numbers<[1], [0], [0], [1], [0, 0, 1, 1], [], []>} : vector<8x8xf32>, vector<8x8xf32>, vector<8x8xf32> -> vector<8x8xf32>
    %122 = vector.broadcast %120 : vector<8x1xf32> to vector<8x8xf32>
    %123 = arith.mulf %121, %122 : vector<8x8xf32>
    %c0_49 = arith.constant 0 : index
    %c0_50 = arith.constant 0 : index
    %124 = vector.load %arg7[%c0_49, %c0_50] : memref<32x32xf32, #tpu.memory_space<vmem>>, vector<8x32xf32>
    %cst_51 = arith.constant dense<0.000000e+00> : vector<8x32xf32>
    %125 = tpu.matmul %123, %124, %cst_51 {dimension_numbers = #tpu.dot_dimension_numbers<[1], [0], [0], [1], [0, 0, 1, 1], [], []>} : vector<8x8xf32>, vector<8x32xf32>, vector<8x32xf32> -> vector<8x32xf32>
    %126 = arith.addf %103, %125 : vector<8x32xf32>
    %127 = vector.extract_strided_slice %6 {offsets = [8, 8], sizes = [8, 8], strides = [1, 1]} : vector<16x96xf32> to vector<8x8xf32>
    %128 = vector.extract_strided_slice %6 {offsets = [8, 40], sizes = [8, 8], strides = [1, 1]} : vector<16x96xf32> to vector<8x8xf32>
    %129 = vector.extract_strided_slice %6 {offsets = [8, 72], sizes = [8, 8], strides = [1, 1]} : vector<16x96xf32> to vector<8x8xf32>
    %cst_52 = arith.constant dense<0.000000e+00> : vector<8x8xf32>
    %130 = tpu.matmul %127, %128, %cst_52 {dimension_numbers = #tpu.dot_dimension_numbers<[1], [1], [0], [0], [0, 0, 1, 0], [], []>} : vector<8x8xf32>, vector<8x8xf32>, vector<8x8xf32> -> vector<8x8xf32>
    %131 = arith.addf %130, %102 : vector<8x8xf32>
    %cst_53 = arith.constant dense<0xFF800000> : vector<8xf32>
    %132 = vector.multi_reduction <maximumf>, %131, %cst_53 [1] : vector<8x8xf32> to vector<8xf32>
    %133 = vector.shape_cast %132 : vector<8xf32> to vector<8x1xf32>
    %134 = vector.broadcast %133 : vector<8x1xf32> to vector<8x8xf32>
    %135 = arith.subf %131, %134 : vector<8x8xf32>
    %136 = math.exp %135 : vector<8x8xf32>
    %cst_54 = arith.constant dense<0.000000e+00> : vector<8xf32>
    %137 = vector.multi_reduction <add>, %136, %cst_54 [1] : vector<8x8xf32> to vector<8xf32>
    %138 = vector.shape_cast %137 : vector<8xf32> to vector<8x1xf32>
    %139 = tpu.reciprocal %138 {approx = true} : vector<8x1xf32> -> vector<8x1xf32>
    %140 = arith.mulf %138, %139 : vector<8x1xf32>
    %cst_55 = arith.constant 2.000000e+00 : f32
    %141 = vector.broadcast %cst_55 : f32 to vector<8x1xf32>
    %142 = arith.subf %141, %140 : vector<8x1xf32>
    %143 = arith.mulf %139, %142 : vector<8x1xf32>
    %cst_56 = arith.constant dense<0.000000e+00> : vector<8x8xf32>
    %144 = tpu.matmul %136, %129, %cst_56 {dimension_numbers = #tpu.dot_dimension_numbers<[1], [0], [0], [1], [0, 0, 1, 1], [], []>} : vector<8x8xf32>, vector<8x8xf32>, vector<8x8xf32> -> vector<8x8xf32>
    %145 = vector.broadcast %143 : vector<8x1xf32> to vector<8x8xf32>
    %146 = arith.mulf %144, %145 : vector<8x8xf32>
    %c8_57 = arith.constant 8 : index
    %c0_58 = arith.constant 0 : index
    %147 = vector.load %arg7[%c8_57, %c0_58] : memref<32x32xf32, #tpu.memory_space<vmem>>, vector<8x32xf32>
    %cst_59 = arith.constant dense<0.000000e+00> : vector<8x32xf32>
    %148 = tpu.matmul %146, %147, %cst_59 {dimension_numbers = #tpu.dot_dimension_numbers<[1], [0], [0], [1], [0, 0, 1, 1], [], []>} : vector<8x8xf32>, vector<8x32xf32>, vector<8x32xf32> -> vector<8x32xf32>
    %149 = arith.addf %126, %148 : vector<8x32xf32>
    %150 = vector.extract_strided_slice %6 {offsets = [8, 16], sizes = [8, 8], strides = [1, 1]} : vector<16x96xf32> to vector<8x8xf32>
    %151 = vector.extract_strided_slice %6 {offsets = [8, 48], sizes = [8, 8], strides = [1, 1]} : vector<16x96xf32> to vector<8x8xf32>
    %152 = vector.extract_strided_slice %6 {offsets = [8, 80], sizes = [8, 8], strides = [1, 1]} : vector<16x96xf32> to vector<8x8xf32>
    %cst_60 = arith.constant dense<0.000000e+00> : vector<8x8xf32>
    %153 = tpu.matmul %150, %151, %cst_60 {dimension_numbers = #tpu.dot_dimension_numbers<[1], [1], [0], [0], [0, 0, 1, 0], [], []>} : vector<8x8xf32>, vector<8x8xf32>, vector<8x8xf32> -> vector<8x8xf32>
    %154 = arith.addf %153, %102 : vector<8x8xf32>
    %cst_61 = arith.constant dense<0xFF800000> : vector<8xf32>
    %155 = vector.multi_reduction <maximumf>, %154, %cst_61 [1] : vector<8x8xf32> to vector<8xf32>
    %156 = vector.shape_cast %155 : vector<8xf32> to vector<8x1xf32>
    %157 = vector.broadcast %156 : vector<8x1xf32> to vector<8x8xf32>
    %158 = arith.subf %154, %157 : vector<8x8xf32>
    %159 = math.exp %158 : vector<8x8xf32>
    %cst_62 = arith.constant dense<0.000000e+00> : vector<8xf32>
    %160 = vector.multi_reduction <add>, %159, %cst_62 [1] : vector<8x8xf32> to vector<8xf32>
    %161 = vector.shape_cast %160 : vector<8xf32> to vector<8x1xf32>
    %162 = tpu.reciprocal %161 {approx = true} : vector<8x1xf32> -> vector<8x1xf32>
    %163 = arith.mulf %161, %162 : vector<8x1xf32>
    %cst_63 = arith.constant 2.000000e+00 : f32
    %164 = vector.broadcast %cst_63 : f32 to vector<8x1xf32>
    %165 = arith.subf %164, %163 : vector<8x1xf32>
    %166 = arith.mulf %162, %165 : vector<8x1xf32>
    %cst_64 = arith.constant dense<0.000000e+00> : vector<8x8xf32>
    %167 = tpu.matmul %159, %152, %cst_64 {dimension_numbers = #tpu.dot_dimension_numbers<[1], [0], [0], [1], [0, 0, 1, 1], [], []>} : vector<8x8xf32>, vector<8x8xf32>, vector<8x8xf32> -> vector<8x8xf32>
    %168 = vector.broadcast %166 : vector<8x1xf32> to vector<8x8xf32>
    %169 = arith.mulf %167, %168 : vector<8x8xf32>
    %c16_65 = arith.constant 16 : index
    %c0_66 = arith.constant 0 : index
    %170 = vector.load %arg7[%c16_65, %c0_66] : memref<32x32xf32, #tpu.memory_space<vmem>>, vector<8x32xf32>
    %cst_67 = arith.constant dense<0.000000e+00> : vector<8x32xf32>
    %171 = tpu.matmul %169, %170, %cst_67 {dimension_numbers = #tpu.dot_dimension_numbers<[1], [0], [0], [1], [0, 0, 1, 1], [], []>} : vector<8x8xf32>, vector<8x32xf32>, vector<8x32xf32> -> vector<8x32xf32>
    %172 = arith.addf %149, %171 : vector<8x32xf32>
    %173 = vector.extract_strided_slice %6 {offsets = [8, 24], sizes = [8, 8], strides = [1, 1]} : vector<16x96xf32> to vector<8x8xf32>
    %174 = vector.extract_strided_slice %6 {offsets = [8, 56], sizes = [8, 8], strides = [1, 1]} : vector<16x96xf32> to vector<8x8xf32>
    %175 = vector.extract_strided_slice %6 {offsets = [8, 88], sizes = [8, 8], strides = [1, 1]} : vector<16x96xf32> to vector<8x8xf32>
    %cst_68 = arith.constant dense<0.000000e+00> : vector<8x8xf32>
    %176 = tpu.matmul %173, %174, %cst_68 {dimension_numbers = #tpu.dot_dimension_numbers<[1], [1], [0], [0], [0, 0, 1, 0], [], []>} : vector<8x8xf32>, vector<8x8xf32>, vector<8x8xf32> -> vector<8x8xf32>
    %177 = arith.addf %176, %102 : vector<8x8xf32>
    %cst_69 = arith.constant dense<0xFF800000> : vector<8xf32>
    %178 = vector.multi_reduction <maximumf>, %177, %cst_69 [1] : vector<8x8xf32> to vector<8xf32>
    %179 = vector.shape_cast %178 : vector<8xf32> to vector<8x1xf32>
    %180 = vector.broadcast %179 : vector<8x1xf32> to vector<8x8xf32>
    %181 = arith.subf %177, %180 : vector<8x8xf32>
    %182 = math.exp %181 : vector<8x8xf32>
    %cst_70 = arith.constant dense<0.000000e+00> : vector<8xf32>
    %183 = vector.multi_reduction <add>, %182, %cst_70 [1] : vector<8x8xf32> to vector<8xf32>
    %184 = vector.shape_cast %183 : vector<8xf32> to vector<8x1xf32>
    %185 = tpu.reciprocal %184 {approx = true} : vector<8x1xf32> -> vector<8x1xf32>
    %186 = arith.mulf %184, %185 : vector<8x1xf32>
    %cst_71 = arith.constant 2.000000e+00 : f32
    %187 = vector.broadcast %cst_71 : f32 to vector<8x1xf32>
    %188 = arith.subf %187, %186 : vector<8x1xf32>
    %189 = arith.mulf %185, %188 : vector<8x1xf32>
    %cst_72 = arith.constant dense<0.000000e+00> : vector<8x8xf32>
    %190 = tpu.matmul %182, %175, %cst_72 {dimension_numbers = #tpu.dot_dimension_numbers<[1], [0], [0], [1], [0, 0, 1, 1], [], []>} : vector<8x8xf32>, vector<8x8xf32>, vector<8x8xf32> -> vector<8x8xf32>
    %191 = vector.broadcast %189 : vector<8x1xf32> to vector<8x8xf32>
    %192 = arith.mulf %190, %191 : vector<8x8xf32>
    %c24_73 = arith.constant 24 : index
    %c0_74 = arith.constant 0 : index
    %193 = vector.load %arg7[%c24_73, %c0_74] : memref<32x32xf32, #tpu.memory_space<vmem>>, vector<8x32xf32>
    %cst_75 = arith.constant dense<0.000000e+00> : vector<8x32xf32>
    %194 = tpu.matmul %192, %193, %cst_75 {dimension_numbers = #tpu.dot_dimension_numbers<[1], [0], [0], [1], [0, 0, 1, 1], [], []>} : vector<8x8xf32>, vector<8x32xf32>, vector<8x32xf32> -> vector<8x32xf32>
    %195 = arith.addf %172, %194 : vector<8x32xf32>
    %c8_76 = arith.constant 8 : index
    %c0_77 = arith.constant 0 : index
    %196 = vector.load %arg26[%c8_76, %c0_77] : memref<16x32xf32, #tpu.memory_space<vmem>>, vector<8x32xf32>
    tpu.vector_store %arg26[%c8_76, %c0_77], %195 {strides = array<i32>} : memref<16x32xf32, #tpu.memory_space<vmem>>, vector<8x32xf32>,
    %c0_78 = arith.constant 0 : index
    %c0_79 = arith.constant 0 : index
    %197 = vector.load %arg26[%c0_78, %c0_79] : memref<16x32xf32, #tpu.memory_space<vmem>>, vector<16x32xf32>
    %c0_80 = arith.constant 0 : index
    %c0_81 = arith.constant 0 : index
    %198 = vector.load %arg8[%c0_80, %c0_81] : memref<1x32xf32, #tpu.memory_space<vmem>>, vector<1x32xf32>
    %199 = vector.broadcast %198 : vector<1x32xf32> to vector<16x32xf32>
    %200 = arith.addf %197, %199 : vector<16x32xf32>
    %c0_82 = arith.constant 0 : index
    %c0_83 = arith.constant 0 : index
    %201 = vector.load %arg19[%c0_82, %c0_83] : memref<1x32xf32, #tpu.memory_space<vmem>>, vector<1x32xf32>
    %c0_84 = arith.constant 0 : index
    %c0_85 = arith.constant 0 : index
    %202 = vector.load %arg20[%c0_84, %c0_85] : memref<1x32xf32, #tpu.memory_space<vmem>>, vector<1x32xf32>
    %203 = arith.addf %0, %200 : vector<16x32xf32>
    %cst_86 = arith.constant dense<0.000000e+00> : vector<16xf32>
    %204 = vector.multi_reduction <add>, %203, %cst_86 [1] : vector<16x32xf32> to vector<16xf32>
    %205 = vector.shape_cast %204 : vector<16xf32> to vector<16x1xf32>
    %cst_87 = arith.constant 3.200000e+01 : f32
    %206 = vector.broadcast %cst_87 : f32 to vector<16x1xf32>
    %207 = arith.divf %205, %206 : vector<16x1xf32>
    %208 = vector.broadcast %207 : vector<16x1xf32> to vector<16x32xf32>
    %209 = arith.subf %203, %208 : vector<16x32xf32>
    %210 = vector.broadcast %207 : vector<16x1xf32> to vector<16x32xf32>
    %211 = arith.subf %203, %210 : vector<16x32xf32>
    %212 = arith.mulf %209, %211 : vector<16x32xf32>
    %cst_88 = arith.constant dense<0.000000e+00> : vector<16xf32>
    %213 = vector.multi_reduction <add>, %212, %cst_88 [1] : vector<16x32xf32> to vector<16xf32>
    %214 = vector.shape_cast %213 : vector<16xf32> to vector<16x1xf32>
    %cst_89 = arith.constant 3.200000e+01 : f32
    %215 = vector.broadcast %cst_89 : f32 to vector<16x1xf32>
    %216 = arith.divf %214, %215 : vector<16x1xf32>
    %217 = vector.broadcast %207 : vector<16x1xf32> to vector<16x32xf32>
    %218 = arith.subf %203, %217 : vector<16x32xf32>
    %cst_90 = arith.constant 9.99999974E-6 : f32
    %219 = vector.broadcast %cst_90 : f32 to vector<16x1xf32>
    %220 = arith.addf %216, %219 : vector<16x1xf32>
    %221 = math.rsqrt %220 : vector<16x1xf32>
    %222 = vector.broadcast %221 : vector<16x1xf32> to vector<16x32xf32>
    %223 = arith.mulf %218, %222 : vector<16x32xf32>
    %224 = vector.broadcast %201 : vector<1x32xf32> to vector<16x32xf32>
    %225 = arith.mulf %223, %224 : vector<16x32xf32>
    %226 = vector.broadcast %202 : vector<1x32xf32> to vector<16x32xf32>
    %227 = arith.addf %225, %226 : vector<16x32xf32>
    %c0_91 = arith.constant 0 : index
    %c0_92 = arith.constant 0 : index
    %228 = vector.load %arg9[%c0_91, %c0_92] : memref<32x32xf32, #tpu.memory_space<vmem>>, vector<32x32xf32>
    %cst_93 = arith.constant dense<0.000000e+00> : vector<16x32xf32>
    %229 = tpu.matmul %227, %228, %cst_93 {dimension_numbers = #tpu.dot_dimension_numbers<[1], [0], [0], [1], [0, 0, 1, 1], [], []>} : vector<16x32xf32>, vector<32x32xf32>, vector<16x32xf32> -> vector<16x32xf32>
    %c0_94 = arith.constant 0 : index
    %c0_95 = arith.constant 0 : index
    %230 = vector.load %arg10[%c0_94, %c0_95] : memref<1x32xf32, #tpu.memory_space<vmem>>, vector<1x32xf32>
    %231 = vector.broadcast %230 : vector<1x32xf32> to vector<16x32xf32>
    %232 = arith.addf %229, %231 : vector<16x32xf32>
    %c0_96 = arith.constant 0 : index
    %c0_97 = arith.constant 0 : index
    %233 = vector.load %arg11[%c0_96, %c0_97] : memref<32x64xf32, #tpu.memory_space<vmem>>, vector<32x64xf32>
    %cst_98 = arith.constant dense<0.000000e+00> : vector<32x64xf32>
    %234 = tpu.matmul %1, %233, %cst_98 {dimension_numbers = #tpu.dot_dimension_numbers<[1], [0], [0], [1], [0, 0, 1, 1], [], []>} : vector<32x32xf32>, vector<32x64xf32>, vector<32x64xf32> -> vector<32x64xf32>
    %c0_99 = arith.constant 0 : index
    %c0_100 = arith.constant 0 : index
    %235 = vector.load %arg12[%c0_99, %c0_100] : memref<1x64xf32, #tpu.memory_space<vmem>>, vector<1x64xf32>
    %236 = vector.broadcast %235 : vector<1x64xf32> to vector<32x64xf32>
    %237 = arith.addf %234, %236 : vector<32x64xf32>
    %c0_101 = arith.constant 0 : index
    %c0_102 = arith.constant 0 : index
    %238 = vector.load %arg4[%c0_101, %c0_102] : memref<16x16xf32, #tpu.memory_space<vmem>>, vector<8x16xf32>
    %cst_103 = arith.constant 0.000000e+00 : f32
    %239 = vector.broadcast %cst_103 : f32 to vector<8x32xf32>
    %240 = vector.extract_strided_slice %232 {offsets = [0, 0], sizes = [8, 8], strides = [1, 1]} : vector<16x32xf32> to vector<8x8xf32>
    %241 = vector.extract_strided_slice %237 {offsets = [0, 0], sizes = [16, 8], strides = [1, 1]} : vector<32x64xf32> to vector<16x8xf32>
    %242 = vector.extract_strided_slice %237 {offsets = [0, 32], sizes = [16, 8], strides = [1, 1]} : vector<32x64xf32> to vector<16x8xf32>
    %cst_104 = arith.constant dense<0.000000e+00> : vector<8x16xf32>
    %243 = tpu.matmul %240, %241, %cst_104 {dimension_numbers = #tpu.dot_dimension_numbers<[1], [1], [0], [0], [0, 0, 1, 0], [], []>} : vector<8x8xf32>, vector<16x8xf32>, vector<8x16xf32> -> vector<8x16xf32>
    %244 = arith.addf %243, %238 : vector<8x16xf32>
    %cst_105 = arith.constant dense<0xFF800000> : vector<8xf32>
    %245 = vector.multi_reduction <maximumf>, %244, %cst_105 [1] : vector<8x16xf32> to vector<8xf32>
    %246 = vector.shape_cast %245 : vector<8xf32> to vector<8x1xf32>
    %247 = vector.broadcast %246 : vector<8x1xf32> to vector<8x16xf32>
    %248 = arith.subf %244, %247 : vector<8x16xf32>
    %249 = math.exp %248 : vector<8x16xf32>
    %cst_106 = arith.constant dense<0.000000e+00> : vector<8xf32>
    %250 = vector.multi_reduction <add>, %249, %cst_106 [1] : vector<8x16xf32> to vector<8xf32>
    %251 = vector.shape_cast %250 : vector<8xf32> to vector<8x1xf32>
    %252 = tpu.reciprocal %251 {approx = true} : vector<8x1xf32> -> vector<8x1xf32>
    %253 = arith.mulf %251, %252 : vector<8x1xf32>
    %cst_107 = arith.constant 2.000000e+00 : f32
    %254 = vector.broadcast %cst_107 : f32 to vector<8x1xf32>
    %255 = arith.subf %254, %253 : vector<8x1xf32>
    %256 = arith.mulf %252, %255 : vector<8x1xf32>
    %cst_108 = arith.constant dense<0.000000e+00> : vector<8x8xf32>
    %257 = tpu.matmul %249, %242, %cst_108 {dimension_numbers = #tpu.dot_dimension_numbers<[1], [0], [0], [1], [0, 0, 1, 1], [], []>} : vector<8x16xf32>, vector<16x8xf32>, vector<8x8xf32> -> vector<8x8xf32>
    %258 = vector.broadcast %256 : vector<8x1xf32> to vector<8x8xf32>
    %259 = arith.mulf %257, %258 : vector<8x8xf32>
    %c0_109 = arith.constant 0 : index
    %c0_110 = arith.constant 0 : index
    %260 = vector.load %arg13[%c0_109, %c0_110] : memref<32x32xf32, #tpu.memory_space<vmem>>, vector<8x32xf32>
    %cst_111 = arith.constant dense<0.000000e+00> : vector<8x32xf32>
    %261 = tpu.matmul %259, %260, %cst_111 {dimension_numbers = #tpu.dot_dimension_numbers<[1], [0], [0], [1], [0, 0, 1, 1], [], []>} : vector<8x8xf32>, vector<8x32xf32>, vector<8x32xf32> -> vector<8x32xf32>
    %262 = arith.addf %239, %261 : vector<8x32xf32>
    %263 = vector.extract_strided_slice %232 {offsets = [0, 8], sizes = [8, 8], strides = [1, 1]} : vector<16x32xf32> to vector<8x8xf32>
    %264 = vector.extract_strided_slice %237 {offsets = [0, 8], sizes = [16, 8], strides = [1, 1]} : vector<32x64xf32> to vector<16x8xf32>
    %265 = vector.extract_strided_slice %237 {offsets = [0, 40], sizes = [16, 8], strides = [1, 1]} : vector<32x64xf32> to vector<16x8xf32>
    %cst_112 = arith.constant dense<0.000000e+00> : vector<8x16xf32>
    %266 = tpu.matmul %263, %264, %cst_112 {dimension_numbers = #tpu.dot_dimension_numbers<[1], [1], [0], [0], [0, 0, 1, 0], [], []>} : vector<8x8xf32>, vector<16x8xf32>, vector<8x16xf32> -> vector<8x16xf32>
    %267 = arith.addf %266, %238 : vector<8x16xf32>
    %cst_113 = arith.constant dense<0xFF800000> : vector<8xf32>
    %268 = vector.multi_reduction <maximumf>, %267, %cst_113 [1] : vector<8x16xf32> to vector<8xf32>
    %269 = vector.shape_cast %268 : vector<8xf32> to vector<8x1xf32>
    %270 = vector.broadcast %269 : vector<8x1xf32> to vector<8x16xf32>
    %271 = arith.subf %267, %270 : vector<8x16xf32>
    %272 = math.exp %271 : vector<8x16xf32>
    %cst_114 = arith.constant dense<0.000000e+00> : vector<8xf32>
    %273 = vector.multi_reduction <add>, %272, %cst_114 [1] : vector<8x16xf32> to vector<8xf32>
    %274 = vector.shape_cast %273 : vector<8xf32> to vector<8x1xf32>
    %275 = tpu.reciprocal %274 {approx = true} : vector<8x1xf32> -> vector<8x1xf32>
    %276 = arith.mulf %274, %275 : vector<8x1xf32>
    %cst_115 = arith.constant 2.000000e+00 : f32
    %277 = vector.broadcast %cst_115 : f32 to vector<8x1xf32>
    %278 = arith.subf %277, %276 : vector<8x1xf32>
    %279 = arith.mulf %275, %278 : vector<8x1xf32>
    %cst_116 = arith.constant dense<0.000000e+00> : vector<8x8xf32>
    %280 = tpu.matmul %272, %265, %cst_116 {dimension_numbers = #tpu.dot_dimension_numbers<[1], [0], [0], [1], [0, 0, 1, 1], [], []>} : vector<8x16xf32>, vector<16x8xf32>, vector<8x8xf32> -> vector<8x8xf32>
    %281 = vector.broadcast %279 : vector<8x1xf32> to vector<8x8xf32>
    %282 = arith.mulf %280, %281 : vector<8x8xf32>
    %c8_117 = arith.constant 8 : index
    %c0_118 = arith.constant 0 : index
    %283 = vector.load %arg13[%c8_117, %c0_118] : memref<32x32xf32, #tpu.memory_space<vmem>>, vector<8x32xf32>
    %cst_119 = arith.constant dense<0.000000e+00> : vector<8x32xf32>
    %284 = tpu.matmul %282, %283, %cst_119 {dimension_numbers = #tpu.dot_dimension_numbers<[1], [0], [0], [1], [0, 0, 1, 1], [], []>} : vector<8x8xf32>, vector<8x32xf32>, vector<8x32xf32> -> vector<8x32xf32>
    %285 = arith.addf %262, %284 : vector<8x32xf32>
    %286 = vector.extract_strided_slice %232 {offsets = [0, 16], sizes = [8, 8], strides = [1, 1]} : vector<16x32xf32> to vector<8x8xf32>
    %287 = vector.extract_strided_slice %237 {offsets = [0, 16], sizes = [16, 8], strides = [1, 1]} : vector<32x64xf32> to vector<16x8xf32>
    %288 = vector.extract_strided_slice %237 {offsets = [0, 48], sizes = [16, 8], strides = [1, 1]} : vector<32x64xf32> to vector<16x8xf32>
    %cst_120 = arith.constant dense<0.000000e+00> : vector<8x16xf32>
    %289 = tpu.matmul %286, %287, %cst_120 {dimension_numbers = #tpu.dot_dimension_numbers<[1], [1], [0], [0], [0, 0, 1, 0], [], []>} : vector<8x8xf32>, vector<16x8xf32>, vector<8x16xf32> -> vector<8x16xf32>
    %290 = arith.addf %289, %238 : vector<8x16xf32>
    %cst_121 = arith.constant dense<0xFF800000> : vector<8xf32>
    %291 = vector.multi_reduction <maximumf>, %290, %cst_121 [1] : vector<8x16xf32> to vector<8xf32>
    %292 = vector.shape_cast %291 : vector<8xf32> to vector<8x1xf32>
    %293 = vector.broadcast %292 : vector<8x1xf32> to vector<8x16xf32>
    %294 = arith.subf %290, %293 : vector<8x16xf32>
    %295 = math.exp %294 : vector<8x16xf32>
    %cst_122 = arith.constant dense<0.000000e+00> : vector<8xf32>
    %296 = vector.multi_reduction <add>, %295, %cst_122 [1] : vector<8x16xf32> to vector<8xf32>
    %297 = vector.shape_cast %296 : vector<8xf32> to vector<8x1xf32>
    %298 = tpu.reciprocal %297 {approx = true} : vector<8x1xf32> -> vector<8x1xf32>
    %299 = arith.mulf %297, %298 : vector<8x1xf32>
    %cst_123 = arith.constant 2.000000e+00 : f32
    %300 = vector.broadcast %cst_123 : f32 to vector<8x1xf32>
    %301 = arith.subf %300, %299 : vector<8x1xf32>
    %302 = arith.mulf %298, %301 : vector<8x1xf32>
    %cst_124 = arith.constant dense<0.000000e+00> : vector<8x8xf32>
    %303 = tpu.matmul %295, %288, %cst_124 {dimension_numbers = #tpu.dot_dimension_numbers<[1], [0], [0], [1], [0, 0, 1, 1], [], []>} : vector<8x16xf32>, vector<16x8xf32>, vector<8x8xf32> -> vector<8x8xf32>
    %304 = vector.broadcast %302 : vector<8x1xf32> to vector<8x8xf32>
    %305 = arith.mulf %303, %304 : vector<8x8xf32>
    %c16_125 = arith.constant 16 : index
    %c0_126 = arith.constant 0 : index
    %306 = vector.load %arg13[%c16_125, %c0_126] : memref<32x32xf32, #tpu.memory_space<vmem>>, vector<8x32xf32>
    %cst_127 = arith.constant dense<0.000000e+00> : vector<8x32xf32>
    %307 = tpu.matmul %305, %306, %cst_127 {dimension_numbers = #tpu.dot_dimension_numbers<[1], [0], [0], [1], [0, 0, 1, 1], [], []>} : vector<8x8xf32>, vector<8x32xf32>, vector<8x32xf32> -> vector<8x32xf32>
    %308 = arith.addf %285, %307 : vector<8x32xf32>
    %309 = vector.extract_strided_slice %232 {offsets = [0, 24], sizes = [8, 8], strides = [1, 1]} : vector<16x32xf32> to vector<8x8xf32>
    %310 = vector.extract_strided_slice %237 {offsets = [0, 24], sizes = [16, 8], strides = [1, 1]} : vector<32x64xf32> to vector<16x8xf32>
    %311 = vector.extract_strided_slice %237 {offsets = [0, 56], sizes = [16, 8], strides = [1, 1]} : vector<32x64xf32> to vector<16x8xf32>
    %cst_128 = arith.constant dense<0.000000e+00> : vector<8x16xf32>
    %312 = tpu.matmul %309, %310, %cst_128 {dimension_numbers = #tpu.dot_dimension_numbers<[1], [1], [0], [0], [0, 0, 1, 0], [], []>} : vector<8x8xf32>, vector<16x8xf32>, vector<8x16xf32> -> vector<8x16xf32>
    %313 = arith.addf %312, %238 : vector<8x16xf32>
    %cst_129 = arith.constant dense<0xFF800000> : vector<8xf32>
    %314 = vector.multi_reduction <maximumf>, %313, %cst_129 [1] : vector<8x16xf32> to vector<8xf32>
    %315 = vector.shape_cast %314 : vector<8xf32> to vector<8x1xf32>
    %316 = vector.broadcast %315 : vector<8x1xf32> to vector<8x16xf32>
    %317 = arith.subf %313, %316 : vector<8x16xf32>
    %318 = math.exp %317 : vector<8x16xf32>
    %cst_130 = arith.constant dense<0.000000e+00> : vector<8xf32>
    %319 = vector.multi_reduction <add>, %318, %cst_130 [1] : vector<8x16xf32> to vector<8xf32>
    %320 = vector.shape_cast %319 : vector<8xf32> to vector<8x1xf32>
    %321 = tpu.reciprocal %320 {approx = true} : vector<8x1xf32> -> vector<8x1xf32>
    %322 = arith.mulf %320, %321 : vector<8x1xf32>
    %cst_131 = arith.constant 2.000000e+00 : f32
    %323 = vector.broadcast %cst_131 : f32 to vector<8x1xf32>
    %324 = arith.subf %323, %322 : vector<8x1xf32>
    %325 = arith.mulf %321, %324 : vector<8x1xf32>
    %cst_132 = arith.constant dense<0.000000e+00> : vector<8x8xf32>
    %326 = tpu.matmul %318, %311, %cst_132 {dimension_numbers = #tpu.dot_dimension_numbers<[1], [0], [0], [1], [0, 0, 1, 1], [], []>} : vector<8x16xf32>, vector<16x8xf32>, vector<8x8xf32> -> vector<8x8xf32>
    %327 = vector.broadcast %325 : vector<8x1xf32> to vector<8x8xf32>
    %328 = arith.mulf %326, %327 : vector<8x8xf32>
    %c24_133 = arith.constant 24 : index
    %c0_134 = arith.constant 0 : index
    %329 = vector.load %arg13[%c24_133, %c0_134] : memref<32x32xf32, #tpu.memory_space<vmem>>, vector<8x32xf32>
    %cst_135 = arith.constant dense<0.000000e+00> : vector<8x32xf32>
    %330 = tpu.matmul %328, %329, %cst_135 {dimension_numbers = #tpu.dot_dimension_numbers<[1], [0], [0], [1], [0, 0, 1, 1], [], []>} : vector<8x8xf32>, vector<8x32xf32>, vector<8x32xf32> -> vector<8x32xf32>
    %331 = arith.addf %308, %330 : vector<8x32xf32>
    %c0_136 = arith.constant 0 : index
    %c0_137 = arith.constant 0 : index
    %332 = vector.load %arg26[%c0_136, %c0_137] : memref<16x32xf32, #tpu.memory_space<vmem>>, vector<8x32xf32>
    tpu.vector_store %arg26[%c0_136, %c0_137], %331 {strides = array<i32>} : memref<16x32xf32, #tpu.memory_space<vmem>>, vector<8x32xf32>,
    %c8_138 = arith.constant 8 : index
    %c0_139 = arith.constant 0 : index
    %333 = vector.load %arg4[%c8_138, %c0_139] : memref<16x16xf32, #tpu.memory_space<vmem>>, vector<8x16xf32>
    %cst_140 = arith.constant 0.000000e+00 : f32
    %334 = vector.broadcast %cst_140 : f32 to vector<8x32xf32>
    %335 = vector.extract_strided_slice %232 {offsets = [8, 0], sizes = [8, 8], strides = [1, 1]} : vector<16x32xf32> to vector<8x8xf32>
    %336 = vector.extract_strided_slice %237 {offsets = [16, 0], sizes = [16, 8], strides = [1, 1]} : vector<32x64xf32> to vector<16x8xf32>
    %337 = vector.extract_strided_slice %237 {offsets = [16, 32], sizes = [16, 8], strides = [1, 1]} : vector<32x64xf32> to vector<16x8xf32>
    %cst_141 = arith.constant dense<0.000000e+00> : vector<8x16xf32>
    %338 = tpu.matmul %335, %336, %cst_141 {dimension_numbers = #tpu.dot_dimension_numbers<[1], [1], [0], [0], [0, 0, 1, 0], [], []>} : vector<8x8xf32>, vector<16x8xf32>, vector<8x16xf32> -> vector<8x16xf32>
    %339 = arith.addf %338, %333 : vector<8x16xf32>
    %cst_142 = arith.constant dense<0xFF800000> : vector<8xf32>
    %340 = vector.multi_reduction <maximumf>, %339, %cst_142 [1] : vector<8x16xf32> to vector<8xf32>
    %341 = vector.shape_cast %340 : vector<8xf32> to vector<8x1xf32>
    %342 = vector.broadcast %341 : vector<8x1xf32> to vector<8x16xf32>
    %343 = arith.subf %339, %342 : vector<8x16xf32>
    %344 = math.exp %343 : vector<8x16xf32>
    %cst_143 = arith.constant dense<0.000000e+00> : vector<8xf32>
    %345 = vector.multi_reduction <add>, %344, %cst_143 [1] : vector<8x16xf32> to vector<8xf32>
    %346 = vector.shape_cast %345 : vector<8xf32> to vector<8x1xf32>
    %347 = tpu.reciprocal %346 {approx = true} : vector<8x1xf32> -> vector<8x1xf32>
    %348 = arith.mulf %346, %347 : vector<8x1xf32>
    %cst_144 = arith.constant 2.000000e+00 : f32
    %349 = vector.broadcast %cst_144 : f32 to vector<8x1xf32>
    %350 = arith.subf %349, %348 : vector<8x1xf32>
    %351 = arith.mulf %347, %350 : vector<8x1xf32>
    %cst_145 = arith.constant dense<0.000000e+00> : vector<8x8xf32>
    %352 = tpu.matmul %344, %337, %cst_145 {dimension_numbers = #tpu.dot_dimension_numbers<[1], [0], [0], [1], [0, 0, 1, 1], [], []>} : vector<8x16xf32>, vector<16x8xf32>, vector<8x8xf32> -> vector<8x8xf32>
    %353 = vector.broadcast %351 : vector<8x1xf32> to vector<8x8xf32>
    %354 = arith.mulf %352, %353 : vector<8x8xf32>
    %c0_146 = arith.constant 0 : index
    %c0_147 = arith.constant 0 : index
    %355 = vector.load %arg13[%c0_146, %c0_147] : memref<32x32xf32, #tpu.memory_space<vmem>>, vector<8x32xf32>
    %cst_148 = arith.constant dense<0.000000e+00> : vector<8x32xf32>
    %356 = tpu.matmul %354, %355, %cst_148 {dimension_numbers = #tpu.dot_dimension_numbers<[1], [0], [0], [1], [0, 0, 1, 1], [], []>} : vector<8x8xf32>, vector<8x32xf32>, vector<8x32xf32> -> vector<8x32xf32>
    %357 = arith.addf %334, %356 : vector<8x32xf32>
    %358 = vector.extract_strided_slice %232 {offsets = [8, 8], sizes = [8, 8], strides = [1, 1]} : vector<16x32xf32> to vector<8x8xf32>
    %359 = vector.extract_strided_slice %237 {offsets = [16, 8], sizes = [16, 8], strides = [1, 1]} : vector<32x64xf32> to vector<16x8xf32>
    %360 = vector.extract_strided_slice %237 {offsets = [16, 40], sizes = [16, 8], strides = [1, 1]} : vector<32x64xf32> to vector<16x8xf32>
    %cst_149 = arith.constant dense<0.000000e+00> : vector<8x16xf32>
    %361 = tpu.matmul %358, %359, %cst_149 {dimension_numbers = #tpu.dot_dimension_numbers<[1], [1], [0], [0], [0, 0, 1, 0], [], []>} : vector<8x8xf32>, vector<16x8xf32>, vector<8x16xf32> -> vector<8x16xf32>
    %362 = arith.addf %361, %333 : vector<8x16xf32>
    %cst_150 = arith.constant dense<0xFF800000> : vector<8xf32>
    %363 = vector.multi_reduction <maximumf>, %362, %cst_150 [1] : vector<8x16xf32> to vector<8xf32>
    %364 = vector.shape_cast %363 : vector<8xf32> to vector<8x1xf32>
    %365 = vector.broadcast %364 : vector<8x1xf32> to vector<8x16xf32>
    %366 = arith.subf %362, %365 : vector<8x16xf32>
    %367 = math.exp %366 : vector<8x16xf32>
    %cst_151 = arith.constant dense<0.000000e+00> : vector<8xf32>
    %368 = vector.multi_reduction <add>, %367, %cst_151 [1] : vector<8x16xf32> to vector<8xf32>
    %369 = vector.shape_cast %368 : vector<8xf32> to vector<8x1xf32>
    %370 = tpu.reciprocal %369 {approx = true} : vector<8x1xf32> -> vector<8x1xf32>
    %371 = arith.mulf %369, %370 : vector<8x1xf32>
    %cst_152 = arith.constant 2.000000e+00 : f32
    %372 = vector.broadcast %cst_152 : f32 to vector<8x1xf32>
    %373 = arith.subf %372, %371 : vector<8x1xf32>
    %374 = arith.mulf %370, %373 : vector<8x1xf32>
    %cst_153 = arith.constant dense<0.000000e+00> : vector<8x8xf32>
    %375 = tpu.matmul %367, %360, %cst_153 {dimension_numbers = #tpu.dot_dimension_numbers<[1], [0], [0], [1], [0, 0, 1, 1], [], []>} : vector<8x16xf32>, vector<16x8xf32>, vector<8x8xf32> -> vector<8x8xf32>
    %376 = vector.broadcast %374 : vector<8x1xf32> to vector<8x8xf32>
    %377 = arith.mulf %375, %376 : vector<8x8xf32>
    %c8_154 = arith.constant 8 : index
    %c0_155 = arith.constant 0 : index
    %378 = vector.load %arg13[%c8_154, %c0_155] : memref<32x32xf32, #tpu.memory_space<vmem>>, vector<8x32xf32>
    %cst_156 = arith.constant dense<0.000000e+00> : vector<8x32xf32>
    %379 = tpu.matmul %377, %378, %cst_156 {dimension_numbers = #tpu.dot_dimension_numbers<[1], [0], [0], [1], [0, 0, 1, 1], [], []>} : vector<8x8xf32>, vector<8x32xf32>, vector<8x32xf32> -> vector<8x32xf32>
    %380 = arith.addf %357, %379 : vector<8x32xf32>
    %381 = vector.extract_strided_slice %232 {offsets = [8, 16], sizes = [8, 8], strides = [1, 1]} : vector<16x32xf32> to vector<8x8xf32>
    %382 = vector.extract_strided_slice %237 {offsets = [16, 16], sizes = [16, 8], strides = [1, 1]} : vector<32x64xf32> to vector<16x8xf32>
    %383 = vector.extract_strided_slice %237 {offsets = [16, 48], sizes = [16, 8], strides = [1, 1]} : vector<32x64xf32> to vector<16x8xf32>
    %cst_157 = arith.constant dense<0.000000e+00> : vector<8x16xf32>
    %384 = tpu.matmul %381, %382, %cst_157 {dimension_numbers = #tpu.dot_dimension_numbers<[1], [1], [0], [0], [0, 0, 1, 0], [], []>} : vector<8x8xf32>, vector<16x8xf32>, vector<8x16xf32> -> vector<8x16xf32>
    %385 = arith.addf %384, %333 : vector<8x16xf32>
    %cst_158 = arith.constant dense<0xFF800000> : vector<8xf32>
    %386 = vector.multi_reduction <maximumf>, %385, %cst_158 [1] : vector<8x16xf32> to vector<8xf32>
    %387 = vector.shape_cast %386 : vector<8xf32> to vector<8x1xf32>
    %388 = vector.broadcast %387 : vector<8x1xf32> to vector<8x16xf32>
    %389 = arith.subf %385, %388 : vector<8x16xf32>
    %390 = math.exp %389 : vector<8x16xf32>
    %cst_159 = arith.constant dense<0.000000e+00> : vector<8xf32>
    %391 = vector.multi_reduction <add>, %390, %cst_159 [1] : vector<8x16xf32> to vector<8xf32>
    %392 = vector.shape_cast %391 : vector<8xf32> to vector<8x1xf32>
    %393 = tpu.reciprocal %392 {approx = true} : vector<8x1xf32> -> vector<8x1xf32>
    %394 = arith.mulf %392, %393 : vector<8x1xf32>
    %cst_160 = arith.constant 2.000000e+00 : f32
    %395 = vector.broadcast %cst_160 : f32 to vector<8x1xf32>
    %396 = arith.subf %395, %394 : vector<8x1xf32>
    %397 = arith.mulf %393, %396 : vector<8x1xf32>
    %cst_161 = arith.constant dense<0.000000e+00> : vector<8x8xf32>
    %398 = tpu.matmul %390, %383, %cst_161 {dimension_numbers = #tpu.dot_dimension_numbers<[1], [0], [0], [1], [0, 0, 1, 1], [], []>} : vector<8x16xf32>, vector<16x8xf32>, vector<8x8xf32> -> vector<8x8xf32>
    %399 = vector.broadcast %397 : vector<8x1xf32> to vector<8x8xf32>
    %400 = arith.mulf %398, %399 : vector<8x8xf32>
    %c16_162 = arith.constant 16 : index
    %c0_163 = arith.constant 0 : index
    %401 = vector.load %arg13[%c16_162, %c0_163] : memref<32x32xf32, #tpu.memory_space<vmem>>, vector<8x32xf32>
    %cst_164 = arith.constant dense<0.000000e+00> : vector<8x32xf32>
    %402 = tpu.matmul %400, %401, %cst_164 {dimension_numbers = #tpu.dot_dimension_numbers<[1], [0], [0], [1], [0, 0, 1, 1], [], []>} : vector<8x8xf32>, vector<8x32xf32>, vector<8x32xf32> -> vector<8x32xf32>
    %403 = arith.addf %380, %402 : vector<8x32xf32>
    %404 = vector.extract_strided_slice %232 {offsets = [8, 24], sizes = [8, 8], strides = [1, 1]} : vector<16x32xf32> to vector<8x8xf32>
    %405 = vector.extract_strided_slice %237 {offsets = [16, 24], sizes = [16, 8], strides = [1, 1]} : vector<32x64xf32> to vector<16x8xf32>
    %406 = vector.extract_strided_slice %237 {offsets = [16, 56], sizes = [16, 8], strides = [1, 1]} : vector<32x64xf32> to vector<16x8xf32>
    %cst_165 = arith.constant dense<0.000000e+00> : vector<8x16xf32>
    %407 = tpu.matmul %404, %405, %cst_165 {dimension_numbers = #tpu.dot_dimension_numbers<[1], [1], [0], [0], [0, 0, 1, 0], [], []>} : vector<8x8xf32>, vector<16x8xf32>, vector<8x16xf32> -> vector<8x16xf32>
    %408 = arith.addf %407, %333 : vector<8x16xf32>
    %cst_166 = arith.constant dense<0xFF800000> : vector<8xf32>
    %409 = vector.multi_reduction <maximumf>, %408, %cst_166 [1] : vector<8x16xf32> to vector<8xf32>
    %410 = vector.shape_cast %409 : vector<8xf32> to vector<8x1xf32>
    %411 = vector.broadcast %410 : vector<8x1xf32> to vector<8x16xf32>
    %412 = arith.subf %408, %411 : vector<8x16xf32>
    %413 = math.exp %412 : vector<8x16xf32>
    %cst_167 = arith.constant dense<0.000000e+00> : vector<8xf32>
    %414 = vector.multi_reduction <add>, %413, %cst_167 [1] : vector<8x16xf32> to vector<8xf32>
    %415 = vector.shape_cast %414 : vector<8xf32> to vector<8x1xf32>
    %416 = tpu.reciprocal %415 {approx = true} : vector<8x1xf32> -> vector<8x1xf32>
    %417 = arith.mulf %415, %416 : vector<8x1xf32>
    %cst_168 = arith.constant 2.000000e+00 : f32
    %418 = vector.broadcast %cst_168 : f32 to vector<8x1xf32>
    %419 = arith.subf %418, %417 : vector<8x1xf32>
    %420 = arith.mulf %416, %419 : vector<8x1xf32>
    %cst_169 = arith.constant dense<0.000000e+00> : vector<8x8xf32>
    %421 = tpu.matmul %413, %406, %cst_169 {dimension_numbers = #tpu.dot_dimension_numbers<[1], [0], [0], [1], [0, 0, 1, 1], [], []>} : vector<8x16xf32>, vector<16x8xf32>, vector<8x8xf32> -> vector<8x8xf32>
    %422 = vector.broadcast %420 : vector<8x1xf32> to vector<8x8xf32>
    %423 = arith.mulf %421, %422 : vector<8x8xf32>
    %c24_170 = arith.constant 24 : index
    %c0_171 = arith.constant 0 : index
    %424 = vector.load %arg13[%c24_170, %c0_171] : memref<32x32xf32, #tpu.memory_space<vmem>>, vector<8x32xf32>
    %cst_172 = arith.constant dense<0.000000e+00> : vector<8x32xf32>
    %425 = tpu.matmul %423, %424, %cst_172 {dimension_numbers = #tpu.dot_dimension_numbers<[1], [0], [0], [1], [0, 0, 1, 1], [], []>} : vector<8x8xf32>, vector<8x32xf32>, vector<8x32xf32> -> vector<8x32xf32>
    %426 = arith.addf %403, %425 : vector<8x32xf32>
    %c8_173 = arith.constant 8 : index
    %c0_174 = arith.constant 0 : index
    %427 = vector.load %arg26[%c8_173, %c0_174] : memref<16x32xf32, #tpu.memory_space<vmem>>, vector<8x32xf32>
    tpu.vector_store %arg26[%c8_173, %c0_174], %426 {strides = array<i32>} : memref<16x32xf32, #tpu.memory_space<vmem>>, vector<8x32xf32>,
    %c0_175 = arith.constant 0 : index
    %c0_176 = arith.constant 0 : index
    %428 = vector.load %arg26[%c0_175, %c0_176] : memref<16x32xf32, #tpu.memory_space<vmem>>, vector<16x32xf32>
    %c0_177 = arith.constant 0 : index
    %c0_178 = arith.constant 0 : index
    %429 = vector.load %arg14[%c0_177, %c0_178] : memref<1x32xf32, #tpu.memory_space<vmem>>, vector<1x32xf32>
    %430 = vector.broadcast %429 : vector<1x32xf32> to vector<16x32xf32>
    %431 = arith.addf %428, %430 : vector<16x32xf32>
    %c0_179 = arith.constant 0 : index
    %c0_180 = arith.constant 0 : index
    %432 = vector.load %arg21[%c0_179, %c0_180] : memref<1x32xf32, #tpu.memory_space<vmem>>, vector<1x32xf32>
    %c0_181 = arith.constant 0 : index
    %c0_182 = arith.constant 0 : index
    %433 = vector.load %arg22[%c0_181, %c0_182] : memref<1x32xf32, #tpu.memory_space<vmem>>, vector<1x32xf32>
    %434 = arith.addf %227, %431 : vector<16x32xf32>
    %cst_183 = arith.constant dense<0.000000e+00> : vector<16xf32>
    %435 = vector.multi_reduction <add>, %434, %cst_183 [1] : vector<16x32xf32> to vector<16xf32>
    %436 = vector.shape_cast %435 : vector<16xf32> to vector<16x1xf32>
    %cst_184 = arith.constant 3.200000e+01 : f32
    %437 = vector.broadcast %cst_184 : f32 to vector<16x1xf32>
    %438 = arith.divf %436, %437 : vector<16x1xf32>
    %439 = vector.broadcast %438 : vector<16x1xf32> to vector<16x32xf32>
    %440 = arith.subf %434, %439 : vector<16x32xf32>
    %441 = vector.broadcast %438 : vector<16x1xf32> to vector<16x32xf32>
    %442 = arith.subf %434, %441 : vector<16x32xf32>
    %443 = arith.mulf %440, %442 : vector<16x32xf32>
    %cst_185 = arith.constant dense<0.000000e+00> : vector<16xf32>
    %444 = vector.multi_reduction <add>, %443, %cst_185 [1] : vector<16x32xf32> to vector<16xf32>
    %445 = vector.shape_cast %444 : vector<16xf32> to vector<16x1xf32>
    %cst_186 = arith.constant 3.200000e+01 : f32
    %446 = vector.broadcast %cst_186 : f32 to vector<16x1xf32>
    %447 = arith.divf %445, %446 : vector<16x1xf32>
    %448 = vector.broadcast %438 : vector<16x1xf32> to vector<16x32xf32>
    %449 = arith.subf %434, %448 : vector<16x32xf32>
    %cst_187 = arith.constant 9.99999974E-6 : f32
    %450 = vector.broadcast %cst_187 : f32 to vector<16x1xf32>
    %451 = arith.addf %447, %450 : vector<16x1xf32>
    %452 = math.rsqrt %451 : vector<16x1xf32>
    %453 = vector.broadcast %452 : vector<16x1xf32> to vector<16x32xf32>
    %454 = arith.mulf %449, %453 : vector<16x32xf32>
    %455 = vector.broadcast %432 : vector<1x32xf32> to vector<16x32xf32>
    %456 = arith.mulf %454, %455 : vector<16x32xf32>
    %457 = vector.broadcast %433 : vector<1x32xf32> to vector<16x32xf32>
    %458 = arith.addf %456, %457 : vector<16x32xf32>
    %c0_188 = arith.constant 0 : index
    %c0_189 = arith.constant 0 : index
    %459 = vector.load %arg15[%c0_188, %c0_189] : memref<32x64xf32, #tpu.memory_space<vmem>>, vector<32x64xf32>
    %cst_190 = arith.constant dense<0.000000e+00> : vector<16x64xf32>
    %460 = tpu.matmul %458, %459, %cst_190 {dimension_numbers = #tpu.dot_dimension_numbers<[1], [0], [0], [1], [0, 0, 1, 1], [], []>} : vector<16x32xf32>, vector<32x64xf32>, vector<16x64xf32> -> vector<16x64xf32>
    %c0_191 = arith.constant 0 : index
    %c0_192 = arith.constant 0 : index
    %461 = vector.load %arg16[%c0_191, %c0_192] : memref<1x64xf32, #tpu.memory_space<vmem>>, vector<1x64xf32>
    %462 = vector.broadcast %461 : vector<1x64xf32> to vector<16x64xf32>
    %463 = arith.addf %460, %462 : vector<16x64xf32>
    %cst_193 = arith.constant 0.000000e+00 : f32
    %464 = vector.broadcast %cst_193 : f32 to vector<16x64xf32>
    %465 = arith.maximumf %463, %464 : vector<16x64xf32>
    %c0_194 = arith.constant 0 : index
    %c0_195 = arith.constant 0 : index
    %466 = vector.load %arg17[%c0_194, %c0_195] : memref<64x32xf32, #tpu.memory_space<vmem>>, vector<64x32xf32>
    %cst_196 = arith.constant dense<0.000000e+00> : vector<16x32xf32>
    %467 = tpu.matmul %465, %466, %cst_196 {dimension_numbers = #tpu.dot_dimension_numbers<[1], [0], [0], [1], [0, 0, 1, 1], [], []>} : vector<16x64xf32>, vector<64x32xf32>, vector<16x32xf32> -> vector<16x32xf32>
    %c0_197 = arith.constant 0 : index
    %c0_198 = arith.constant 0 : index
    %468 = vector.load %arg18[%c0_197, %c0_198] : memref<1x32xf32, #tpu.memory_space<vmem>>, vector<1x32xf32>
    %469 = vector.broadcast %468 : vector<1x32xf32> to vector<16x32xf32>
    %470 = arith.addf %467, %469 : vector<16x32xf32>
    %c0_199 = arith.constant 0 : index
    %c0_200 = arith.constant 0 : index
    %471 = vector.load %arg23[%c0_199, %c0_200] : memref<1x32xf32, #tpu.memory_space<vmem>>, vector<1x32xf32>
    %c0_201 = arith.constant 0 : index
    %c0_202 = arith.constant 0 : index
    %472 = vector.load %arg24[%c0_201, %c0_202] : memref<1x32xf32, #tpu.memory_space<vmem>>, vector<1x32xf32>
    %473 = arith.addf %458, %470 : vector<16x32xf32>
    %cst_203 = arith.constant dense<0.000000e+00> : vector<16xf32>
    %474 = vector.multi_reduction <add>, %473, %cst_203 [1] : vector<16x32xf32> to vector<16xf32>
    %475 = vector.shape_cast %474 : vector<16xf32> to vector<16x1xf32>
    %cst_204 = arith.constant 3.200000e+01 : f32
    %476 = vector.broadcast %cst_204 : f32 to vector<16x1xf32>
    %477 = arith.divf %475, %476 : vector<16x1xf32>
    %478 = vector.broadcast %477 : vector<16x1xf32> to vector<16x32xf32>
    %479 = arith.subf %473, %478 : vector<16x32xf32>
    %480 = vector.broadcast %477 : vector<16x1xf32> to vector<16x32xf32>
    %481 = arith.subf %473, %480 : vector<16x32xf32>
    %482 = arith.mulf %479, %481 : vector<16x32xf32>
    %cst_205 = arith.constant dense<0.000000e+00> : vector<16xf32>
    %483 = vector.multi_reduction <add>, %482, %cst_205 [1] : vector<16x32xf32> to vector<16xf32>
    %484 = vector.shape_cast %483 : vector<16xf32> to vector<16x1xf32>
    %cst_206 = arith.constant 3.200000e+01 : f32
    %485 = vector.broadcast %cst_206 : f32 to vector<16x1xf32>
    %486 = arith.divf %484, %485 : vector<16x1xf32>
    %487 = vector.broadcast %477 : vector<16x1xf32> to vector<16x32xf32>
    %488 = arith.subf %473, %487 : vector<16x32xf32>
    %cst_207 = arith.constant 9.99999974E-6 : f32
    %489 = vector.broadcast %cst_207 : f32 to vector<16x1xf32>
    %490 = arith.addf %486, %489 : vector<16x1xf32>
    %491 = math.rsqrt %490 : vector<16x1xf32>
    %492 = vector.broadcast %491 : vector<16x1xf32> to vector<16x32xf32>
    %493 = arith.mulf %488, %492 : vector<16x32xf32>
    %494 = vector.broadcast %471 : vector<1x32xf32> to vector<16x32xf32>
    %495 = arith.mulf %493, %494 : vector<16x32xf32>
    %496 = vector.broadcast %472 : vector<1x32xf32> to vector<16x32xf32>
    %497 = arith.addf %495, %496 : vector<16x32xf32>
    %c0_208 = arith.constant 0 : index
    %c0_209 = arith.constant 0 : index
    %498 = vector.load %arg25[%c0_208, %c0_209] : memref<16x32xf32, #tpu.memory_space<vmem>>, vector<16x32xf32>
    tpu.vector_store %arg25[%c0_208, %c0_209], %497 {strides = array<i32>} : memref<16x32xf32, #tpu.memory_space<vmem>>, vector<16x32xf32>,
    return
  }
  func.func @transform_0(%arg0: i32) -> (i32, i32) {
    %c0_i32 = arith.constant 0 : i32
    %c0_i32_0 = arith.constant 0 : i32
    %c0_i32_1 = arith.constant 0 : i32
    return %c0_i32, %c0_i32_0 : i32, i32
  }
  func.func @transform_1(%arg0: i32) -> (i32, i32) {
    %c0_i32 = arith.constant 0 : i32
    %c0_i32_0 = arith.constant 0 : i32
    %c0_i32_1 = arith.constant 0 : i32
    return %c0_i32, %c0_i32_0 : i32, i32
  }
  func.func @transform_2(%arg0: i32) -> (i32, i32) {
    %c0_i32 = arith.constant 0 : i32
    %c0_i32_0 = arith.constant 0 : i32
    %c0_i32_1 = arith.constant 0 : i32
    return %c0_i32, %c0_i32_0 : i32, i32
  }
  func.func @transform_3(%arg0: i32) -> (i32, i32) {
    %c0_i32 = arith.constant 0 : i32
    %c0_i32_0 = arith.constant 0 : i32
    %c0_i32_1 = arith.constant 0 : i32
    return %c0_i32, %c0_i32_0 : i32, i32
  }
  func.func @transform_4(%arg0: i32) -> (i32, i32) {
    %c0_i32 = arith.constant 0 : i32
    %c0_i32_0 = arith.constant 0 : i32
    %c0_i32_1 = arith.constant 0 : i32
    return %c0_i32, %c0_i32_0 : i32, i32
  }
  func.func @transform_5(%arg0: i32) -> (i32, i32) {
    %c0_i32 = arith.constant 0 : i32
    %c0_i32_0 = arith.constant 0 : i32
    %c0_i32_1 = arith.constant 0 : i32
    return %c0_i32, %c0_i32_0 : i32, i32
  }
  func.func @transform_6(%arg0: i32) -> (i32, i32) {
    %c0_i32 = arith.constant 0 : i32
    %c0_i32_0 = arith.constant 0 : i32
    %c0_i32_1 = arith.constant 0 : i32
    return %c0_i32, %c0_i32_0 : i32, i32
  }
  func.func @transform_7(%arg0: i32) -> (i32, i32) {
    %c0_i32 = arith.constant 0 : i32
    %c0_i32_0 = arith.constant 0 : i32
    %c0_i32_1 = arith.constant 0 : i32
    return %c0_i32, %c0_i32_0 : i32, i32
  }
  func.func @transform_8(%arg0: i32) -> (i32, i32) {
    %c0_i32 = arith.constant 0 : i32
    %c0_i32_0 = arith.constant 0 : i32
    %c0_i32_1 = arith.constant 0 : i32
    return %c0_i32, %c0_i32_0 : i32, i32
  }
  func.func @transform_9(%arg0: i32) -> (i32, i32) {
    %c0_i32 = arith.constant 0 : i32
    %c0_i32_0 = arith.constant 0 : i32
    %c0_i32_1 = arith.constant 0 : i32
    return %c0_i32, %c0_i32_0 : i32, i32
  }
  func.func @transform_10(%arg0: i32) -> (i32, i32) {
    %c0_i32 = arith.constant 0 : i32
    %c0_i32_0 = arith.constant 0 : i32
    %c0_i32_1 = arith.constant 0 : i32
    return %c0_i32, %c0_i32_0 : i32, i32
  }
  func.func @transform_11(%arg0: i32) -> (i32, i32) {
    %c0_i32 = arith.constant 0 : i32
    %c0_i32_0 = arith.constant 0 : i32
    %c0_i32_1 = arith.constant 0 : i32
    return %c0_i32, %c0_i32_0 : i32, i32
  }
  func.func @transform_12(%arg0: i32) -> (i32, i32) {
    %c0_i32 = arith.constant 0 : i32
    %c0_i32_0 = arith.constant 0 : i32
    %c0_i32_1 = arith.constant 0 : i32
    return %c0_i32, %c0_i32_0 : i32, i32
  }
  func.func @transform_13(%arg0: i32) -> (i32, i32) {
    %c0_i32 = arith.constant 0 : i32
    %c0_i32_0 = arith.constant 0 : i32
    %c0_i32_1 = arith.constant 0 : i32
    return %c0_i32, %c0_i32_0 : i32, i32
  }
  func.func @transform_14(%arg0: i32) -> (i32, i32) {
    %c0_i32 = arith.constant 0 : i32
    %c0_i32_0 = arith.constant 0 : i32
    %c0_i32_1 = arith.constant 0 : i32
    return %c0_i32, %c0_i32_0 : i32, i32
  }
  func.func @transform_15(%arg0: i32) -> (i32, i32) {
    %c0_i32 = arith.constant 0 : i32
    %c0_i32_0 = arith.constant 0 : i32
    %c0_i32_1 = arith.constant 0 : i32
    return %c0_i32, %c0_i32_0 : i32, i32
  }
  func.func @transform_16(%arg0: i32) -> (i32, i32) {
    %c0_i32 = arith.constant 0 : i32
    %c0_i32_0 = arith.constant 0 : i32
    %c0_i32_1 = arith.constant 0 : i32
    return %c0_i32, %c0_i32_0 : i32, i32
  }
  func.func @transform_17(%arg0: i32) -> (i32, i32) {
    %c0_i32 = arith.constant 0 : i32
    %c0_i32_0 = arith.constant 0 : i32
    %c0_i32_1 = arith.constant 0 : i32
    return %c0_i32, %c0_i32_0 : i32, i32
  }
  func.func @transform_18(%arg0: i32) -> (i32, i32) {
    %c0_i32 = arith.constant 0 : i32
    %c0_i32_0 = arith.constant 0 : i32
    %c0_i32_1 = arith.constant 0 : i32
    return %c0_i32, %c0_i32_0 : i32, i32
  }
  func.func @transform_19(%arg0: i32) -> (i32, i32) {
    %c0_i32 = arith.constant 0 : i32
    %c0_i32_0 = arith.constant 0 : i32
    %c0_i32_1 = arith.constant 0 : i32
    return %c0_i32, %c0_i32_0 : i32, i32
  }
  func.func @transform_20(%arg0: i32) -> (i32, i32) {
    %c0_i32 = arith.constant 0 : i32
    %c0_i32_0 = arith.constant 0 : i32
    %c0_i32_1 = arith.constant 0 : i32
    return %c0_i32, %c0_i32_0 : i32, i32
  }
  func.func @transform_21(%arg0: i32) -> (i32, i32) {
    %c0_i32 = arith.constant 0 : i32
    %c0_i32_0 = arith.constant 0 : i32
    %c0_i32_1 = arith.constant 0 : i32
    return %c0_i32, %c0_i32_0 : i32, i32
  }
  func.func @transform_22(%arg0: i32) -> (i32, i32) {
    %c0_i32 = arith.constant 0 : i32
    %c0_i32_0 = arith.constant 0 : i32
    %c0_i32_1 = arith.constant 0 : i32
    return %c0_i32, %c0_i32_0 : i32, i32
  }
  func.func @transform_23(%arg0: i32) -> (i32, i32) {
    %c0_i32 = arith.constant 0 : i32
    %c0_i32_0 = arith.constant 0 : i32
    %c0_i32_1 = arith.constant 0 : i32
    return %c0_i32, %c0_i32_0 : i32, i32
  }
  func.func @transform_24(%arg0: i32) -> (i32, i32) {
    %c0_i32 = arith.constant 0 : i32
    %c0_i32_0 = arith.constant 0 : i32
    %c0_i32_1 = arith.constant 0 : i32
    return %c0_i32, %c0_i32_0 : i32, i32
  }
}

</mosaic_0001>

<bundles_post_ra>
// kernel: decoder_layer.1
= control target key start
LH: loop header
LB: loop body
LE: loop exit
PB: predicated region body
PF: predicated region fallthrough
CT: control target
= control target key end

     0   :  { %s6732_s0 = inlined_call_operand.vmem [shape: f32[16,32], index: 0, kind: input, shape index: {}]   ;;  %s6733_s1 = inlined_call_operand.vmem [shape: f32[32,32], index: 1, kind: input, shape index: {}]   ;;  %s6734_s2 = inlined_call_operand.vmem [shape: f32[16,8], index: 2, kind: input, shape index: {}]   ;;  %s6735_s3 = inlined_call_operand.vmem [shape: f32[16,16], index: 3, kind: input, shape index: {}]   ;;  %s6736_s4 = inlined_call_operand.vmem [shape: f32[32,96], index: 4, kind: input, shape index: {}]   ;;  %s6737_s5 = inlined_call_operand.vmem [shape: f32[1,96], index: 5, kind: input, shape index: {}]   ;;  %s6738_s6 = inlined_call_operand.vmem [shape: f32[32,32], index: 6, kind: input, shape index: {}]   ;;  %s6739_s7 = inlined_call_operand.vmem [shape: f32[1,32], index: 7, kind: input, shape index: {}]   ;;  %s6740_s8 = inlined_call_operand.vmem [shape: f32[32,32], index: 8, kind: input, shape index: {}]   ;;  %s6741_s9 = inlined_call_operand.hbm [shape: f32[1,32], index: 9, kind: input, shape index: {}]   ;;  %s6742_s10 = inlined_call_operand.hbm [shape: f32[32,64], index: 10, kind: input, shape index: {}]   ;;  %s6743_s11 = inlined_call_operand.hbm [shape: f32[1,64], index: 11, kind: input, shape index: {}]   ;;  %s6744_s12 = inlined_call_operand.hbm [shape: f32[32,32], index: 12, kind: input, shape index: {}]   ;;  %s6745_s13 = inlined_call_operand.hbm [shape: f32[1,32], index: 13, kind: input, shape index: {}]   ;;  %s6746_s14 = inlined_call_operand.hbm [shape: f32[32,64], index: 14, kind: input, shape index: {}]   ;;  %s6747_s15 = inlined_call_operand.vmem [shape: f32[1,64], index: 15, kind: input, shape index: {}]   ;;  %s6748_s16 = inlined_call_operand.vmem [shape: f32[64,32], index: 16, kind: input, shape index: {}]   ;;  %s6749_s17 = inlined_call_operand.hbm [shape: f32[1,32], index: 17, kind: input, shape index: {}]   ;;  %s6750_s18 = inlined_call_operand.vmem [shape: f32[1,32], index: 18, kind: input, shape index: {}]   ;;  %s6751_s19 = inlined_call_operand.hbm [shape: f32[1,32], index: 19, kind: input, shape index: {}]   ;;  %s6752_s20 = inlined_call_operand.vmem [shape: f32[1,32], index: 20, kind: input, shape index: {}]   ;;  %s6753_s21 = inlined_call_operand.vmem [shape: f32[1,32], index: 21, kind: input, shape index: {}]   ;;  %s6754_s22 = inlined_call_operand.vmem [shape: f32[1,32], index: 22, kind: input, shape index: {}]   ;;  %s6755_s23 = inlined_call_operand.vmem [shape: f32[1,32], index: 23, kind: input, shape index: {}]   ;;  %s6756_s24 = inlined_call_operand.hbm [shape: f32[16,32], index: 24, kind: output, shape index: {}]  }
   0x1   :  { %6765 = sst [smem:[#allocation24_spill]] %s6732_s0 }
   0x2   :  { %6766 = sst [smem:[#allocation25_spill]] %s6733_s1 }
   0x3   :  { %6767 = sst [smem:[#allocation26_spill]] %s6734_s2 }
   0x4   :  { %6768 = sst [smem:[#allocation27_spill]] %s6735_s3 }
   0x5   :  { %6769 = sst [smem:[#allocation28_spill]] %s6736_s4 }
   0x6   :  { %6770 = sst [smem:[#allocation29_spill]] %s6737_s5 }
   0x7   :  { %6771 = sst [smem:[#allocation30_spill]] %s6738_s6 }
   0x8   :  { %6772 = sst [smem:[#allocation31_spill]] %s6739_s7 }
   0x9   :  { %6773 = sst [smem:[#allocation32_spill]] %s6740_s8 }
   0xa   :  { %6774 = sst [smem:[#allocation33_spill]] %s6756_s24 }
   0xb   :  { %29 = vsyncpa [#allocation4], 0 }
   0xc   :  { %30 = vsyncpa [#allocation7], 0 }
   0xd   :  { %31 = vsyncpa [#allocation10], 0 }
   0xe   :  { %32 = vsyncpa [#allocation13], 0 }
   0xf   :  { %33 = vsyncpa [#allocation16], 0 }
  0x10   :  { %34 = vsyncpa [#allocation5], 0  ;;  %s5881_s5 = smov [#allocation6]   ;;  %s5671_s6 = scalar_lea.hbm %s6742_s10, 512 }
  0x11   :  { %s68_s26 = sshll.u32 %s5881_s5, 4  ;;  %p5672_p0 = scmp.ne.s32.totalorder %s6742_s10, %s5671_s6  ;;  %s69_s26 = int_to_ptr.vmem [resolvable:$true] %s68_s26 }
  0x12   :  { %p5675_p1 = scmp.lt.u32.totalorder %s5671_s6, %s6742_s10 }
  0x14   :  { %p5677_p2 = pnand %p5675_p1, %p5672_p0 }
  0x16   :  { %5680 = shalt.err (!%p5677_p2)
}
  0x17   :  { %s5681_s30 = scalar_lea.vmem %s69_s26, 512  ;;  %p5686_p4 = scmp.lt.s32.totalorder %s69_s26, %s69_s26 }
  0x18   :  { %p5682_p3 = scmp.ne.s32.totalorder %s69_s26, %s5681_s30  ;;  %p5687_p5 = scmp.lt.s32.totalorder %s5681_s30, %s5681_s30 }
  0x1a   :  { %p5688_p6 = por %p5687_p5, %p5686_p4 }
  0x1c   :  { %p5689_p7 = pnand %p5688_p6, %p5682_p3 }
  0x1e   :  { %5692 = shalt.err (!%p5689_p7)
}
  0x1f   :  { %s5882_s3 = smov 128   ;;  %s5883_s25 = smov 8  }
  0x20   :  { %74 = dma.hbm_to_vmem [thread:$0]  %s6742_s10, 512, %s69_s26, [#allocation7], %s5882_s3, %s5882_s3, %s5883_s25  }
  0x21   :  { %s5884_s1 = smov [#allocation9]   ;;  %s5885_s27 = smov [#allocation12]  }
  0x22   :  { %s90_s5 = sshll.u32 %s5884_s1, 4  ;;  %s112_s28 = sshll.u32 %s5885_s27, 4  ;;  %s91_s5 = int_to_ptr.vmem [resolvable:$true] %s90_s5  ;;  %s113_s28 = int_to_ptr.vmem [resolvable:$true] %s112_s28 }
  0x23   :  { %s5693_s29 = scalar_lea.hbm %s6744_s12, 512 }
  0x24   :  { %p5694_p8 = scmp.ne.s32.totalorder %s6744_s12, %s5693_s29  ;;  %p5697_p9 = scmp.lt.u32.totalorder %s5693_s29, %s6744_s12 }
  0x26   :  { %p5699_p10 = pnand %p5697_p9, %p5694_p8 }
  0x28   :  { %5702 = shalt.err (!%p5699_p10)
}
  0x29   :  { %s5703_s10 = scalar_lea.vmem %s91_s5, 512  ;;  %p5708_p12 = scmp.lt.s32.totalorder %s91_s5, %s91_s5 }
  0x2a   :  { %p5704_p11 = scmp.ne.s32.totalorder %s91_s5, %s5703_s10  ;;  %p5709_p13 = scmp.lt.s32.totalorder %s5703_s10, %s5703_s10 }
  0x2c   :  { %p5710_p0 = por %p5709_p13, %p5708_p12 }
  0x2e   :  { %p5711_p1 = pnand %p5710_p0, %p5704_p11 }
  0x30   :  { %5714 = shalt.err (!%p5711_p1)
}
  0x31   :  { %96 = dma.hbm_to_vmem [thread:$0]  %s6744_s12, 512, %s91_s5, [#allocation10], %s5882_s3, %s5882_s3, %s5883_s25  }
  0x32   :  { %s5715_s1 = scalar_lea.hbm %s6746_s14, 512 }
  0x33   :  { %p5716_p2 = scmp.ne.s32.totalorder %s6746_s14, %s5715_s1  ;;  %p5719_p3 = scmp.lt.u32.totalorder %s5715_s1, %s6746_s14 }
  0x35   :  { %p5721_p4 = pnand %p5719_p3, %p5716_p2 }
  0x37   :  { %5724 = shalt.err (!%p5721_p4)
}
  0x38   :  { %s5725_s0 = scalar_lea.vmem %s113_s28, 512  ;;  %p5730_p6 = scmp.lt.s32.totalorder %s113_s28, %s113_s28 }
  0x39   :  { %p5726_p5 = scmp.ne.s32.totalorder %s113_s28, %s5725_s0  ;;  %p5731_p7 = scmp.lt.s32.totalorder %s5725_s0, %s5725_s0 }
  0x3b   :  { %p5732_p8 = por %p5731_p7, %p5730_p6 }
  0x3d   :  { %p5733_p9 = pnand %p5732_p8, %p5726_p5 }
  0x3f   :  { %5736 = shalt.err (!%p5733_p9)
}
  0x40   :  { %118 = dma.hbm_to_vmem [thread:$0]  %s6746_s14, 512, %s113_s28, [#allocation13], %s5882_s3, %s5882_s3, %s5883_s25  }
  0x41   :  { %s5886_s7 = smov [#allocation3]   ;;  %s5887_s10 = smov [#allocation8]  }
  0x42   :  { %s59_s30 = sshll.u32 %s5886_s7, 4  ;;  %s81_s26 = sshll.u32 %s5887_s10, 4  ;;  %s60_s30 = int_to_ptr.vmem [resolvable:$true] %s59_s30  ;;  %s82_s26 = int_to_ptr.vmem [resolvable:$true] %s81_s26 }
  0x43   :  { %s5737_s24 = scalar_lea.hbm %s6741_s9, 16 }
  0x44   :  { %p5738_p10 = scmp.ne.s32.totalorder %s6741_s9, %s5737_s24  ;;  %p5741_p11 = scmp.lt.u32.totalorder %s5737_s24, %s6741_s9 }
  0x46   :  { %p5743_p12 = pnand %p5741_p11, %p5738_p10 }
  0x48   :  { %5746 = shalt.err (!%p5743_p12)
}
  0x49   :  { %s5747_s14 = scalar_lea.vmem %s60_s30, 16  ;;  %s5751_s28 = scalar_lea.vmem %s60_s30, 32 }
  0x4a   :  { %p5748_p13 = scmp.ne.s32.totalorder %s60_s30, %s5747_s14  ;;  %p5752_p0 = scmp.lt.s32.totalorder %s60_s30, %s60_s30 }
  0x4b   :  { %p5753_p1 = scmp.lt.s32.totalorder %s5751_s28, %s5747_s14 }
  0x4d   :  { %p5754_p2 = por %p5753_p1, %p5752_p0 }
  0x4f   :  { %p5755_p3 = pnand %p5754_p2, %p5748_p13 }
  0x51   :  { %5758 = shalt.err (!%p5755_p3)
}
  0x52   :  { %62 = dma.hbm_to_vmem [thread:$0]  %s6741_s9, 16, %s60_s30, [#allocation4]  }
  0x53   :  { %s5759_s7 = scalar_lea.hbm %s6743_s11, 16 }
  0x54   :  { %p5760_p4 = scmp.ne.s32.totalorder %s6743_s11, %s5759_s7  ;;  %p5763_p5 = scmp.lt.u32.totalorder %s5759_s7, %s6743_s11 }
  0x56   :  { %p5765_p6 = pnand %p5763_p5, %p5760_p4 }
  0x58   :  { %5768 = shalt.err (!%p5765_p6)
}
  0x59   :  { %s5769_s1 = scalar_lea.vmem %s82_s26, 16  ;;  %s5773_s27 = scalar_lea.vmem %s82_s26, 32 }
  0x5a   :  { %p5770_p7 = scmp.ne.s32.totalorder %s82_s26, %s5769_s1  ;;  %p5774_p8 = scmp.lt.s32.totalorder %s82_s26, %s82_s26 }
  0x5b   :  { %p5775_p9 = scmp.lt.s32.totalorder %s5773_s27, %s5769_s1 }
  0x5d   :  { %p5776_p10 = por %p5775_p9, %p5774_p8 }
  0x5f   :  { %p5777_p11 = pnand %p5776_p10, %p5770_p7 }
  0x61   :  { %5780 = shalt.err (!%p5777_p11)
}
  0x62   :  { %84 = dma.hbm_to_vmem [thread:$0]  %s6743_s11, 16, %s82_s26, [#allocation7]  }
  0x63   :  { %s5888_s6 = smov [#allocation11]   ;;  %s5889_s14 = smov [#allocation14]  }
  0x64   :  { %s103_s2 = sshll.u32 %s5888_s6, 4  ;;  %s129_s28 = sshll.u32 %s5889_s14, 4  ;;  %s104_s2 = int_to_ptr.vmem [resolvable:$true] %s103_s2  ;;  %s130_s28 = int_to_ptr.vmem [resolvable:$true] %s129_s28 }
  0x65   :  { %s5781_s12 = scalar_lea.hbm %s6745_s13, 16 }
  0x66   :  { %p5782_p12 = scmp.ne.s32.totalorder %s6745_s13, %s5781_s12  ;;  %p5785_p13 = scmp.lt.u32.totalorder %s5781_s12, %s6745_s13 }
  0x68   :  { %p5787_p0 = pnand %p5785_p13, %p5782_p12 }
  0x6a   :  { %5790 = shalt.err (!%p5787_p0)
}
  0x6b   :  { %s5791_s11 = scalar_lea.vmem %s104_s2, 16  ;;  %s5795_s26 = scalar_lea.vmem %s104_s2, 32 }
  0x6c   :  { %p5792_p1 = scmp.ne.s32.totalorder %s104_s2, %s5791_s11  ;;  %p5796_p2 = scmp.lt.s32.totalorder %s104_s2, %s104_s2 }
  0x6d   :  { %p5797_p3 = scmp.lt.s32.totalorder %s5795_s26, %s5791_s11 }
  0x6f   :  { %p5798_p4 = por %p5797_p3, %p5796_p2 }
  0x71   :  { %p5799_p5 = pnand %p5798_p4, %p5792_p1 }
  0x73   :  { %5802 = shalt.err (!%p5799_p5)
}
  0x74   :  { %106 = dma.hbm_to_vmem [thread:$0]  %s6745_s13, 16, %s104_s2, [#allocation10]  }
  0x75   :  { %s5803_s9 = scalar_lea.hbm %s6749_s17, 16 }
  0x76   :  { %p5804_p6 = scmp.ne.s32.totalorder %s6749_s17, %s5803_s9  ;;  %p5807_p7 = scmp.lt.u32.totalorder %s5803_s9, %s6749_s17 }
  0x78   :  { %p5809_p8 = pnand %p5807_p7, %p5804_p6 }
  0x7a   :  { %5812 = shalt.err (!%p5809_p8)
}
  0x7b   :  { %s5813_s0 = scalar_lea.vmem %s130_s28, 16  ;;  %s5817_s12 = scalar_lea.vmem %s130_s28, 32 }
  0x7c   :  { %p5814_p9 = scmp.ne.s32.totalorder %s130_s28, %s5813_s0  ;;  %p5818_p10 = scmp.lt.s32.totalorder %s130_s28, %s130_s28 }
  0x7d   :  { %p5819_p11 = scmp.lt.s32.totalorder %s5817_s12, %s5813_s0 }
  0x7f   :  { %p5820_p12 = por %p5819_p11, %p5818_p10 }
  0x81   :  { %p5821_p13 = pnand %p5820_p12, %p5814_p9 }
  0x83   :  { %5824 = shalt.err (!%p5821_p13)
}
  0x84   :  { %132 = dma.hbm_to_vmem [thread:$0]  %s6749_s17, 16, %s130_s28, [#allocation13]  }
  0x85   :  { %s5890_s5 = smov [#allocation15]   ;;  %s5825_s11 = scalar_lea.hbm %s6751_s19, 16 }
  0x86   :  { %s141_s7 = sshll.u32 %s5890_s5, 4  ;;  %p5826_p0 = scmp.ne.s32.totalorder %s6751_s19, %s5825_s11  ;;  %s142_s7 = int_to_ptr.vmem [resolvable:$true] %s141_s7 }
  0x87   :  { %p5829_p1 = scmp.lt.u32.totalorder %s5825_s11, %s6751_s19 }
  0x89   :  { %p5831_p2 = pnand %p5829_p1, %p5826_p0 }
  0x8b   :  { %5834 = shalt.err (!%p5831_p2)
}
  0x8c   :  { %s5835_s27 = scalar_lea.vmem %s142_s7, 16  ;;  %s5839_s17 = scalar_lea.vmem %s142_s7, 32 }
  0x8d   :  { %p5836_p3 = scmp.ne.s32.totalorder %s142_s7, %s5835_s27  ;;  %p5840_p4 = scmp.lt.s32.totalorder %s142_s7, %s142_s7 }
  0x8e   :  { %p5841_p5 = scmp.lt.s32.totalorder %s5839_s17, %s5835_s27 }
  0x90   :  { %p5842_p6 = por %p5841_p5, %p5840_p4 }
  0x92   :  { %p5843_p7 = pnand %p5842_p6, %p5836_p3 }
  0x94   :  { %5846 = shalt.err (!%p5843_p7)
}
  0x95   :  { %144 = dma.hbm_to_vmem [thread:$0]  %s6751_s19, 16, %s142_s7, [#allocation16]  }
  0x96   :  { %5869 = dma.done.wait [#allocation4], 16  }
  0x97   :  { %5870 = vsyncadd [#allocation4], 4294967280 }
  0x98   :  { %5871 = dma.done.wait [#allocation7], 528  }
  0x99   :  { %5872 = vsyncadd [#allocation7], 4294966768 }
  0x9a   :  { %5873 = dma.done.wait [#allocation10], 528  }
  0x9b   :  { %5874 = vsyncadd [#allocation10], 4294966768 }
  0x9c   :  { %5875 = dma.done.wait [#allocation13], 528  }
  0x9d   :  { %5876 = vsyncadd [#allocation13], 4294966768 }
  0x9e   :  { %5877 = dma.done.wait [#allocation16], 16  }
  0x9f   :  { %5878 = vsyncadd [#allocation16], 4294967280  ;;  %vm194_vm0 = vcmask 261120   ;;  %s6775_s14 = sld [smem:[#allocation28_spill]]  ;;  %s6776_s10 = sld [smem:[#allocation24_spill]]  ;;  %v5891_v8 = vmov 0.0  }
  0xa0   :  { %5055 = vmatprep.subr.mxu0 %v5891_v8  ;;  %vm5892_vm1 = vmmov 0   ;;  %s6777_s24 = sld [smem:[#allocation29_spill]]  ;;  %s5893_s1 = smov 120   ;;  %vm280_vm2 = vcmask 64512   ;;  %vm2557_vm4 = vcmask 130048   ;;  %vm4638_vm5 = vcmask 523264  }
  0xa1   :  { %5057 = vmatprep.mubr.msk.f32.mxu0 %vm5892_vm1, %v5891_v8  ;;  %s5894_s27 = smov 96   ;;  %s5895_s17 = smov 88   ;;  %vm6429_vm3 = vmpackc.low %vm280_vm2, %vm280_vm2 }
  0xa2   :  { %s6778_s30 = sld [smem:[#allocation26_spill]]  ;;  %s5896_s6 = smov 56  }
  0xa3   :  { %s5898_s29 = smov 64   ;;  %s5899_s0 = smov 112  }
  0xa4   :  { %s5900_s19 = smov 48   ;;  %s5901_s12 = smov 72  }
  0xa5   :  { %v183_v0 = vld [vmem:[%s6775_s14] sm:$0xff]  ;;  %v184_v1 = vld [vmem:[%s6775_s14 + $0x8] sm:$0xff]  ;;  %v185_v2 = vld [vmem:[%s6775_s14 + $0x10] sm:$0xff]  ;;  %s5902_s13 = smov 104   ;;  %s5903_s2 = smov 40  }
  0xa6   :  { %v5372_v3 = vpack.c.bf16 %v184_v1, %v183_v0  ;;  %v186_v4 = vld [vmem:[%s6775_s14 + $0x18] sm:$0xff]  ;;  %v6151_v5 = vld [vmem:[%s6776_s10] sm:$0xff]  ;;  %v6158_v7 = vld [vmem:[%s6776_s10 + $0x8] sm:$0xff]  ;;  %s5897_s14 = smov 80   ;;  %s6779_s10 = sld [smem:[#allocation30_spill]] }
  0xa7   :  { %v5376_v6 = vpack.c.bf16 %v186_v4, %v185_v2  ;;  %5042 = vmatprep.mubr.msk.f32.mxu1 %vm194_vm0, %v6151_v5  ;;  %v4789_v9 = vld [vmem:[%s6777_s24] ss:$0 sm:$0xff]  ;;  %s6781_s8 = sld [smem:[#allocation25_spill]]  ;;  %s6782_s24 = sld [smem:[#allocation32_spill]] }
  0xa8   :  { %5373 = vmatprep.subr.bf16.mxu1 %v5372_v3  ;;  %v6195_v17 = vld [vmem:[%s6778_s30] sm:$0xff]  ;;  %s6785_s11 = sld [smem:[#allocation27_spill]]  ;;  %s5905_s26 = smov [#allocation17]  }
  0xa9   :  { %5375 = vmatpush3.bf16.msra.mxu1 %v5372_v3 }
  0xaa   :  { %5377 = vmatprep.subr.bf16.mxu1 %v5376_v6 }
  0xac   :  { %v6237_v40 = vld [vmem:[%s6779_s10 + $0x8] sm:$0xff]  ;;  %v6250_v58 = vld [vmem:[%s6779_s10] sm:$0xff] }
  0xad   :  { %5379 = vmatpush3.bf16.msra.mxu1 %v5376_v6 }
  0xae   :  { %5045 = vmatprep.subr.mxu1 %v5891_v8 }
  0xb0   :  { %5043 = vmatmul.mubr.msk.f32.vlgmr.msra.gmra.mrb[0].mxu1 %vm194_vm0, %v6158_v7 }
  0xb1   :  { %5047 = vmatprep.mubr.msk.f32.mxu1 %vm5892_vm1, %v5891_v8 }
 0x183   :  { %v5044_v10 = vpop.f32.mrb[0].mxu1 }
 0x184   :  { %v6171_v11 = vadd.f32 %v5044_v10, %v4789_v9  ;;  %v267_v12 = vpop.f32.mrb[1].mxu1 }
 0x185   :  { %v6173_v13 = vadd.f32 %v4789_v9, %v267_v12  ;;  %v6269_v9 = vld [vmem:[%s6779_s10 + $0x10] sm:$0xff] }
 0x187   :  { %446 = vrot.lane.b32.xlu1 %v6173_v13, %s5893_s1  ;;  %278 = vrot.lane.b32.xlu0 %v6173_v13, %s5894_s27 }
 0x18b   :  { %448 = vrot.lane.b32.xlu0 %v6173_v13, %s5895_s17 }
 0x1f9   :  { %v279_v14 = vpop.permute.xlu0 %278  ;;  %v447_v16 = vpop.permute.xlu1 %446 }
 0x1fa   :  { %5046 = vmatpush3.xpose.msk.msra.mxu1 %vm280_vm2, %v279_v14 }
 0x1fb   :  { %5050 = vmatprep.subr.mxu1 %v5891_v8 }
 0x1fd   :  { %5048 = vmatmul.mubr.msk.f32.vlgmr.msra.gmra.mrb[2].mxu1 %vm280_vm2, %v6173_v13  ;;  %v449_v15 = vpop.permute.xlu0 %448 }
 0x1fe   :  { %5056 = vmatpush3.xpose.msk.msra.mxu0 %vm280_vm2, %v449_v15  ;;  %5052 = vmatprep.mubr.msk.f32.mxu1 %vm5892_vm1, %v5891_v8 }
 0x1ff   :  { %5065 = vmatprep.subr.mxu0 %v5891_v8 }
 0x201   :  { %5058 = vmatmul.mubr.msk.f32.vlgmr.msra.gmra.mrb[0].mxu0 %vm280_vm2, %v447_v16 }
 0x202   :  { %5067 = vmatprep.mubr.msk.f32.mxu0 %vm5892_vm1, %v5891_v8  ;;  %5066 = vmatpush3.msra.mxu0 %v6237_v40 }
 0x203   :  { %5070 = vmatprep.subr.mxu0 %v5891_v8 }
 0x2d0   :  { %v351_v18 = vpop.f32.mrb[2].mxu1 }
 0x2d1   :  { %v352_v19 = vadd.f32 %v351_v18, %v6195_v17  ;;  %v5049_v20 = vpop.f32.mrb[3].mxu1 }
 0x2d3   :  { %v355_v21 = vsel %vm280_vm2, %v352_v19, -inf }
 0x2d4   :  { %356 = vmax.xlane.f32.xlu1 %v355_v21  ;;  %v520_v22 = vpop.f32.mrb[0].mxu0 }
 0x2d5   :  { %v521_v23 = vadd.f32 %v520_v22, %v6195_v17  ;;  %v5059_v24 = vpop.f32.mrb[1].mxu0 }
 0x2d7   :  { %v524_v25 = vsel %vm280_vm2, %v521_v23, -inf }
 0x2d8   :  { %525 = vmax.xlane.f32.xlu0 %v524_v25 }
 0x2e5   :  { %537 = vrot.lane.b32.xlu1 %v6173_v13, %s5896_s6 }
 0x2e9   :  { %763 = vrot.lane.b32.xlu1 %v6173_v13, %s5897_s14 }
 0x2ee   :  { %368 = vrot.lane.b32.xlu0 %v6173_v13, %s5898_s29 }
 0x2f2   :  { %761 = vrot.lane.b32.xlu0 %v6173_v13, %s5899_s0 }
 0x2f6   :  { %852 = vrot.lane.b32.xlu0 %v6173_v13, %s5900_s19 }
 0x2fa   :  { %1006 = vrot.lane.b32.xlu0 %v6173_v13, %s5901_s12 }
 0x2fe   :  { %1004 = vrot.lane.b32.xlu0 %v6173_v13, %s5902_s13 }
 0x361   :  { %v357_v26 = vpop.xlane.xlu1 %356 }
 0x362   :  { %v358_v27 = vsub.f32 %v352_v19, %v357_v26 }
 0x364   :  { %v359_v28 = vmul.f32 1.442695, %v358_v27 }
 0x365   :  { %v526_v29 = vpop.xlane.xlu0 %525  ;;  %v538_v34 = vpop.permute.xlu1 %537 }
 0x366   :  { %5595 = vpow2.f32 %v359_v28  ;;  %v527_v30 = vsub.f32 %v521_v23, %v526_v29 }
 0x368   :  { %v528_v31 = vmul.f32 1.442695, %v527_v30 }
 0x369   :  { %v369_v32 = vpop.permute.xlu0 %368  ;;  %v764_v38 = vpop.permute.xlu1 %763 }
 0x36a   :  { %5597 = vpow2.f32 %v528_v31  ;;  %5051 = vmatpush3.msra.mxu1 %v369_v32 }
 0x36b   :  { %5060 = vmatprep.subr.mxu1 %v5891_v8 }
 0x36d   :  { %v762_v37 = vpop.permute.xlu0 %761 }
 0x370   :  { %v5596_v33 = vpop.eup %5595 }
 0x371   :  { %5053 = vmatmul.mubr.msk.f32.vlgmr.msra.gmra.mrb[4].mxu1 %vm280_vm2, %v5596_v33  ;;  %v853_v39 = vpop.permute.xlu0 %852  ;;  %v361_v57 = vsel %vm280_vm2, %v5596_v33, 0.0 }
 0x372   :  { %5061 = vmatpush3.msra.mxu1 %v538_v34  ;;  %5062 = vmatprep.mubr.msk.f32.mxu1 %vm5892_vm1, %v5891_v8 }
 0x373   :  { %5075 = vmatprep.subr.mxu1 %v5891_v8 }
 0x374   :  { %v5598_v35 = vpop.eup %5597 }
 0x375   :  { %5063 = vmatmul.mubr.msk.f32.vlgmr.msra.gmra.mrb[6].mxu1 %vm280_vm2, %v5598_v35  ;;  %v530_v36 = vsel %vm280_vm2, %v5598_v35, 0.0  ;;  %v1007_v41 = vpop.permute.xlu0 %1006 }
 0x376   :  { %531 = vadd.xlane.f32.xlu0 %v530_v36  ;;  %5077 = vmatprep.mubr.msk.f32.mxu1 %vm5892_vm1, %v5891_v8 }
 0x379   :  { %5076 = vmatpush3.xpose.msk.msra.mxu1 %vm280_vm2, %v764_v38  ;;  %v1005_v42 = vpop.permute.xlu0 %1004 }
 0x37a   :  { %5080 = vmatprep.subr.mxu1 %v5891_v8 }
 0x37c   :  { %5078 = vmatmul.mubr.msk.f32.vlgmr.msra.gmra.mrb[8].mxu1 %vm280_vm2, %v762_v37 }
 0x37d   :  { %5081 = vmatpush3.msra.mxu1 %v853_v39  ;;  %5082 = vmatprep.mubr.msk.f32.mxu1 %vm5892_vm1, %v5891_v8 }
 0x37e   :  { %5090 = vmatprep.subr.mxu1 %v5891_v8 }
 0x38c   :  { %1095 = vrot.lane.b32.xlu0 %v6173_v13, %s5903_s2 }
 0x390   :  { %1419 = vrot.lane.b32.xlu0 %v6171_v11, %s5895_s17 }
 0x403   :  { %v532_v43 = vpop.xlane.xlu0 %531 }
 0x404   :  { %5599 = vrcp.f32 %v532_v43 }
 0x407   :  { %v1096_v20 = vpop.permute.xlu0 %1095 }
 0x40b   :  { %v1420_v39 = vpop.permute.xlu0 %1419 }
 0x40e   :  { %v5600_v44 = vpop.eup %5599 }
 0x40f   :  { %v534_v45 = vmul.f32 %v5600_v44, %v532_v43 }
 0x411   :  { %v535_v46 = vsub.f32 2.0, %v534_v45 }
 0x413   :  { %v536_v49 = vmul.f32 %v5600_v44, %v535_v46 }
 0x444   :  { %v440_v47 = vpop.f32.mrb[4].mxu1 }
 0x445   :  { %v5054_v48 = vpop.f32.mrb[5].mxu1 }
 0x448   :  { %v609_v50 = vpop.f32.mrb[6].mxu1 }
 0x449   :  { %v613_v51 = vmul.f32 %v609_v50, %v536_v49  ;;  %v5064_v52 = vpop.f32.mrb[7].mxu1 }
 0x44b   :  { %5068 = vmatmul.mubr.msk.f32.vlgmr.msra.gmra.mrb[2].mxu0 %vm280_vm2, %v613_v51 }
 0x44c   :  { %5072 = vmatprep.mubr.msk.f32.mxu0 %vm5892_vm1, %v5891_v8  ;;  %5071 = vmatpush3.msra.mxu0 %v6250_v58 }
 0x44d   :  { %5085 = vmatprep.subr.mxu0 %v5891_v8 }
 0x44f   :  { %v835_v53 = vpop.f32.mrb[8].mxu1 }
 0x450   :  { %v836_v54 = vadd.f32 %v835_v53, %v6195_v17  ;;  %v5079_v55 = vpop.f32.mrb[9].mxu1 }
 0x452   :  { %v839_v56 = vsel %vm280_vm2, %v836_v54, -inf }
 0x453   :  { %840 = vmax.xlane.f32.xlu1 %v839_v56 }
 0x457   :  { %362 = vadd.xlane.f32.xlu1 %v361_v57 }
 0x4e0   :  { %v841_v59 = vpop.xlane.xlu1 %840 }
 0x4e1   :  { %v842_v60 = vsub.f32 %v836_v54, %v841_v59 }
 0x4e3   :  { %v843_v61 = vmul.f32 1.442695, %v842_v60 }
 0x4e4   :  { %v363_v62 = vpop.xlane.xlu1 %362 }
 0x4e5   :  { %5601 = vpow2.f32 %v843_v61 }
 0x4e6   :  { %5603 = vrcp.f32 %v363_v62 }
 0x4ef   :  { %v5602_v63 = vpop.eup %5601 }
 0x4f0   :  { %v5604_v0 = vpop.eup %5603  ;;  %5083 = vmatmul.mubr.msk.f32.vlgmr.msra.gmra.mrb[10].mxu1 %vm280_vm2, %v5602_v63  ;;  %v845_v1 = vsel %vm280_vm2, %v5602_v63, 0.0 }
 0x4f1   :  { %v365_v2 = vmul.f32 %v5604_v0, %v363_v62  ;;  %5091 = vmatpush3.xpose.msk.msra.mxu1 %vm280_vm2, %v1007_v41  ;;  %846 = vadd.xlane.f32.xlu1 %v845_v1 }
 0x4f2   :  { %5092 = vmatprep.mubr.msk.f32.mxu1 %vm5892_vm1, %v5891_v8  ;;  %5105 = vmatprep.subr.mxu1 %v5891_v8 }
 0x4f3   :  { %v366_v3 = vsub.f32 2.0, %v365_v2 }
 0x4f4   :  { %5093 = vmatmul.mubr.msk.f32.vlgmr.msra.gmra.mrb[12].mxu1 %vm280_vm2, %v1005_v42  ;;  %v6315_v42 = vld [vmem:[%s6778_s30 + $0x8] sm:$0xff] }
 0x4f5   :  { %v367_v4 = vmul.f32 %v5604_v0, %v366_v3  ;;  %5107 = vmatprep.mubr.msk.f32.mxu1 %vm5892_vm1, %v5891_v8 }
 0x4f7   :  { %v444_v6 = vmul.f32 %v440_v47, %v367_v4 }
 0x4f9   :  { %5073 = vmatmul.mubr.msk.f32.vlgmr.msra.gmra.mrb[2].mxu0 %vm280_vm2, %v444_v6 }
 0x4fa   :  { %5087 = vmatprep.mubr.msk.f32.mxu0 %vm5892_vm1, %v5891_v8  ;;  %5086 = vmatpush3.msra.mxu0 %v6269_v9 }
 0x4fb   :  { %5095 = vmatprep.subr.mxu0 %v5891_v8 }
 0x57e   :  { %v847_v10 = vpop.xlane.xlu1 %846 }
 0x57f   :  { %5605 = vrcp.f32 %v847_v10 }
 0x589   :  { %v5606_v12 = vpop.eup %5605 }
 0x58a   :  { %v849_v13 = vmul.f32 %v5606_v12, %v847_v10 }
 0x58c   :  { %v850_v14 = vsub.f32 2.0, %v849_v13 }
 0x58e   :  { %v851_v15 = vmul.f32 %v5606_v12, %v850_v14 }
 0x5c3   :  { %v924_v16 = vpop.f32.mrb[10].mxu1 }
 0x5c4   :  { %v928_v18 = vmul.f32 %v924_v16, %v851_v15  ;;  %v5084_v19 = vpop.f32.mrb[11].mxu1 }
 0x5c6   :  { %5088 = vmatmul.mubr.msk.f32.vlgmr.msra.gmra.mrb[2].mxu0 %vm280_vm2, %v928_v18 }
 0x5c7   :  { %5096 = vmatpush3.msra.mxu0 %v1096_v20  ;;  %v1078_v21 = vpop.f32.mrb[12].mxu1  ;;  %5097 = vmatprep.mubr.msk.f32.mxu0 %vm5892_vm1, %v5891_v8 }
 0x5c8   :  { %v1079_v22 = vadd.f32 %v1078_v21, %v6195_v17  ;;  %v5094_v23 = vpop.f32.mrb[13].mxu1  ;;  %5100 = vmatprep.subr.mxu0 %v5891_v8  ;;  %v6292_v17 = vld [vmem:[%s6779_s10 + $0x18] sm:$0xff] }
 0x5ca   :  { %v1082_v24 = vsel %vm280_vm2, %v1079_v22, -inf }
 0x5cb   :  { %1083 = vmax.xlane.f32.xlu1 %v1082_v24 }
 0x658   :  { %v1084_v25 = vpop.xlane.xlu1 %1083 }
 0x659   :  { %v1085_v26 = vsub.f32 %v1079_v22, %v1084_v25 }
 0x65b   :  { %v1086_v27 = vmul.f32 1.442695, %v1085_v26 }
 0x65d   :  { %5607 = vpow2.f32 %v1086_v27 }
 0x667   :  { %v5608_v28 = vpop.eup %5607 }
 0x668   :  { %5098 = vmatmul.mubr.msk.f32.vlgmr.msra.gmra.mrb[4].mxu0 %vm280_vm2, %v5608_v28  ;;  %v1088_v29 = vsel %vm280_vm2, %v5608_v28, 0.0 }
 0x669   :  { %1089 = vadd.xlane.f32.xlu1 %v1088_v29  ;;  %5102 = vmatprep.mubr.msk.f32.mxu0 %vm5892_vm1, %v5891_v8 }
 0x66a   :  { %5101 = vmatpush3.msra.mxu0 %v6292_v17 }
 0x66b   :  { %5115 = vmatprep.subr.mxu0 %v5891_v8 }
 0x67a   :  { %1250 = vrot.lane.b32.xlu1 %v6171_v11, %s5894_s27 }
 0x67e   :  { %1417 = vrot.lane.b32.xlu1 %v6171_v11, %s5893_s1 }
 0x682   :  { %1508 = vrot.lane.b32.xlu1 %v6171_v11, %s5896_s6 }
 0x6f6   :  { %v1090_v30 = vpop.xlane.xlu1 %1089 }
 0x6f7   :  { %5609 = vrcp.f32 %v1090_v30 }
 0x6fa   :  { %v1251_v31 = vpop.permute.xlu1 %1250 }
 0x6fb   :  { %5106 = vmatpush3.xpose.msk.msra.mxu1 %vm280_vm2, %v1251_v31 }
 0x6fc   :  { %5110 = vmatprep.subr.mxu1 %v5891_v8 }
 0x6fe   :  { %5108 = vmatmul.mubr.msk.f32.vlgmr.msra.gmra.mrb[14].mxu1 %vm280_vm2, %v6171_v11  ;;  %v1418_v41 = vpop.permute.xlu1 %1417 }
 0x6ff   :  { %5112 = vmatprep.mubr.msk.f32.mxu1 %vm5892_vm1, %v5891_v8 }
 0x701   :  { %v5610_v32 = vpop.eup %5609 }
 0x702   :  { %v1092_v33 = vmul.f32 %v5610_v32, %v1090_v30  ;;  %v1509_v57 = vpop.permute.xlu1 %1508 }
 0x704   :  { %v1093_v34 = vsub.f32 2.0, %v1092_v33 }
 0x706   :  { %v1094_v35 = vmul.f32 %v5610_v32, %v1093_v34 }
 0x73b   :  { %v1167_v36 = vpop.f32.mrb[4].mxu0 }
 0x73c   :  { %v1171_v37 = vmul.f32 %v1167_v36, %v1094_v35  ;;  %v5099_v38 = vpop.f32.mrb[5].mxu0 }
 0x73e   :  { %5103 = vmatmul.mubr.msk.f32.vlgmr.msra.gmra.mrb[2].mxu0 %vm280_vm2, %v1171_v37 }
 0x73f   :  { %5116 = vmatpush3.xpose.msk.msra.mxu0 %vm280_vm2, %v1420_v39  ;;  %5117 = vmatprep.mubr.msk.f32.mxu0 %vm5892_vm1, %v5891_v8 }
 0x740   :  { %5125 = vmatprep.subr.mxu0 %v5891_v8 }
 0x742   :  { %5118 = vmatmul.mubr.msk.f32.vlgmr.msra.gmra.mrb[6].mxu0 %vm280_vm2, %v1418_v41 }
 0x743   :  { %5126 = vmatpush3.msra.mxu0 %v6237_v40  ;;  %5127 = vmatprep.mubr.msk.f32.mxu0 %vm5892_vm1, %v5891_v8 }
 0x744   :  { %5130 = vmatprep.subr.mxu0 %v5891_v8 }
 0x7d1   :  { %v1322_v43 = vpop.f32.mrb[14].mxu1 }
 0x7d2   :  { %v1323_v44 = vadd.f32 %v1322_v43, %v6315_v42  ;;  %v5109_v45 = vpop.f32.mrb[15].mxu1 }
 0x7d4   :  { %v1326_v46 = vsel %vm280_vm2, %v1323_v44, -inf }
 0x7d5   :  { %1327 = vmax.xlane.f32.xlu0 %v1326_v46 }
 0x7eb   :  { %1339 = vrot.lane.b32.xlu0 %v6171_v11, %s5898_s29 }
 0x7ef   :  { %1734 = vrot.lane.b32.xlu0 %v6171_v11, %s5897_s14 }
 0x811   :  { %v1242_v40 = vpop.f32.mrb[2].mxu0 }
 0x812   :  { %1247 = vst.msk [vmem:[#allocation2] sm:$0xff] %vm194_vm0, %v1242_v40  ;;  %v5104_v47 = vpop.f32.mrb[3].mxu0 }
 0x815   :  { %v1491_v48 = vpop.f32.mrb[6].mxu0 }
 0x816   :  { %v1492_v49 = vadd.f32 %v1491_v48, %v6315_v42  ;;  %v5119_v50 = vpop.f32.mrb[7].mxu0 }
 0x818   :  { %v1495_v51 = vsel %vm280_vm2, %v1492_v49, -inf }
 0x819   :  { %1496 = vmax.xlane.f32.xlu1 %v1495_v51 }
 0x82a   :  { %1732 = vrot.lane.b32.xlu1 %v6171_v11, %s5899_s0 }
 0x82e   :  { %1823 = vrot.lane.b32.xlu1 %v6171_v11, %s5900_s19  ;;  %s6780_s19 = sld [smem:[#allocation31_spill]] }
 0x832   :  { %1977 = vrot.lane.b32.xlu1 %v6171_v11, %s5901_s12 }
 0x836   :  { %1975 = vrot.lane.b32.xlu1 %v6171_v11, %s5902_s13 }
 0x862   :  { %v1328_v52 = vpop.xlane.xlu0 %1327 }
 0x863   :  { %v1329_v53 = vsub.f32 %v1323_v44, %v1328_v52  ;;  %v2219_v52 = vld [vmem:[#allocation2] sm:$0xff] }
 0x865   :  { %v1330_v54 = vmul.f32 1.442695, %v1329_v53 }
 0x866   :  { %v1340_v55 = vpop.permute.xlu0 %1339 }
 0x867   :  { %5611 = vpow2.f32 %v1330_v54  ;;  %5111 = vmatpush3.msra.mxu1 %v1340_v55 }
 0x868   :  { %5120 = vmatprep.subr.mxu1 %v5891_v8 }
 0x86a   :  { %v1735_v0 = vpop.permute.xlu0 %1734 }
 0x871   :  { %v5612_v56 = vpop.eup %5611 }
 0x872   :  { %5113 = vmatmul.mubr.msk.f32.vlgmr.msra.gmra.mrb[16].mxu1 %vm280_vm2, %v5612_v56  ;;  %v1332_v25 = vsel %vm280_vm2, %v5612_v56, 0.0 }
 0x873   :  { %5121 = vmatpush3.msra.mxu1 %v1509_v57  ;;  %5122 = vmatprep.mubr.msk.f32.mxu1 %vm5892_vm1, %v5891_v8 }
 0x874   :  { %5135 = vmatprep.subr.mxu1 %v5891_v8 }
 0x8a6   :  { %v1497_v59 = vpop.xlane.xlu1 %1496 }
 0x8a7   :  { %v1498_v60 = vsub.f32 %v1492_v49, %v1497_v59 }
 0x8a9   :  { %v1499_v61 = vmul.f32 1.442695, %v1498_v60 }
 0x8aa   :  { %v1733_v62 = vpop.permute.xlu1 %1732 }
 0x8ab   :  { %5613 = vpow2.f32 %v1499_v61 }
 0x8ae   :  { %v1824_v2 = vpop.permute.xlu1 %1823 }
 0x8b2   :  { %v1978_v6 = vpop.permute.xlu1 %1977 }
 0x8b5   :  { %v5614_v63 = vpop.eup %5613 }
 0x8b6   :  { %5123 = vmatmul.mubr.msk.f32.vlgmr.msra.gmra.mrb[18].mxu1 %vm280_vm2, %v5614_v63  ;;  %v1501_v1 = vsel %vm280_vm2, %v5614_v63, 0.0  ;;  %v1976_v10 = vpop.permute.xlu1 %1975 }
 0x8b7   :  { %5136 = vmatpush3.xpose.msk.msra.mxu1 %vm280_vm2, %v1735_v0  ;;  %1502 = vadd.xlane.f32.xlu1 %v1501_v1 }
 0x8b8   :  { %5137 = vmatprep.mubr.msk.f32.mxu1 %vm5892_vm1, %v5891_v8  ;;  %5140 = vmatprep.subr.mxu1 %v5891_v8 }
 0x8ba   :  { %5138 = vmatmul.mubr.msk.f32.vlgmr.msra.gmra.mrb[20].mxu1 %vm280_vm2, %v1733_v62 }
 0x8bb   :  { %5141 = vmatpush3.msra.mxu1 %v1824_v2  ;;  %5142 = vmatprep.mubr.msk.f32.mxu1 %vm5892_vm1, %v5891_v8 }
 0x8bc   :  { %5150 = vmatprep.subr.mxu1 %v5891_v8 }
 0x944   :  { %v1503_v12 = vpop.xlane.xlu1 %1502 }
 0x945   :  { %v1411_v3 = vpop.f32.mrb[16].mxu1  ;;  %5615 = vrcp.f32 %v1503_v12 }
 0x946   :  { %v5114_v4 = vpop.f32.mrb[17].mxu1 }
 0x94f   :  { %v5616_v13 = vpop.eup %5615 }
 0x950   :  { %v1505_v14 = vmul.f32 %v5616_v13, %v1503_v12 }
 0x952   :  { %v1506_v15 = vsub.f32 2.0, %v1505_v14 }
 0x954   :  { %v1507_v16 = vmul.f32 %v5616_v13, %v1506_v15 }
 0x989   :  { %v1580_v18 = vpop.f32.mrb[18].mxu1 }
 0x98a   :  { %v1584_v19 = vmul.f32 %v1580_v18, %v1507_v16  ;;  %v5124_v20 = vpop.f32.mrb[19].mxu1  ;;  %v2369_v16 = vld [vmem:[#allocation6] sm:$0xff]  ;;  %v2370_v18 = vld [vmem:[#allocation6 + $0x8] sm:$0xff] }
 0x98c   :  { %5128 = vmatmul.mubr.msk.f32.vlgmr.msra.gmra.mrb[8].mxu0 %vm280_vm2, %v1584_v19  ;;  %v5388_v19 = vpack.c.bf16 %v2370_v18, %v2369_v16 }
 0x98d   :  { %v1806_v21 = vpop.f32.mrb[20].mxu1  ;;  %5131 = vmatpush3.msra.mxu0 %v6250_v58  ;;  %5132 = vmatprep.mubr.msk.f32.mxu0 %vm5892_vm1, %v5891_v8 }
 0x98e   :  { %v1807_v22 = vadd.f32 %v1806_v21, %v6315_v42  ;;  %v5139_v23 = vpop.f32.mrb[21].mxu1  ;;  %5145 = vmatprep.subr.mxu0 %v5891_v8 }
 0x990   :  { %v1810_v24 = vsel %vm280_vm2, %v1807_v22, -inf }
 0x991   :  { %1811 = vmax.xlane.f32.xlu0 %v1810_v24 }
 0x995   :  { %1333 = vadd.xlane.f32.xlu0 %v1332_v25 }
 0xa1e   :  { %v1812_v26 = vpop.xlane.xlu0 %1811 }
 0xa1f   :  { %v1813_v27 = vsub.f32 %v1807_v22, %v1812_v26 }
 0xa21   :  { %v1814_v28 = vmul.f32 1.442695, %v1813_v27 }
 0xa22   :  { %v1334_v29 = vpop.xlane.xlu0 %1333 }
 0xa23   :  { %5617 = vpow2.f32 %v1814_v28  ;;  %v4825_v28 = vld [vmem:[%s6750_s18] ss:$0 sm:$0xff] }
 0xa24   :  { %5619 = vrcp.f32 %v1334_v29 }
 0xa2d   :  { %v5618_v58 = vpop.eup %5617 }
 0xa2e   :  { %v5620_v30 = vpop.eup %5619  ;;  %5143 = vmatmul.mubr.msk.f32.vlgmr.msra.gmra.mrb[22].mxu1 %vm280_vm2, %v5618_v58  ;;  %v1816_v31 = vsel %vm280_vm2, %v5618_v58, 0.0  ;;  %v4826_v58 = vld [vmem:[#allocation15] ss:$0 sm:$0xff] }
 0xa2f   :  { %v1336_v32 = vmul.f32 %v5620_v30, %v1334_v29  ;;  %5151 = vmatpush3.xpose.msk.msra.mxu1 %vm280_vm2, %v1978_v6  ;;  %1817 = vadd.xlane.f32.xlu0 %v1816_v31  ;;  %v2371_v31 = vld [vmem:[#allocation6 + $0x10] sm:$0xff] }
 0xa30   :  { %5152 = vmatprep.mubr.msk.f32.mxu1 %vm5892_vm1, %v5891_v8 }
 0xa31   :  { %v1337_v33 = vsub.f32 2.0, %v1336_v32  ;;  %v2372_v32 = vld [vmem:[#allocation6 + $0x18] sm:$0xff] }
 0xa32   :  { %5153 = vmatmul.mubr.msk.f32.vlgmr.msra.gmra.mrb[24].mxu1 %vm280_vm2, %v1976_v10 }
 0xa33   :  { %v1338_v34 = vmul.f32 %v5620_v30, %v1337_v33 }
 0xa35   :  { %v1415_v35 = vmul.f32 %v1411_v3, %v1338_v34  ;;  %v5392_v34 = vpack.c.bf16 %v2372_v32, %v2371_v31 }
 0xa37   :  { %5133 = vmatmul.mubr.msk.f32.vlgmr.msra.gmra.mrb[8].mxu0 %vm280_vm2, %v1415_v35  ;;  %v179_v35 = vld [vmem:[%s6781_s8] sm:$0xff] }
 0xa38   :  { %5146 = vmatpush3.msra.mxu0 %v6269_v9  ;;  %5147 = vmatprep.mubr.msk.f32.mxu0 %vm5892_vm1, %v5891_v8 }
 0xa39   :  { %5155 = vmatprep.subr.mxu0 %v5891_v8 }
 0xabc   :  { %v1818_v36 = vpop.xlane.xlu0 %1817 }
 0xabd   :  { %5621 = vrcp.f32 %v1818_v36 }
 0xac7   :  { %v5622_v37 = vpop.eup %5621 }
 0xac8   :  { %v1820_v38 = vmul.f32 %v5622_v37, %v1818_v36  ;;  %v180_v36 = vld [vmem:[%s6781_s8 + $0x8] sm:$0xff] }
 0xaca   :  { %v1821_v39 = vsub.f32 2.0, %v1820_v38  ;;  %v2278_v38 = vld [vmem:[%s6782_s24 + $0x8] sm:$0xff] }
 0xacc   :  { %v1822_v41 = vmul.f32 %v5622_v37, %v1821_v39  ;;  %v2277_v37 = vld [vmem:[%s6782_s24] sm:$0xff] }
 0xacd   :  { %v5380_v39 = vpack.c.bf16 %v2278_v38, %v2277_v37 }
 0xacf   :  { %5381 = vmatprep.subr.bf16.mxu1 %v5380_v39 }
 0xad0   :  { %5383 = vmatpush3.bf16.msra.mxu1 %v5380_v39 }
 0xb01   :  { %v1895_v43 = vpop.f32.mrb[22].mxu1 }
 0xb02   :  { %v1899_v44 = vmul.f32 %v1895_v43, %v1822_v41  ;;  %v5144_v45 = vpop.f32.mrb[23].mxu1  ;;  %v2279_v41 = vld [vmem:[%s6782_s24 + $0x10] sm:$0xff]  ;;  %v2280_v43 = vld [vmem:[%s6782_s24 + $0x18] sm:$0xff] }
 0xb03   :  { %v5904_v45 = vmov 0.0|0.0  }
 0xb04   :  { %5148 = vmatmul.mubr.msk.f32.vlgmr.msra.gmra.mrb[8].mxu0 %vm280_vm2, %v1899_v44  ;;  %v5384_v44 = vpack.c.bf16 %v2280_v43, %v2279_v41 }
 0xb05   :  { %v2049_v46 = vpop.f32.mrb[24].mxu1  ;;  %5157 = vmatprep.mubr.msk.f32.mxu0 %vm5892_vm1, %v5891_v8 }
 0xb06   :  { %v2050_v9 = vadd.f32 %v2049_v46, %v6315_v42  ;;  %v5154_v40 = vpop.f32.mrb[25].mxu1  ;;  %v4824_v42 = vld [vmem:[%s6780_s19] ss:$0 sm:$0xff]  ;;  %5385 = vmatprep.subr.bf16.mxu1 %v5384_v44 }
 0xb07   :  { %v2228_v53 = vadd.f32 %v4824_v42, %v2219_v52  ;;  %5387 = vmatpush3.bf16.msra.mxu1 %v5384_v44 }
 0xb08   :  { %v2053_v47 = vsel %vm280_vm2, %v2050_v9, -inf  ;;  %5396 = vmatprep.subr.bf16.mxu1 %v5904_v45 }
 0xb09   :  { %2054 = vmax.xlane.f32.xlu0 %v2053_v47 }
 0xb1f   :  { %2066 = vrot.lane.b32.xlu0 %v6171_v11, %s5903_s2  ;;  %v2232_v11 = vadd.f32 %v2228_v53, %v6151_v5 }
 0xb21   :  { %v2234_v56 = vsel %vm194_vm0, %v2232_v11, 0.0 }
 0xb96   :  { %v2055_v48 = vpop.xlane.xlu0 %2054 }
 0xb97   :  { %v2056_v49 = vsub.f32 %v2050_v9, %v2055_v48 }
 0xb99   :  { %v2057_v50 = vmul.f32 1.442695, %v2056_v49 }
 0xb9a   :  { %v2067_v51 = vpop.permute.xlu0 %2066 }
 0xb9b   :  { %5623 = vpow2.f32 %v2057_v50  ;;  %5156 = vmatpush3.msra.mxu0 %v2067_v51  ;;  %v4830_v51 = vld [vmem:[#allocation8] ss:$0 sm:$0xff] }
 0xb9c   :  { %5160 = vmatprep.subr.mxu0 %v5891_v8 }
 0xba5   :  { %v5624_v54 = vpop.eup %5623 }
 0xba6   :  { %5158 = vmatmul.mubr.msk.f32.vlgmr.msra.gmra.mrb[10].mxu0 %vm280_vm2, %v5624_v54  ;;  %v2059_v55 = vsel %vm280_vm2, %v5624_v54, 0.0 }
 0xba7   :  { %2060 = vadd.xlane.f32.xlu1 %v2059_v55  ;;  %5161 = vmatpush3.msra.mxu0 %v6292_v17 }
 0xba8   :  { %5162 = vmatprep.mubr.msk.f32.mxu0 %vm5892_vm1, %v5891_v8  ;;  %5389 = vmatprep.subr.bf16.mxu0 %v5388_v19 }
 0xbab   :  { %2235 = vadd.xlane.f32.xlu1 %v2234_v56 }
 0xc34   :  { %v2061_v57 = vpop.xlane.xlu1 %2060 }
 0xc35   :  { %5625 = vrcp.f32 %v2061_v57 }
 0xc38   :  { %v2236_v2 = vpop.xlane.xlu1 %2235 }
 0xc39   :  { %v2241_v3 = vmul.f32 0.03125, %v2236_v2 }
 0xc3b   :  { %v2243_v6 = vsub.f32 %v2232_v11, %v2241_v3 }
 0xc3d   :  { %v2245_v14 = vmul.f32 %v2243_v6, %v2243_v6 }
 0xc3f   :  { %v5626_v59 = vpop.eup %5625  ;;  %v2247_v15 = vsel %vm194_vm0, %v2245_v14, 0.0 }
 0xc40   :  { %v2063_v60 = vmul.f32 %v5626_v59, %v2061_v57  ;;  %v181_v57 = vld [vmem:[%s6781_s8 + $0x10] sm:$0xff] }
 0xc42   :  { %v2064_v61 = vsub.f32 2.0, %v2063_v60 }
 0xc44   :  { %v2065_v62 = vmul.f32 %v5626_v59, %v2064_v61  ;;  %v182_v59 = vld [vmem:[%s6781_s8 + $0x18] sm:$0xff] }
 0xc79   :  { %v2138_v63 = vpop.f32.mrb[10].mxu0 }
 0xc7a   :  { %v2142_v0 = vmul.f32 %v2138_v63, %v2065_v62  ;;  %v5159_v1 = vpop.f32.mrb[11].mxu0 }
 0xc7c   :  { %5163 = vmatmul.mubr.msk.f32.vlgmr.msra.gmra.mrb[8].mxu0 %vm280_vm2, %v2142_v0  ;;  %v4827_v0 = vld [vmem:[#allocation3] ss:$0 sm:$0xff] }
 0xc7d   :  { %5391 = vmatpush3.bf16.msra.mxu0 %v5388_v19  ;;  %5184 = vmatprep.mubr.msk.f32.mxu0 %vm194_vm0, %v179_v35 }
 0xc7e   :  { %5393 = vmatprep.subr.bf16.mxu0 %v5392_v34 }
 0xc81   :  { %5395 = vmatpush3.bf16.msra.mxu0 %v5392_v34 }
 0xc82   :  { %5403 = vmatprep.subr.bf16.mxu0 %v5904_v45 }
 0xc84   :  { %5185 = vmatmul.mubr.msk.f32.vlgmr.msra.gmra.mrb[12].mxu0 %vm194_vm0, %v180_v36 }
 0xc85   :  { %5187 = vmatprep.mubr.msk.f32.mxu0 %vm194_vm0, %v181_v57 }
 0xc88   :  { %5188 = vmatmul.mubr.msk.f32.gmra.mrb[14].mxu0 %vm194_vm0, %v182_v59 }
 0xc89   :  { %5208 = vmatprep.mubr.msk.f32.mxu0 %vm5892_vm1, %v5891_v8 }
 0xd4f   :  { %v2213_v5 = vpop.f32.mrb[8].mxu0 }
 0xd50   :  { %2218 = vst.msk [vmem:[#allocation2 + $0x8] sm:$0xff] %vm194_vm0, %v2213_v5  ;;  %v5164_v17 = vpop.f32.mrb[9].mxu0 }
 0xd57   :  { %v2220_v4 = vld [vmem:[#allocation2 + $0x8] sm:$0xff]  ;;  %v5186_v52 = vpop.f32.mrb[12].mxu0 }
 0xd58   :  { %v2229_v10 = vadd.f32 %v4824_v42, %v2220_v4  ;;  %v2464_v42 = vadd.f32 %v5186_v52, %v4830_v51  ;;  %v2458_v53 = vpop.f32.mrb[13].mxu0 }
 0xd59   :  { %v2459_v54 = vadd.f32 %v4830_v51, %v2458_v53 }
 0xd5a   :  { %v2233_v12 = vadd.f32 %v2229_v10, %v6158_v7 }
 0xd5b   :  { %v6433_v11 = vpack.i.bf16 %v2464_v42, %v2459_v54  ;;  %v5397_v56 = vpack.c.bf16 %v2464_v42, %v2459_v54  ;;  %v5189_v4 = vpop.f32.mrb[14].mxu0 }
 0xd5c   :  { %v2237_v13 = vsel %vm194_vm0, %v2233_v12, 0.0  ;;  %v6462_v10 = vadd.f32 %v5189_v4, %v4830_v51 }
 0xd5d   :  { %2238 = vadd.xlane.f32.xlu1 %v2237_v13  ;;  %5526 = vrot.lane.b32.xlu0 %v6433_v11, %s5893_s1 }
 0xd61   :  { %2248 = vadd.xlane.f32.xlu1 %v2247_v15  ;;  %v6475_v15 = vld [vmem:[%s6785_s11] sm:$0xff] }
 0xdcf   :  { %v5527_v60 = vpop.permute.xlu0 %5526 }
 0xdd0   :  { %v5529_v61 = vunpack.i.h.bf16 %v5527_v60  ;;  %v5528_v62 = vunpack.i.l.bf16 %v5527_v60 }
 0xdd2   :  { %v5404_v63 = vpack.c.bf16 %v5529_v61, %v5528_v62  ;;  %v6533_v62 = vld [vmem:[#allocation9 + $0x8] sm:$0xff] }
 0xdd4   :  { %5406 = vmatpush3.bf16.xpose.msk.msra.mxu0 %vm6429_vm3, %v5404_v63 }
 0xdd5   :  { %5218 = vmatprep.subr.mxu0 %v5891_v8 }
 0xdea   :  { %v2239_v20 = vpop.xlane.xlu1 %2238 }
 0xdeb   :  { %v2242_v21 = vmul.f32 0.03125, %v2239_v20 }
 0xded   :  { %v2244_v22 = vsub.f32 %v2233_v12, %v2242_v21 }
 0xdee   :  { %v2249_v23 = vpop.xlane.xlu1 %2248 }
 0xdef   :  { %v2253_v24 = vmul.f32 0.03125, %v2249_v23  ;;  %v2246_v25 = vmul.f32 %v2244_v22, %v2244_v22 }
 0xdf1   :  { %v2255_v26 = vadd.f32 1e-05, %v2253_v24  ;;  %v2250_v7 = vsel %vm194_vm0, %v2246_v25, 0.0 }
 0xdf2   :  { %2251 = vadd.xlane.f32.xlu1 %v2250_v7 }
 0xdf3   :  { %5627 = vrsqrt.f32 %v2255_v26 }
 0xdfd   :  { %v5628_v27 = vpop.eup %5627 }
 0xdfe   :  { %v2259_v29 = vmul.f32 %v5628_v27, %v2243_v6  ;;  %v2468_v6 = vpop.f32.mrb[15].mxu0 }
 0xdff   :  { %v6464_v12 = vadd.f32 %v4830_v51, %v2468_v6 }
 0xe00   :  { %v2267_v30 = vmul.f32 %v4825_v28, %v2259_v29 }
 0xe01   :  { %v6468_v13 = vpack.i.bf16 %v6462_v10, %v6464_v12  ;;  %v5425_v14 = vpack.c.bf16 %v6462_v10, %v6464_v12 }
 0xe02   :  { %v6395_v33 = vadd.f32 %v4826_v58, %v2267_v30 }
 0xe04   :  { %5173 = vmatprep.mubr.msk.f32.mxu1 %vm194_vm0, %v6395_v33 }
 0xe7f   :  { %v2252_v46 = vpop.xlane.xlu1 %2251 }
 0xe80   :  { %v2254_v9 = vmul.f32 0.03125, %v2252_v46 }
 0xe82   :  { %v2256_v40 = vadd.f32 1e-05, %v2254_v9 }
 0xe84   :  { %5629 = vrsqrt.f32 %v2256_v40 }
 0xe8e   :  { %v5630_v47 = vpop.eup %5629 }
 0xe8f   :  { %v2260_v48 = vmul.f32 %v5630_v47, %v2244_v22 }
 0xe91   :  { %v2268_v49 = vmul.f32 %v4825_v28, %v2260_v48 }
 0xe93   :  { %v6421_v50 = vadd.f32 %v4826_v58, %v2268_v49 }
 0xe95   :  { %5174 = vmatmul.mubr.msk.f32.vlgmr.msra.gmra.mrb[26].mxu1 %vm194_vm0, %v6421_v50 }
 0xe96   :  { %5194 = vmatprep.mubr.msk.f32.mxu1 %vm5892_vm1, %v5891_v8  ;;  %5399 = vmatpush3.bf16.xpose.msk.msra.mxu1 %vm6429_vm3, %v5397_v56 }
 0xe97   :  { %5400 = vmatprep.subr.bf16.mxu1 %v5904_v45 }
 0xf68   :  { %v5175_v1 = vpop.f32.mrb[26].mxu1 }
 0xf69   :  { %v6453_v5 = vadd.f32 %v5175_v1, %v4827_v0  ;;  %v2360_v17 = vpop.f32.mrb[27].mxu1 }
 0xf6a   :  { %v2361_v2 = vadd.f32 %v4827_v0, %v2360_v17 }
 0xf6c   :  { %2652 = vrot.lane.b32.xlu1 %v2361_v2, %s5893_s1  ;;  %5195 = vmatmul.mubr.msk.f32.vlgmr.msra.gmra.mrb[28].mxu1 %vm280_vm2, %v2361_v2 }
 0xf6d   :  { %5201 = vmatprep.mubr.msk.f32.mxu1 %vm5892_vm1, %v5891_v8 }
 0xfde   :  { %v2653_v3 = vpop.permute.xlu1 %2652 }
 0xfdf   :  { %5209 = vmatmul.mubr.msk.f32.vlgmr.msra.gmra.mrb[16].mxu0 %vm280_vm2, %v2653_v3 }
 0xfe0   :  { %5220 = vmatprep.mubr.msk.f32.mxu0 %vm5892_vm1, %v5891_v8  ;;  %5219 = vmatpush3.msra.mxu0 %v6533_v62 }
 0xfe1   :  { %5223 = vmatprep.subr.mxu0 %v5891_v8 }
0x103f   :  { %v2553_v16 = vpop.f32.mrb[28].mxu1 }
0x1040   :  { %v2554_v18 = vadd.f32 %v2553_v16, %v6475_v15  ;;  %v5196_v19 = vpop.f32.mrb[29].mxu1 }
0x1042   :  { %v2558_v20 = vsel %vm2557_vm4, %v2554_v18, -inf }
0x1043   :  { %2559 = vmax.xlane.f32.xlu0 %v2558_v20  ;;  %v6537_v20 = vld [vmem:[#allocation9] sm:$0xff] }
0x1059   :  { %5531 = vrot.lane.b32.xlu0 %v6433_v11, %s5894_s27 }
0x105d   :  { %5541 = vrot.lane.b32.xlu0 %v6433_v11, %s5899_s0 }
0x1061   :  { %2974 = vrot.lane.b32.xlu0 %v2361_v2, %s5899_s0 }
0x1065   :  { %5546 = vrot.lane.b32.xlu0 %v6433_v11, %s5902_s13 }
0x1069   :  { %3224 = vrot.lane.b32.xlu0 %v2361_v2, %s5902_s13 }
0x10b2   :  { %v2730_v21 = vpop.f32.mrb[16].mxu0 }
0x10b3   :  { %v2731_v22 = vadd.f32 %v2730_v21, %v6475_v15  ;;  %v5210_v23 = vpop.f32.mrb[17].mxu0 }
0x10b5   :  { %v2734_v24 = vsel %vm2557_vm4, %v2731_v22, -inf }
0x10b6   :  { %2735 = vmax.xlane.f32.xlu1 %v2734_v24 }
0x10c7   :  { %5536 = vrot.lane.b32.xlu1 %v6433_v11, %s5895_s17 }
0x10d0   :  { %v2560_v25 = vpop.xlane.xlu0 %2559 }
0x10d1   :  { %v2561_v26 = vsub.f32 %v2554_v18, %v2560_v25 }
0x10d3   :  { %v2562_v7 = vmul.f32 1.442695, %v2561_v26 }
0x10d4   :  { %v5532_v27 = vpop.permute.xlu0 %5531 }
0x10d5   :  { %5631 = vpow2.f32 %v2562_v7  ;;  %v5534_v28 = vunpack.i.h.bf16 %v5532_v27  ;;  %v5533_v29 = vunpack.i.l.bf16 %v5532_v27 }
0x10d7   :  { %v5401_v58 = vpack.c.bf16 %v5534_v28, %v5533_v29 }
0x10d8   :  { %v5542_v37 = vpop.permute.xlu0 %5541 }
0x10d9   :  { %5402 = vmatpush3.bf16.msra.mxu1 %v5401_v58  ;;  %v5544_v44 = vunpack.i.h.bf16 %v5542_v37  ;;  %v5543_v46 = vunpack.i.l.bf16 %v5542_v37 }
0x10da   :  { %5407 = vmatprep.subr.bf16.mxu1 %v5904_v45 }
0x10db   :  { %v5411_v40 = vpack.c.bf16 %v5544_v44, %v5543_v46 }
0x10dc   :  { %v2975_v43 = vpop.permute.xlu0 %2974 }
0x10df   :  { %v5632_v30 = vpop.eup %5631 }
0x10e0   :  { %5202 = vmatmul.mubr.msk.f32.vlgmr.msra.gmra.mrb[30].mxu1 %vm2557_vm4, %v5632_v30  ;;  %v2564_v31 = vsel %vm2557_vm4, %v5632_v30, 0.0  ;;  %v5547_v48 = vpop.permute.xlu0 %5546 }
0x10e1   :  { %5215 = vmatprep.mubr.msk.f32.mxu1 %vm5892_vm1, %v5891_v8  ;;  %v5549_v49 = vunpack.i.h.bf16 %v5547_v48  ;;  %v5548_v51 = vunpack.i.l.bf16 %v5547_v48 }
0x10e3   :  { %v5418_v52 = vpack.c.bf16 %v5549_v49, %v5548_v51  ;;  %v6577_v51 = vld [vmem:[%s6785_s11 + $0x8] sm:$0xff] }
0x10e4   :  { %v3225_v42 = vpop.permute.xlu0 %3224 }
0x10eb   :  { %2565 = vadd.xlane.f32.xlu1 %v2564_v31 }
0x10fc   :  { %5556 = vrot.lane.b32.xlu1 %v6468_v13, %s5893_s1 }
0x1100   :  { %3649 = vrot.lane.b32.xlu1 %v6453_v5, %s5893_s1 }
0x1143   :  { %v2736_v32 = vpop.xlane.xlu1 %2735 }
0x1144   :  { %v2737_v34 = vsub.f32 %v2731_v22, %v2736_v32 }
0x1146   :  { %v2738_v35 = vmul.f32 1.442695, %v2737_v34 }
0x1147   :  { %v5537_v36 = vpop.permute.xlu1 %5536 }
0x1148   :  { %5633 = vpow2.f32 %v2738_v35  ;;  %v5539_v38 = vunpack.i.h.bf16 %v5537_v36  ;;  %v5538_v39 = vunpack.i.l.bf16 %v5537_v36 }
0x114a   :  { %v5408_v41 = vpack.c.bf16 %v5539_v38, %v5538_v39 }
0x114c   :  { %5409 = vmatpush3.bf16.msra.mxu1 %v5408_v41 }
0x114d   :  { %5410 = vmatprep.subr.bf16.mxu1 %v5904_v45 }
0x1152   :  { %v5634_v9 = vpop.eup %5633 }
0x1153   :  { %5216 = vmatmul.mubr.msk.f32.vlgmr.msra.gmra.mrb[32].mxu1 %vm2557_vm4, %v5634_v9  ;;  %v2740_v47 = vsel %vm2557_vm4, %v5634_v9, 0.0 }
0x1154   :  { %2741 = vadd.xlane.f32.xlu0 %v2740_v47  ;;  %5232 = vmatprep.mubr.msk.f32.mxu1 %vm5892_vm1, %v5891_v8 }
0x1155   :  { %5413 = vmatpush3.bf16.xpose.msk.msra.mxu1 %vm6429_vm3, %v5411_v40 }
0x1156   :  { %5417 = vmatprep.subr.bf16.mxu1 %v5904_v45 }
0x115c   :  { %5233 = vmatmul.mubr.msk.f32.vlgmr.msra.gmra.mrb[34].mxu1 %vm280_vm2, %v2975_v43 }
0x115d   :  { %5420 = vmatpush3.bf16.xpose.msk.msra.mxu1 %vm6429_vm3, %v5418_v52  ;;  %5251 = vmatprep.mubr.msk.f32.mxu1 %vm5892_vm1, %v5891_v8 }
0x115e   :  { %5424 = vmatprep.subr.bf16.mxu1 %v5904_v45 }
0x1164   :  { %5252 = vmatmul.mubr.msk.f32.vlgmr.msra.gmra.mrb[36].mxu1 %vm280_vm2, %v3225_v42 }
0x1165   :  { %5427 = vmatpush3.bf16.xpose.msk.msra.mxu1 %vm6429_vm3, %v5425_v14  ;;  %5270 = vmatprep.mubr.msk.f32.mxu1 %vm5892_vm1, %v5891_v8 }
0x1166   :  { %5431 = vmatprep.subr.bf16.mxu1 %v5904_v45 }
0x116c   :  { %5271 = vmatmul.mubr.msk.f32.vlgmr.msra.gmra.mrb[38].mxu1 %vm280_vm2, %v6453_v5 }
0x116d   :  { %5284 = vmatprep.mubr.msk.f32.mxu1 %vm5892_vm1, %v5891_v8 }
0x1178   :  { %v2566_v53 = vpop.xlane.xlu1 %2565 }
0x1179   :  { %5635 = vrcp.f32 %v2566_v53 }
0x117c   :  { %v5557_v54 = vpop.permute.xlu1 %5556 }
0x117d   :  { %v5559_v56 = vunpack.i.h.bf16 %v5557_v54  ;;  %v5558_v57 = vunpack.i.l.bf16 %v5557_v54  ;;  %v6585_v54 = vld [vmem:[#allocation9 + $0x10] sm:$0xff] }
0x117f   :  { %v5432_v59 = vpack.c.bf16 %v5559_v56, %v5558_v57 }
0x1180   :  { %v3650_v60 = vpop.permute.xlu1 %3649 }
0x1181   :  { %5434 = vmatpush3.bf16.xpose.msk.msra.mxu1 %vm6429_vm3, %v5432_v59 }
0x1182   :  { %5438 = vmatprep.subr.bf16.mxu1 %v5904_v45 }
0x1183   :  { %v5636_v61 = vpop.eup %5635 }
0x1184   :  { %v2568_v63 = vmul.f32 %v5636_v61, %v2566_v53 }
0x1186   :  { %v2569_v0 = vsub.f32 2.0, %v2568_v63 }
0x1188   :  { %5285 = vmatmul.mubr.msk.f32.vlgmr.msra.gmra.mrb[40].mxu1 %vm280_vm2, %v3650_v60  ;;  %v2570_v1 = vmul.f32 %v5636_v61, %v2569_v0 }
0x1189   :  { %5308 = vmatprep.mubr.msk.f32.mxu1 %vm5892_vm1, %v5891_v8 }
0x11b3   :  { %v2646_v17 = vpop.f32.mrb[30].mxu1 }
0x11b4   :  { %v2650_v2 = vmul.f32 %v2646_v17, %v2570_v1  ;;  %v5203_v3 = vpop.f32.mrb[31].mxu1 }
0x11e1   :  { %v2742_v4 = vpop.xlane.xlu0 %2741 }
0x11e2   :  { %5637 = vrcp.f32 %v2742_v4 }
0x11ec   :  { %v5638_v6 = vpop.eup %5637 }
0x11ed   :  { %v2744_v10 = vmul.f32 %v5638_v6, %v2742_v4 }
0x11ef   :  { %v2745_v12 = vsub.f32 2.0, %v2744_v10 }
0x11f1   :  { %v2746_v14 = vmul.f32 %v5638_v6, %v2745_v12 }
0x1226   :  { %v2822_v16 = vpop.f32.mrb[32].mxu1 }
0x1227   :  { %v2826_v18 = vmul.f32 %v2822_v16, %v2746_v14  ;;  %v5217_v19 = vpop.f32.mrb[33].mxu1 }
0x1229   :  { %5221 = vmatmul.mubr.msk.f32.vlgmr.msra.gmra.mrb[18].mxu0 %vm280_vm2, %v2826_v18 }
0x122a   :  { %5224 = vmatpush3.msra.mxu0 %v6537_v20  ;;  %5225 = vmatprep.mubr.msk.f32.mxu0 %vm5892_vm1, %v5891_v8 }
0x122b   :  { %5414 = vmatprep.subr.bf16.mxu0 %v5904_v45 }
0x122f   :  { %v3052_v21 = vpop.f32.mrb[34].mxu1 }
0x1230   :  { %v3053_v22 = vadd.f32 %v3052_v21, %v6475_v15  ;;  %v5234_v23 = vpop.f32.mrb[35].mxu1 }
0x1231   :  { %5226 = vmatmul.mubr.msk.f32.vlgmr.msra.gmra.mrb[18].mxu0 %vm280_vm2, %v2650_v2 }
0x1232   :  { %v3056_v24 = vsel %vm2557_vm4, %v3053_v22, -inf  ;;  %5239 = vmatprep.mubr.msk.f32.mxu0 %vm5892_vm1, %v5891_v8 }
0x1233   :  { %3057 = vmax.xlane.f32.xlu0 %v3056_v24 }
0x1237   :  { %v3302_v25 = vpop.f32.mrb[36].mxu1 }
0x1238   :  { %v3303_v26 = vadd.f32 %v3302_v25, %v6475_v15  ;;  %v5253_v7 = vpop.f32.mrb[37].mxu1 }
0x123a   :  { %v3306_v27 = vsel %vm2557_vm4, %v3303_v26, -inf }
0x123b   :  { %3307 = vmax.xlane.f32.xlu1 %v3306_v27 }
0x123f   :  { %v3551_v28 = vpop.f32.mrb[38].mxu1 }
0x1240   :  { %v5272_v29 = vpop.f32.mrb[39].mxu1  ;;  %v3552_v52 = vadd.f32 %v3551_v28, %v6577_v51 }
0x1241   :  { %v6606_v29 = vld [vmem:[#allocation9 + $0x18] sm:$0xff] }
0x1242   :  { %v3555_v42 = vsel %vm2557_vm4, %v3552_v52, -inf }
0x1249   :  { %5551 = vrot.lane.b32.xlu0 %v6433_v11, %s5897_s14 }
0x124c   :  { %5566 = vrot.lane.b32.xlu1 %v6468_v13, %s5899_s0 }
0x125b   :  { %v3727_v58 = vpop.f32.mrb[40].mxu1 }
0x125c   :  { %v5286_v30 = vpop.f32.mrb[41].mxu1 }
0x12c0   :  { %v3058_v31 = vpop.xlane.xlu0 %3057 }
0x12c1   :  { %v3059_v32 = vsub.f32 %v3053_v22, %v3058_v31 }
0x12c3   :  { %v3060_v34 = vmul.f32 1.442695, %v3059_v32 }
0x12c4   :  { %v5552_v35 = vpop.permute.xlu0 %5551 }
0x12c5   :  { %5639 = vpow2.f32 %v3060_v34  ;;  %v5554_v15 = vunpack.i.h.bf16 %v5552_v35  ;;  %v5553_v36 = vunpack.i.l.bf16 %v5552_v35 }
0x12c7   :  { %v5415_v37 = vpack.c.bf16 %v5554_v15, %v5553_v36 }
0x12c8   :  { %v3308_v38 = vpop.xlane.xlu1 %3307 }
0x12c9   :  { %v3309_v39 = vsub.f32 %v3303_v26, %v3308_v38  ;;  %5416 = vmatpush3.bf16.msra.mxu0 %v5415_v37 }
0x12ca   :  { %5242 = vmatprep.subr.mxu0 %v5891_v8 }
0x12cb   :  { %v3310_v41 = vmul.f32 1.442695, %v3309_v39 }
0x12cc   :  { %v5567_v43 = vpop.permute.xlu1 %5566 }
0x12cd   :  { %5641 = vpow2.f32 %v3310_v41  ;;  %v5569_v44 = vunpack.i.h.bf16 %v5567_v43  ;;  %v5568_v46 = vunpack.i.l.bf16 %v5567_v43 }
0x12cf   :  { %v5640_v9 = vpop.eup %5639  ;;  %v5439_v40 = vpack.c.bf16 %v5569_v44, %v5568_v46 }
0x12d0   :  { %5240 = vmatmul.mubr.msk.f32.vlgmr.msra.gmra.mrb[20].mxu0 %vm2557_vm4, %v5640_v9  ;;  %v3062_v47 = vsel %vm2557_vm4, %v5640_v9, 0.0 }
0x12d1   :  { %3063 = vadd.xlane.f32.xlu0 %v3062_v47  ;;  %5441 = vmatpush3.bf16.xpose.msk.msra.mxu1 %vm6429_vm3, %v5439_v40 }
0x12d2   :  { %5445 = vmatprep.subr.bf16.mxu1 %v5904_v45  ;;  %5244 = vmatprep.mubr.msk.f32.mxu0 %vm5892_vm1, %v5891_v8 }
0x12d3   :  { %5243 = vmatpush3.msra.mxu0 %v6585_v54 }
0x12d4   :  { %5421 = vmatprep.subr.bf16.mxu0 %v5904_v45 }
0x12d7   :  { %v5642_v48 = vpop.eup %5641 }
0x12d8   :  { %v3312_v49 = vsel %vm2557_vm4, %v5642_v48, 0.0 }
0x12d9   :  { %3313 = vadd.xlane.f32.xlu1 %v3312_v49 }
0x12e7   :  { %5561 = vrot.lane.b32.xlu0 %v6433_v11, %s5901_s12  ;;  %v3728_v11 = vadd.f32 %v3727_v58, %v6577_v51 }
0x12e9   :  { %v3731_v53 = vsel %vm2557_vm4, %v3728_v11, -inf }
0x12ea   :  { %5571 = vrot.lane.b32.xlu1 %v6468_v13, %s5894_s27  ;;  %s4773_s27 = sshll.u32 %s5905_s26, 4  ;;  %s4774_s27 = int_to_ptr.vmem [resolvable:$true] %s4773_s27 }
0x12eb   :  { %3971 = vrot.lane.b32.xlu0 %v6453_v5, %s5899_s0  ;;  %p5852_p9 = scmp.lt.s32.totalorder %s4774_s27, %s4774_s27 }
0x12ee   :  { %5581 = vrot.lane.b32.xlu1 %v6468_v13, %s5902_s13 }
0x12f2   :  { %4221 = vrot.lane.b32.xlu1 %v6453_v5, %s5902_s13 }
0x130a   :  { %3556 = vmax.xlane.f32.xlu0 %v3555_v42 }
0x130e   :  { %3732 = vmax.xlane.f32.xlu0 %v3731_v53 }
0x1324   :  { %5576 = vrot.lane.b32.xlu0 %v6468_v13, %s5895_s17  ;;  %s5847_s17 = scalar_lea.vmem %s4774_s27, 256 }
0x1325   :  { %p5848_p8 = scmp.ne.s32.totalorder %s4774_s27, %s5847_s17  ;;  %p5853_p10 = scmp.lt.s32.totalorder %s5847_s17, %s5847_s17 }
0x1327   :  { %p5854_p11 = por %p5853_p10, %p5852_p9 }
0x1329   :  { %p5855_p12 = pnand %p5854_p11, %p5848_p8 }
0x135e   :  { %v3064_v5 = vpop.xlane.xlu0 %3063 }
0x135f   :  { %5643 = vrcp.f32 %v3064_v5 }
0x1362   :  { %v5562_v56 = vpop.permute.xlu0 %5561 }
0x1363   :  { %v5564_v19 = vunpack.i.h.bf16 %v5562_v56  ;;  %v5563_v21 = vunpack.i.l.bf16 %v5562_v56 }
0x1365   :  { %v5422_v25 = vpack.c.bf16 %v5564_v19, %v5563_v21 }
0x1366   :  { %v3972_v57 = vpop.permute.xlu0 %3971  ;;  %v3314_v59 = vpop.xlane.xlu1 %3313 }
0x1367   :  { %5309 = vmatmul.mubr.msk.f32.vlgmr.msra.gmra.mrb[42].mxu1 %vm280_vm2, %v3972_v57 }
0x1368   :  { %5327 = vmatprep.mubr.msk.f32.mxu1 %vm5892_vm1, %v5891_v8 }
0x1369   :  { %v5644_v2 = vpop.eup %5643 }
0x136a   :  { %v6592_v60 = vpop.permute.xlu1 %5571  ;;  %v3066_v6 = vmul.f32 %v5644_v2, %v3064_v5 }
0x136b   :  { %v5574_v41 = vunpack.i.h.bf16 %v6592_v60  ;;  %v5573_v43 = vunpack.i.l.bf16 %v6592_v60 }
0x136c   :  { %v3067_v16 = vsub.f32 2.0, %v3066_v6 }
0x136e   :  { %v5582_v61 = vpop.permute.xlu1 %5581  ;;  %v3068_v22 = vmul.f32 %v5644_v2, %v3067_v16 }
0x136f   :  { %v5584_v63 = vunpack.i.h.bf16 %v5582_v61  ;;  %v5583_v0 = vunpack.i.l.bf16 %v5582_v61 }
0x1371   :  { %v5446_v1 = vpack.c.bf16 %v5584_v63, %v5583_v0 }
0x1372   :  { %v4222_v17 = vpop.permute.xlu1 %4221 }
0x1373   :  { %5448 = vmatpush3.bf16.xpose.msk.msra.mxu1 %vm6429_vm3, %v5446_v1 }
0x137a   :  { %5328 = vmatmul.mubr.msk.f32.vlgmr.msra.gmra.mrb[44].mxu1 %vm280_vm2, %v4222_v17 }
0x1397   :  { %v3557_v3 = vpop.xlane.xlu0 %3556 }
0x1398   :  { %v3558_v4 = vsub.f32 %v3552_v52, %v3557_v3 }
0x139a   :  { %v3559_v10 = vmul.f32 1.442695, %v3558_v4 }
0x139b   :  { %v3733_v12 = vpop.xlane.xlu0 %3732 }
0x139c   :  { %5645 = vpow2.f32 %v3559_v10  ;;  %v3734_v14 = vsub.f32 %v3728_v11, %v3733_v12 }
0x139e   :  { %v3735_v18 = vmul.f32 1.442695, %v3734_v14  ;;  %v6636_v14 = vld [vmem:[#allocation11] ss:$0 sm:$0xff] }
0x139f   :  { %v5577_v44 = vpop.permute.xlu0 %5576 }
0x13a0   :  { %5647 = vpow2.f32 %v3735_v18  ;;  %v5579_v49 = vunpack.i.h.bf16 %v5577_v44 }
0x13a1   :  { %5649 = vrcp.f32 %v3314_v59 }
0x13a3   :  { %v3144_v55 = vpop.f32.mrb[20].mxu0 }
0x13a4   :  { %v3148_v23 = vmul.f32 %v3144_v55, %v3068_v22  ;;  %v5241_v24 = vpop.f32.mrb[21].mxu0 }
0x13a6   :  { %v5646_v26 = vpop.eup %5645  ;;  %5245 = vmatmul.mubr.msk.f32.vlgmr.msra.gmra.mrb[18].mxu0 %vm280_vm2, %v3148_v23 }
0x13a7   :  { %5423 = vmatpush3.bf16.msra.mxu0 %v5422_v25  ;;  %v3561_v7 = vsel %vm2557_vm4, %v5646_v26, 0.0  ;;  %5258 = vmatprep.mubr.msk.f32.mxu0 %vm5892_vm1, %v5891_v8 }
0x13a8   :  { %3562 = vadd.xlane.f32.xlu1 %v3561_v7  ;;  %5261 = vmatprep.subr.mxu0 %v5891_v8 }
0x13aa   :  { %v5648_v27 = vpop.eup %5647  ;;  %5259 = vmatmul.mubr.msk.f32.vlgmr.msra.gmra.mrb[22].mxu0 %vm2557_vm4, %v5642_v48  ;;  %v5429_v48 = vpack.c.bf16 %v5574_v41, %v5573_v43 }
0x13ab   :  { %v3737_v28 = vsel %vm2557_vm4, %v5648_v27, 0.0  ;;  %5263 = vmatprep.mubr.msk.f32.mxu0 %vm5892_vm1, %v5891_v8  ;;  %5262 = vmatpush3.msra.mxu0 %v6606_v29  ;;  %v5650_v37 = vpop.eup %5649 }
0x13ac   :  { %3738 = vadd.xlane.f32.xlu0 %v3737_v28  ;;  %5428 = vmatprep.subr.bf16.mxu0 %v5904_v45  ;;  %v3316_v38 = vmul.f32 %v5650_v37, %v3314_v59 }
0x13ae   :  { %v3317_v39 = vsub.f32 2.0, %v3316_v38 }
0x13b0   :  { %v3318_v46 = vmul.f32 %v5650_v37, %v3317_v39 }
0x1435   :  { %v3563_v57 = vpop.xlane.xlu1 %3562 }
0x1439   :  { %v3739_v11 = vpop.xlane.xlu0 %3738 }
0x143a   :  { %v4049_v58 = vpop.f32.mrb[42].mxu1 }
0x143b   :  { %v4050_v30 = vadd.f32 %v4049_v58, %v6577_v51  ;;  %v5310_v31 = vpop.f32.mrb[43].mxu1 }
0x143d   :  { %v4053_v32 = vsel %vm2557_vm4, %v4050_v30, -inf }
0x143e   :  { %4054 = vmax.xlane.f32.xlu0 %v4053_v32 }
0x144d   :  { %v4299_v34 = vpop.f32.mrb[44].mxu1 }
0x144e   :  { %v4300_v35 = vadd.f32 %v4299_v34, %v6577_v51  ;;  %v5329_v15 = vpop.f32.mrb[45].mxu1  ;;  %v5578_v51 = vunpack.i.l.bf16 %v5577_v44 }
0x1450   :  { %v4303_v36 = vsel %vm2557_vm4, %v4300_v35, -inf  ;;  %v5436_v52 = vpack.c.bf16 %v5579_v49, %v5578_v51 }
0x1451   :  { %4304 = vmax.xlane.f32.xlu1 %v4303_v36 }
0x1454   :  { %5586 = vrot.lane.b32.xlu0 %v6468_v13, %s5897_s14 }
0x147d   :  { %v3394_v9 = vpop.f32.mrb[22].mxu0 }
0x147e   :  { %v3398_v40 = vmul.f32 %v3394_v9, %v3318_v46  ;;  %v5260_v47 = vpop.f32.mrb[23].mxu0 }
0x1480   :  { %5264 = vmatmul.mubr.msk.f32.vlgmr.msra.gmra.mrb[18].mxu0 %vm280_vm2, %v3398_v40 }
0x1481   :  { %5430 = vmatpush3.bf16.msra.mxu0 %v5429_v48  ;;  %5277 = vmatprep.mubr.msk.f32.mxu0 %vm5892_vm1, %v5891_v8 }
0x1482   :  { %5435 = vmatprep.subr.bf16.mxu0 %v5904_v45 }
0x1484   :  { %5278 = vmatmul.mubr.msk.f32.vlgmr.msra.gmra.mrb[24].mxu0 %vm2557_vm4, %v5646_v26 }
0x1485   :  { %5437 = vmatpush3.bf16.msra.mxu0 %v5436_v52  ;;  %5291 = vmatprep.mubr.msk.f32.mxu0 %vm5892_vm1, %v5891_v8 }
0x1486   :  { %5294 = vmatprep.subr.mxu0 %v5891_v8 }
0x1488   :  { %5292 = vmatmul.mubr.msk.f32.vlgmr.msra.gmra.mrb[26].mxu0 %vm2557_vm4, %v5648_v27 }
0x1489   :  { %5295 = vmatpush3.msra.mxu0 %v6533_v62  ;;  %5296 = vmatprep.mubr.msk.f32.mxu0 %vm5892_vm1, %v5891_v8 }
0x148a   :  { %5299 = vmatprep.subr.mxu0 %v5891_v8 }
0x14cb   :  { %v4055_v42 = vpop.xlane.xlu0 %4054 }
0x14cc   :  { %v4056_v53 = vsub.f32 %v4050_v30, %v4055_v42 }
0x14ce   :  { %v4057_v5 = vmul.f32 1.442695, %v4056_v53 }
0x14cf   :  { %v5587_v24 = vpop.permute.xlu0 %5586 }
0x14d0   :  { %5651 = vpow2.f32 %v4057_v5  ;;  %v5589_v7 = vunpack.i.h.bf16 %v5587_v24  ;;  %v5588_v27 = vunpack.i.l.bf16 %v5587_v24 }
0x14d2   :  { %v5443_v30 = vpack.c.bf16 %v5589_v7, %v5588_v27 }
0x14da   :  { %v5652_v56 = vpop.eup %5651 }
0x14db   :  { %v4059_v59 = vsel %vm2557_vm4, %v5652_v56, 0.0 }
0x14dc   :  { %4060 = vadd.xlane.f32.xlu1 %v4059_v59 }
0x14de   :  { %v4305_v60 = vpop.xlane.xlu1 %4304 }
0x14df   :  { %v4306_v61 = vsub.f32 %v4300_v35, %v4305_v60 }
0x14e1   :  { %v4307_v63 = vmul.f32 1.442695, %v4306_v61 }
0x14e3   :  { %5653 = vpow2.f32 %v4307_v63 }
0x14e4   :  { %5655 = vrcp.f32 %v3739_v11 }
0x14e5   :  { %5657 = vrcp.f32 %v3563_v57 }
0x14ed   :  { %v5654_v62 = vpop.eup %5653  ;;  %5591 = vrot.lane.b32.xlu1 %v6468_v13, %s5901_s12 }
0x14ee   :  { %v4309_v0 = vsel %vm2557_vm4, %v5654_v62, 0.0  ;;  %v5656_v1 = vpop.eup %5655 }
0x14ef   :  { %4310 = vadd.xlane.f32.xlu0 %v4309_v0  ;;  %v3741_v17 = vmul.f32 %v5656_v1, %v3739_v11  ;;  %v5658_v6 = vpop.eup %5657 }
0x14f0   :  { %v3565_v16 = vmul.f32 %v5658_v6, %v3563_v57 }
0x14f1   :  { %v3742_v4 = vsub.f32 2.0, %v3741_v17 }
0x14f2   :  { %v3566_v23 = vsub.f32 2.0, %v3565_v16  ;;  %v4531_v16 = vld [vmem:[#allocation12 + $0x10] sm:$0xff] }
0x14f3   :  { %v3743_v18 = vmul.f32 %v5656_v1, %v3742_v4 }
0x14f4   :  { %v3567_v28 = vmul.f32 %v5658_v6, %v3566_v23  ;;  %v4626_v23 = vld [vmem:[%s6748_s16 + $0x18] sm:$0xff] }
0x1553   :  { %v3469_v2 = vpop.f32.mrb[18].mxu0 }
0x1554   :  { %3474 = vst.msk [vmem:[#allocation2] sm:$0xff] %vm194_vm0, %v3469_v2  ;;  %v5265_v3 = vpop.f32.mrb[19].mxu0 }
0x1555   :  { %v4877_v3 = vld [vmem:[%s6753_s21] ss:$0 sm:$0xff] }
0x1557   :  { %v3643_v10 = vpop.f32.mrb[24].mxu0 }
0x1558   :  { %v5279_v12 = vpop.f32.mrb[25].mxu0  ;;  %v3647_v58 = vmul.f32 %v3643_v10, %v3567_v28  ;;  %v4529_v10 = vld [vmem:[#allocation12] sm:$0xff] }
0x1559   :  { %v4530_v12 = vld [vmem:[#allocation12 + $0x8] sm:$0xff] }
0x155b   :  { %v3819_v13 = vpop.f32.mrb[26].mxu0  ;;  %v4472_v19 = vld [vmem:[#allocation2] sm:$0xff] }
0x155c   :  { %v3823_v21 = vmul.f32 %v3819_v13, %v3743_v18  ;;  %v5293_v22 = vpop.f32.mrb[27].mxu0  ;;  %v4481_v55 = vadd.f32 %v6636_v14, %v4472_v19  ;;  %v4532_v18 = vld [vmem:[#allocation12 + $0x18] sm:$0xff]  ;;  %v4623_v19 = vld [vmem:[%s6748_s16] sm:$0xff] }
0x155d   :  { %v5456_v13 = vpack.c.bf16 %v4532_v18, %v4531_v16  ;;  %v4625_v22 = vld [vmem:[%s6748_s16 + $0x10] sm:$0xff] }
0x155e   :  { %5297 = vmatmul.mubr.msk.f32.vlgmr.msra.gmra.mrb[28].mxu0 %vm280_vm2, %v3823_v21  ;;  %v4485_v25 = vadd.f32 %v4481_v55, %v6395_v33  ;;  %v4624_v21 = vld [vmem:[%s6748_s16 + $0x8] sm:$0xff]  ;;  %v5464_v24 = vpack.c.bf16 %v4626_v23, %v4625_v22 }
0x155f   :  { %5300 = vmatpush3.msra.mxu0 %v6537_v20  ;;  %5301 = vmatprep.mubr.msk.f32.mxu0 %vm5892_vm1, %v5891_v8  ;;  %v5460_v55 = vpack.c.bf16 %v4624_v21, %v4623_v19 }
0x1560   :  { %v4487_v26 = vsel %vm194_vm0, %v4485_v25, 0.0  ;;  %5442 = vmatprep.subr.bf16.mxu0 %v5904_v45 }
0x1561   :  { %4488 = vadd.xlane.f32.xlu1 %v4487_v26  ;;  %v4628_v26 = vld [vmem:[%s6748_s16 + $0x28] sm:$0xff] }
0x1566   :  { %5302 = vmatmul.mubr.msk.f32.vlgmr.msra.gmra.mrb[28].mxu0 %vm280_vm2, %v3647_v58 }
0x1567   :  { %5444 = vmatpush3.bf16.msra.mxu0 %v5443_v30  ;;  %5315 = vmatprep.mubr.msk.f32.mxu0 %vm5892_vm1, %v5891_v8 }
0x1568   :  { %5318 = vmatprep.subr.mxu0 %v5891_v8 }
0x1569   :  { %v4061_v33 = vpop.xlane.xlu1 %4060 }
0x156a   :  { %5316 = vmatmul.mubr.msk.f32.vlgmr.msra.gmra.mrb[30].mxu0 %vm2557_vm4, %v5652_v56  ;;  %5659 = vrcp.f32 %v4061_v33 }
0x156b   :  { %5319 = vmatpush3.msra.mxu0 %v6585_v54  ;;  %5320 = vmatprep.mubr.msk.f32.mxu0 %vm5892_vm1, %v5891_v8 }
0x156c   :  { %5449 = vmatprep.subr.bf16.mxu0 %v5904_v45 }
0x156d   :  { %v5592_v34 = vpop.permute.xlu1 %5591 }
0x156e   :  { %v5594_v35 = vunpack.i.h.bf16 %v5592_v34  ;;  %v5593_v15 = vunpack.i.l.bf16 %v5592_v34  ;;  %v4630_v34 = vld [vmem:[%s6748_s16 + $0x38] sm:$0xff] }
0x1570   :  { %v5450_v41 = vpack.c.bf16 %v5594_v35, %v5593_v15  ;;  %v4878_v15 = vld [vmem:[%s6747_s15] ss:$0 sm:$0xff] }
0x1574   :  { %v5660_v20 = vpop.eup %5659 }
0x1575   :  { %v4063_v31 = vmul.f32 %v5660_v20, %v4061_v33 }
0x1577   :  { %v4064_v32 = vsub.f32 2.0, %v4063_v31 }
0x1579   :  { %v4065_v36 = vmul.f32 %v5660_v20, %v4064_v32  ;;  %v4629_v32 = vld [vmem:[%s6748_s16 + $0x30] sm:$0xff] }
0x157a   :  { %v5472_v35 = vpack.c.bf16 %v4630_v34, %v4629_v32 }
0x157c   :  { %v4311_v45 = vpop.xlane.xlu0 %4310 }
0x157d   :  { %5661 = vrcp.f32 %v4311_v45 }
0x1587   :  { %v5662_v54 = vpop.eup %5661 }
0x1588   :  { %v4313_v43 = vmul.f32 %v5662_v54, %v4311_v45 }
0x158a   :  { %v4314_v44 = vsub.f32 2.0, %v4313_v43 }
0x158c   :  { %v4315_v46 = vmul.f32 %v5662_v54, %v4314_v44  ;;  %v4881_v54 = vld [vmem:[#allocation14] ss:$0 sm:$0xff] }
0x15ee   :  { %v4489_v51 = vpop.xlane.xlu1 %4488 }
0x163d   :  { %v4141_v37 = vpop.f32.mrb[30].mxu0 }
0x163e   :  { %v4145_v38 = vmul.f32 %v4141_v37, %v4065_v36  ;;  %v5317_v39 = vpop.f32.mrb[31].mxu0 }
0x1640   :  { %5321 = vmatmul.mubr.msk.f32.vlgmr.msra.gmra.mrb[28].mxu0 %vm280_vm2, %v4145_v38 }
0x1641   :  { %5451 = vmatpush3.bf16.msra.mxu0 %v5450_v41  ;;  %5334 = vmatprep.mubr.msk.f32.mxu0 %vm5892_vm1, %v5891_v8 }
0x1642   :  { %5337 = vmatprep.subr.mxu0 %v5891_v8 }
0x1644   :  { %5335 = vmatmul.mubr.msk.f32.vlgmr.msra.gmra.mrb[32].mxu0 %vm2557_vm4, %v5654_v62 }
0x1645   :  { %5338 = vmatpush3.msra.mxu0 %v6606_v29  ;;  %5339 = vmatprep.mubr.msk.f32.mxu0 %vm5892_vm1, %v5891_v8  ;;  %v4493_v29 = vmul.f32 0.03125, %v4489_v51 }
0x1646   :  { %5461 = vmatprep.subr.bf16.mxu0 %v5460_v55 }
0x1647   :  { %v4495_v11 = vsub.f32 %v4485_v25, %v4493_v29  ;;  %v4627_v25 = vld [vmem:[%s6748_s16 + $0x20] sm:$0xff] }
0x1648   :  { %v5468_v7 = vpack.c.bf16 %v4628_v26, %v4627_v25 }
0x1649   :  { %v4497_v5 = vmul.f32 %v4495_v11, %v4495_v11 }
0x164b   :  { %v4499_v56 = vsel %vm194_vm0, %v4497_v5, 0.0 }
0x1717   :  { %v4391_v9 = vpop.f32.mrb[32].mxu0 }
0x1718   :  { %v4395_v40 = vmul.f32 %v4391_v9, %v4315_v46  ;;  %v5336_v47 = vpop.f32.mrb[33].mxu0 }
0x171a   :  { %5340 = vmatmul.mubr.msk.f32.vlgmr.msra.gmra.mrb[28].mxu0 %vm280_vm2, %v4395_v40 }
0x171b   :  { %5463 = vmatpush3.bf16.msra.mxu0 %v5460_v55 }
0x171c   :  { %5465 = vmatprep.subr.bf16.mxu0 %v5464_v24 }
0x171f   :  { %5467 = vmatpush3.bf16.msra.mxu0 %v5464_v24 }
0x1720   :  { %5469 = vmatprep.subr.bf16.mxu0 %v5468_v7 }
0x1723   :  { %5471 = vmatpush3.bf16.msra.mxu0 %v5468_v7 }
0x1724   :  { %5473 = vmatprep.subr.bf16.mxu0 %v5472_v35 }
0x1727   :  { %5475 = vmatpush3.bf16.msra.mxu0 %v5472_v35 }
0x17ed   :  { %v4466_v48 = vpop.f32.mrb[28].mxu0 }
0x17ee   :  { %4471 = vst.msk [vmem:[#allocation2 + $0x8] sm:$0xff] %vm194_vm0, %v4466_v48  ;;  %v5341_v49 = vpop.f32.mrb[29].mxu0 }
0x17f5   :  { %v4473_v52 = vld [vmem:[#allocation2 + $0x8] sm:$0xff] }
0x17f6   :  { %v4482_v8 = vadd.f32 %v6636_v14, %v4473_v52  ;;  %v5452_v14 = vpack.c.bf16 %v4530_v12, %v4529_v10 }
0x17f8   :  { %v4486_v42 = vadd.f32 %v4482_v8, %v6421_v50  ;;  %v4876_v50 = vld [vmem:[%s6752_s20] ss:$0 sm:$0xff]  ;;  %5453 = vmatprep.subr.bf16.mxu1 %v5452_v14 }
0x17f9   :  { %5455 = vmatpush3.bf16.msra.mxu1 %v5452_v14 }
0x17fa   :  { %v4490_v53 = vsel %vm194_vm0, %v4486_v42, 0.0  ;;  %5457 = vmatprep.subr.bf16.mxu1 %v5456_v13 }
0x17fb   :  { %4491 = vadd.xlane.f32.xlu0 %v4490_v53 }
0x17fd   :  { %5459 = vmatpush3.bf16.msra.mxu1 %v5456_v13 }
0x17ff   :  { %4500 = vadd.xlane.f32.xlu0 %v4499_v56 }
0x1888   :  { %v4492_v57 = vpop.xlane.xlu0 %4491 }
0x1889   :  { %v4494_v59 = vmul.f32 0.03125, %v4492_v57 }
0x188b   :  { %v4496_v60 = vsub.f32 %v4486_v42, %v4494_v59 }
0x188c   :  { %v4501_v61 = vpop.xlane.xlu0 %4500 }
0x188d   :  { %v4505_v63 = vmul.f32 0.03125, %v4501_v61  ;;  %v4498_v62 = vmul.f32 %v4496_v60, %v4496_v60 }
0x188f   :  { %v4507_v0 = vadd.f32 1e-05, %v4505_v63  ;;  %v4502_v1 = vsel %vm194_vm0, %v4498_v62, 0.0 }
0x1890   :  { %4503 = vadd.xlane.f32.xlu0 %v4502_v1 }
0x1891   :  { %5663 = vrsqrt.f32 %v4507_v0 }
0x189b   :  { %v5664_v17 = vpop.eup %5663 }
0x189c   :  { %v4511_v2 = vmul.f32 %v5664_v17, %v4495_v11  ;;  %v4884_v17 = vld [vmem:[%s6754_s22] ss:$0 sm:$0xff] }
0x189e   :  { %v4519_v4 = vmul.f32 %v4876_v50, %v4511_v2 }
0x18a0   :  { %v4527_v6 = vadd.f32 %v4877_v3, %v4519_v4  ;;  %v4885_v4 = vld [vmem:[%s6755_s23] ss:$0 sm:$0xff] }
0x18a2   :  { %5350 = vmatprep.mubr.msk.f32.mxu1 %vm194_vm0, %v4527_v6 }
0x191d   :  { %v4504_v27 = vpop.xlane.xlu0 %4503 }
0x191e   :  { %v4506_v28 = vmul.f32 0.03125, %v4504_v27 }
0x1920   :  { %v4508_v58 = vadd.f32 1e-05, %v4506_v28 }
0x1922   :  { %5665 = vrsqrt.f32 %v4508_v58 }
0x192c   :  { %v5666_v30 = vpop.eup %5665 }
0x192d   :  { %v4512_v33 = vmul.f32 %v5666_v30, %v4496_v60 }
0x192f   :  { %v4520_v20 = vmul.f32 %v4876_v50, %v4512_v33 }
0x1931   :  { %v4528_v31 = vadd.f32 %v4877_v3, %v4520_v20 }
0x1933   :  { %5351 = vmatmul.mubr.msk.f32.vlgmr.msra.gmra.mrb[46].mxu1 %vm194_vm0, %v4528_v31 }
0x1a06   :  { %v5352_v36 = vpop.f32.mrb[46].mxu1 }
0x1a07   :  { %v4618_v37 = vadd.f32 %v5352_v36, %v4878_v15  ;;  %v4612_v38 = vpop.f32.mrb[47].mxu1 }
0x1a08   :  { %v4613_v39 = vadd.f32 %v4878_v15, %v4612_v38 }
0x1a09   :  { %v4622_v45 = vmax.f32 %v4618_v37, 0.0 }
0x1a0a   :  { %v4621_v41 = vmax.f32 %v4613_v39, 0.0 }
0x1a0c   :  { %5369 = vmatprep.mubr.msk.f32.mxu0 %vm4638_vm5, %v4621_v41 }
0x1a0d   :  { %5370 = vmatmul.mubr.msk.f32.vlgmr.msra.gmra.mrb[34].mxu0 %vm4638_vm5, %v4622_v45 }
0x1ae0   :  { %v5371_v43 = vpop.f32.mrb[34].mxu0 }
0x1ae1   :  { %v4717_v44 = vadd.f32 %v5371_v43, %v4881_v54  ;;  %v4711_v46 = vpop.f32.mrb[35].mxu0 }
0x1ae2   :  { %v4712_v9 = vadd.f32 %v4881_v54, %v4711_v46 }
0x1ae3   :  { %v4723_v40 = vadd.f32 %v4717_v44, %v4528_v31 }
0x1ae4   :  { %v4722_v47 = vadd.f32 %v4712_v9, %v4527_v6 }
0x1ae5   :  { %v4727_v48 = vsel %vm194_vm0, %v4723_v40, 0.0 }
0x1ae6   :  { %4728 = vadd.xlane.f32.xlu0 %v4727_v48  ;;  %v4724_v49 = vsel %vm194_vm0, %v4722_v47, 0.0 }
0x1ae7   :  { %4725 = vadd.xlane.f32.xlu1 %v4724_v49 }
0x1b73   :  { %v4729_v51 = vpop.xlane.xlu0 %4728 }
0x1b74   :  { %v4731_v29 = vmul.f32 0.03125, %v4729_v51  ;;  %v4726_v52 = vpop.xlane.xlu1 %4725 }
0x1b75   :  { %v4730_v11 = vmul.f32 0.03125, %v4726_v52 }
0x1b76   :  { %v4733_v8 = vsub.f32 %v4723_v40, %v4731_v29 }
0x1b77   :  { %v4732_v42 = vsub.f32 %v4722_v47, %v4730_v11 }
0x1b78   :  { %v4735_v53 = vmul.f32 %v4733_v8, %v4733_v8 }
0x1b79   :  { %v4734_v5 = vmul.f32 %v4732_v42, %v4732_v42 }
0x1b7a   :  { %v4739_v56 = vsel %vm194_vm0, %v4735_v53, 0.0 }
0x1b7b   :  { %4740 = vadd.xlane.f32.xlu0 %v4739_v56  ;;  %v4736_v57 = vsel %vm194_vm0, %v4734_v5, 0.0 }
0x1b7c   :  { %4737 = vadd.xlane.f32.xlu1 %v4736_v57 }
0x1c08   :  { %v4741_v59 = vpop.xlane.xlu0 %4740 }
0x1c09   :  { %v4743_v60 = vmul.f32 0.03125, %v4741_v59  ;;  %v4738_v61 = vpop.xlane.xlu1 %4737 }
0x1c0a   :  { %v4742_v63 = vmul.f32 0.03125, %v4738_v61 }
0x1c0b   :  { %v4745_v62 = vadd.f32 1e-05, %v4743_v60 }
0x1c0c   :  { %v4744_v0 = vadd.f32 1e-05, %v4742_v63 }
0x1c0d   :  { %5667 = vrsqrt.f32 %v4745_v62 }
0x1c0e   :  { %5669 = vrsqrt.f32 %v4744_v0 }
0x1c17   :  { %v5668_v1 = vpop.eup %5667 }
0x1c18   :  { %v5670_v50 = vpop.eup %5669  ;;  %v4749_v2 = vmul.f32 %v5668_v1, %v4733_v8 }
0x1c19   :  { %v4748_v3 = vmul.f32 %v5670_v50, %v4732_v42 }
0x1c1a   :  { %v4757_v6 = vmul.f32 %v4884_v17, %v4749_v2 }
0x1c1b   :  { %v4756_v10 = vmul.f32 %v4884_v17, %v4748_v3 }
0x1c1c   :  { %v4765_v12 = vadd.f32 %v4885_v4, %v4757_v6 }
0x1c1d   :  { %v4764_v14 = vadd.f32 %v4885_v4, %v4756_v10 }
0x1c1e   :  { %4767 = vst.msk [vmem:[#allocation17 + $0x8] sm:$0xff] %vm194_vm0, %v4765_v12 }
0x1c1f   :  { %4766 = vst.msk [vmem:[#allocation17] sm:$0xff] %vm194_vm0, %v4764_v14 }
0x1c20   :  { %5858 = shalt.err (!%p5855_p12)
}
0x1c21   :  { %s6786_s14 = sld [smem:[#allocation33_spill]] }
0x1c27   :  { %s5859_s0 = scalar_lea.hbm %s6786_s14, 256 }
0x1c28   :  { %p5860_p13 = scmp.ne.s32.totalorder %s6786_s14, %s5859_s0  ;;  %p5863_p0 = scmp.lt.u32.totalorder %s5859_s0, %s6786_s14 }
0x1c2a   :  { %p5865_p1 = pnand %p5863_p0, %p5860_p13 }
0x1c2c   :  { %5868 = shalt.err (!%p5865_p1)
}
0x1c2d   :  { %4779 = dma.vmem_to_hbm [thread:$0]  %s4774_s27, 256, %s6786_s14, [#allocation5], %s5882_s3, %s5882_s3, %s5883_s25  }
0x1c2e   :  { %5879 = dma.done.wait [#allocation5], 256  }
0x1c2f   :  { %5880 = vsyncadd [#allocation5], 4294967040 }
0x1c30   :  { %4783 = vsyncpa [#allocation4], 1 }
0x1c31   :  { %4784 = vsyncpa [#allocation7], 1 }
0x1c32   :  { %4785 = vsyncpa [#allocation10], 1 }
0x1c33   :  { %4786 = vsyncpa [#allocation13], 1 }
0x1c34   :  { %4787 = vsyncpa [#allocation16], 1 }
0x1c35   :  { %4788 = vsyncpa [#allocation5], 1 }

</bundles_post_ra>
